<compile_context>
chip_gen: v6e
topology: v6e:2x2x1
jax: 0.10.0
libtpu: 0.0.40
codegen_flags: <defaults>
</compile_context>

<pallas_src>
import functools

import jax
import jax.numpy as jnp
from jax.experimental import pallas as pl
from jax.experimental.pallas import tpu as pltpu


_HIDDEN_DIMS = (256, 512, 1024, 512, 256)
_LANE = 128


def _cdiv(a, b):
    return (a + b - 1) // b


def _round_up(x, m):
    return _cdiv(x, m) * m


# ----------------------------- Pallas kernel --------------------------------
def _mlp_kernel(x_ref,
                w1_ref, s1_ref, b1_ref,
                w2_ref, s2_ref, b2_ref,
                w3_ref, s3_ref, b3_ref,
                w4_ref, s4_ref, b4_ref,
                w5_ref, s5_ref, b5_ref,
                w6_ref, s6_ref,
                o_ref):
    """Fused 6-layer MLP on one (TM, input_dim) row tile.

    int8 weights -> bf16 on the VPU, bf16 x bf16 MXU matmul with f32
    accumulation; per-output-column scale + bias + ReLU in f32; activations
    cast to bf16 exactly once per layer.
    """
    h = x_ref[...].astype(jnp.bfloat16)                       # (TM, in_dim)

    def layer(h, w_ref, s_ref, b_ref):
        acc = jnp.dot(h, w_ref[...].astype(jnp.bfloat16),
                      preferred_element_type=jnp.float32)
        acc = acc * s_ref[...] + b_ref[...]
        return jnp.maximum(acc, 0.0).astype(jnp.bfloat16)

    h = layer(h, w1_ref, s1_ref, b1_ref)
    h = layer(h, w2_ref, s2_ref, b2_ref)
    h = layer(h, w3_ref, s3_ref, b3_ref)
    h = layer(h, w4_ref, s4_ref, b4_ref)
    h = layer(h, w5_ref, s5_ref, b5_ref)

    # Final Linear (bias-free).  Columns are zero-padded to 128 so this store
    # is lane-dense (no masked vst); the wrapper slices the real columns out.
    o_ref[...] = jnp.dot(h, w6_ref[...].astype(jnp.bfloat16),
                         preferred_element_type=jnp.float32) * s6_ref[...]


def _vmem_capacity_bytes():
    try:
        return int(pltpu.get_tpu_info().vmem_capacity_bytes)
    except Exception:
        return 64 * 1024 * 1024   # conservative: assume the smallest (v7x) part


def _run_mlp(x, params):
    """x: (M, input_dim) f32  ->  (M, out_pad) f32 (padded columns are zero)."""
    m, in_dim = x.shape
    out_pad = params["w6_q"].shape[1]

    # Part-adaptive row-tile cap and VMEM limit.
    vmem_cap = _vmem_capacity_bytes()
    if vmem_cap >= 100 * 1024 * 1024:        # v5e / v6e: 128 MiB VMEM per TC
        tm_max, vmem_limit = 2048, 96 * 1024 * 1024
    else:                                    # v7x: 64 MiB VMEM per TC
        tm_max, vmem_limit = 512, 48 * 1024 * 1024

    # Balanced batch tiles: padding bounded to < 8 rows per tile.
    n_chunks = max(1, _cdiv(m, tm_max))
    tm = _round_up(_cdiv(m, n_chunks), 8)
    m_pad = _round_up(m, tm)
    if m_pad != m:
        x = jnp.pad(x, ((0, m_pad - m), (0, 0)))
    n_tiles = m_pad // tm
    grid = (n_tiles,)

    row_map = lambda i: (i, 0)
    const_map = lambda i: (0, 0)
    # Constant-index-map operands: fetched once, single VMEM buffer (no dead
    # second pipeline buffer).
    resident = dict(pipeline_mode=pl.Buffered(1))

    layer_dims = list(zip((in_dim,) + _HIDDEN_DIMS, _HIDDEN_DIMS + (out_pad,)))

    in_specs = [pl.BlockSpec((tm, in_dim), row_map)]
    operands = [x]
    for li, (k_in, k_out) in enumerate(layer_dims, start=1):
        in_specs.append(pl.BlockSpec((k_in, k_out), const_map, **resident))
        operands.append(params[f"w{li}_q"])
        in_specs.append(pl.BlockSpec((1, k_out), const_map, **resident))
        operands.append(params[f"s{li}"])
        if li <= len(_HIDDEN_DIMS):          # last Linear is bias-free
            in_specs.append(pl.BlockSpec((1, k_out), const_map, **resident))
            operands.append(params[f"b{li}"])

    # Megacore sharding only when each core's weight re-fetch is amortized
    # over enough rows (v7x TensorCores have private VMEM).
    semantics = ("parallel",) if n_tiles >= 4 else ("arbitrary",)

    # Advisory cost estimate for XLA's scheduler.
    flops = 2 * m_pad * sum(k * n for k, n in layer_dims)
    weight_bytes = sum(int(params[f"w{i}_q"].size) for i in range(1, 7))   # int8
    small_bytes = sum(int(params[f"s{i}"].size) * 4 for i in range(1, 7))
    small_bytes += sum(int(params[f"b{i}"].size) * 4 for i in range(1, 6))
    bytes_accessed = (weight_bytes + small_bytes
                      + int(x.size) * 4 + m_pad * out_pad * 4)

    out = pl.pallas_call(
        _mlp_kernel,
        out_shape=jax.ShapeDtypeStruct((m_pad, out_pad), jnp.float32),
        grid_spec=pltpu.PrefetchScalarGridSpec(
            num_scalar_prefetch=0,
            grid=grid,
            in_specs=in_specs,
            out_specs=pl.BlockSpec((tm, out_pad), row_map),
        ),
        compiler_params=pltpu.CompilerParams(
            dimension_semantics=semantics,
            vmem_limit_bytes=vmem_limit,
        ),
        cost_estimate=pl.CostEstimate(
            flops=flops, transcendentals=0, bytes_accessed=bytes_accessed),
    )(*operands)

    return out[:m]


# ------------------------------ Poly forward ---------------------------------
def _featurize(pos, target, feat_aug):
    if feat_aug == "dist":
        dist = jnp.linalg.norm(pos - target, axis=-1, keepdims=True)      # (B,P,1)
        return jnp.concatenate([pos, dist], axis=-1)                      # (B,P,4)
    elif feat_aug == "rel_pos":
        return jnp.concatenate([pos, pos - target], axis=-1)              # (B,P,6)
    elif feat_aug == "norm_rel_pos":
        rel = pos - target  # NOTE: no eps, matching the PyTorch reference
        return jnp.concatenate(
            [pos, rel / jnp.linalg.norm(rel, axis=-1, keepdims=True)], axis=-1)
    return pos


def poly_forward(pos, target, params, *, feat_aug="dist", force=True):
    """JAX/Pallas equivalent of Poly.forward (force=True path).

    pos, target: (B, P, 3) float32   ->   (B, P, 3) float32
    """
    if not force:
        raise NotImplementedError("force=False path needs autograd through the kernel")

    pos_ = _featurize(pos, target, feat_aug)
    input_dim = params["w1_q"].shape[0]
    x = pos_.reshape(-1, input_dim).astype(jnp.float32)       # (M, input_dim)

    out = _run_mlp(x, params)                                 # (M, out_pad)
    out_dim = pos.shape[-2] * pos.shape[-1]                   # force=True: P*3
    return out[:, :out_dim].reshape(pos.shape)


# --------------------------- deterministic params ----------------------------
def init_params_f32(key, input_dim, output_dim):
    """Deterministic f32 init mimicking nn.Linear shapes (weights (in, out))."""
    dims = [input_dim] + list(_HIDDEN_DIMS) + [output_dim]
    params = {}
    keys = jax.random.split(key, 2 * (len(dims) - 1))
    for i in range(len(dims) - 1):
        fan_in, fan_out = dims[i], dims[i + 1]
        scale = 1.0 / jnp.sqrt(jnp.float32(fan_in))
        params[f"w{i + 1}"] = jax.random.uniform(
            keys[2 * i], (fan_in, fan_out), minval=-scale, maxval=scale,
            dtype=jnp.float32)
        if i < len(dims) - 2:  # last Linear has bias=False
            params[f"b{i + 1}"] = jax.random.uniform(
                keys[2 * i + 1], (1, fan_out), minval=-scale, maxval=scale,
                dtype=jnp.float32)
    params["log_z"] = jnp.float32(0.0)  # exists in the module, unused in forward()
    return params


def quantize_params(params_f32, *, out_pad=None):
    """Per-output-column symmetric int8 quantization of the MLP weights.

    The last Linear's columns are zero-padded to `out_pad` (multiple of 128)
    so the kernel's output store is lane-dense.  Biases stay f32.
    """
    q = {"log_z": params_f32["log_z"]}
    n_layers = len(_HIDDEN_DIMS) + 1
    for i in range(1, n_layers + 1):
        w = params_f32[f"w{i}"]
        if i == n_layers and out_pad is not None and w.shape[1] < out_pad:
            w = jnp.pad(w, ((0, 0), (0, out_pad - w.shape[1])))
        amax = jnp.max(jnp.abs(w), axis=0, keepdims=True)
        scale = jnp.maximum(amax / 127.0, 1e-12)
        q[f"w{i}_q"] = jnp.clip(jnp.round(w / scale), -127.0, 127.0).astype(jnp.int8)
        q[f"s{i}"] = scale.astype(jnp.float32)
        if i <= len(_HIDDEN_DIMS):
            q[f"b{i}"] = params_f32[f"b{i}"].astype(jnp.float32)
    return q


# ------------------------- pure-JAX references (checks) -----------------------
def _poly_reference_quant(pos, target, params, *, feat_aug="dist"):
    """Reference using the SAME int8 weights / bf16 casts as the kernel."""
    x = _featurize(pos, target, feat_aug).reshape(
        -1, params["w1_q"].shape[0]).astype(jnp.float32)
    h = x.astype(jnp.bfloat16)
    for i in range(1, 6):
        acc = jnp.dot(h, params[f"w{i}_q"].astype(jnp.bfloat16),
                      preferred_element_type=jnp.float32)
        h = jnp.maximum(acc * params[f"s{i}"] + params[f"b{i}"],
                        0.0).astype(jnp.bfloat16)
    out = jnp.dot(h, params["w6_q"].astype(jnp.bfloat16),
                  preferred_element_type=jnp.float32) * params["s6"]
    out_dim = pos.shape[-2] * pos.shape[-1]
    return out[:, :out_dim].reshape(pos.shape)


def _poly_reference_f32(pos, target, params_f32, *, feat_aug="dist"):
    """Full-precision reference matching the original PyTorch module."""
    x = _featurize(pos, target, feat_aug).reshape(-1, params_f32["w1"].shape[0])
    h = x
    for i in range(1, 6):
        h = jnp.maximum(h @ params_f32[f"w{i}"] + params_f32[f"b{i}"], 0.0)
    out = h @ params_f32["w6"]
    return out.reshape(pos.shape)


# ---------------------------------- main --------------------------------------
if __name__ == "__main__":
    B = 8               # batch
    P = 8               # md.num_particles
    FEAT_AUG = "dist"   # args.feat_aug
    FORCE = True        # args.force

    if FEAT_AUG == "dist":
        input_dim = P * (3 + 1)
    elif FEAT_AUG in ("rel_pos", "norm_rel_pos"):
        input_dim = P * (3 + 3)
    else:
        input_dim = P * 3
    output_dim = P * 3 if FORCE else 1
    assert output_dim == P * 3, "force=True requires output_dim == P*3"

    key = jax.random.PRNGKey(0)
    k_pos, k_tgt, k_par = jax.random.split(key, 3)

    pos = jax.random.normal(k_pos, (B, P, 3), dtype=jnp.float32)
    target = jax.random.normal(k_tgt, (B, P, 3), dtype=jnp.float32)

    params_f32 = init_params_f32(k_par, input_dim, output_dim)
    params = quantize_params(params_f32, out_pad=_round_up(output_dim, _LANE))

    fwd = jax.jit(functools.partial(poly_forward, feat_aug=FEAT_AUG, force=FORCE))
    force_out = fwd(pos, target, params)
    jax.block_until_ready(force_out)

    # shape / dtype sanity (force=True path)
    assert force_out.shape == pos.shape, force_out.shape
    assert force_out.dtype == jnp.float32

    # 1) kernel correctness: pure-JAX path with identical int8 weights / casts.
    ref_q = jax.jit(functools.partial(_poly_reference_quant, feat_aug=FEAT_AUG))(
        pos, target, params)
    jax.block_until_ready(ref_q)
    assert jnp.allclose(force_out, ref_q, rtol=1e-2, atol=1e-3), (
        float(jnp.max(jnp.abs(force_out - ref_q))))

    # 2) quantization accuracy: relative error vs the full-f32 Poly forward.
    ref_f32 = jax.jit(functools.partial(_poly_reference_f32, feat_aug=FEAT_AUG))(
        pos, target, params_f32)
    jax.block_until_ready(ref_f32)
    rel_err = float(jnp.linalg.norm(force_out - ref_f32)
                    / (jnp.linalg.norm(ref_f32) + 1e-12))
    assert rel_err < 0.1, rel_err

    print("KERNEL_OK")
</pallas_src>

<mosaic_0001>
module attributes {stable_mosaic.version = 11 : i64} {
  func.func @_mlp_kernel(%arg0: i32, %arg1: memref<8x32xf32, #tpu.memory_space<vmem>>, %arg2: memref<32x256xi8, #tpu.memory_space<vmem>>, %arg3: memref<1x256xf32, #tpu.memory_space<vmem>>, %arg4: memref<1x256xf32, #tpu.memory_space<vmem>>, %arg5: memref<256x512xi8, #tpu.memory_space<vmem>>, %arg6: memref<1x512xf32, #tpu.memory_space<vmem>>, %arg7: memref<1x512xf32, #tpu.memory_space<vmem>>, %arg8: memref<512x1024xi8, #tpu.memory_space<vmem>>, %arg9: memref<1x1024xf32, #tpu.memory_space<vmem>>, %arg10: memref<1x1024xf32, #tpu.memory_space<vmem>>, %arg11: memref<1024x512xi8, #tpu.memory_space<vmem>>, %arg12: memref<1x512xf32, #tpu.memory_space<vmem>>, %arg13: memref<1x512xf32, #tpu.memory_space<vmem>>, %arg14: memref<512x256xi8, #tpu.memory_space<vmem>>, %arg15: memref<1x256xf32, #tpu.memory_space<vmem>>, %arg16: memref<1x256xf32, #tpu.memory_space<vmem>>, %arg17: memref<256x128xi8, #tpu.memory_space<vmem>>, %arg18: memref<1x128xf32, #tpu.memory_space<vmem>>, %arg19: memref<8x128xf32, #tpu.memory_space<vmem>>) attributes {dimension_semantics = [#tpu.dimension_semantics<arbitrary>], iteration_bounds = array<i64: 1>, scalar_prefetch = 0 : i64, scratch_operands = 0 : i64, tpu.core_type = #tpu.core_type<tc>, window_params = [{transform_indices = @transform_0, window_bounds = array<i64: 8, 32>}, {pipeline_mode = #tpu.pipeline_mode<synchronous>, transform_indices = @transform_1, window_bounds = array<i64: 32, 256>}, {pipeline_mode = #tpu.pipeline_mode<synchronous>, transform_indices = @transform_2, window_bounds = array<i64: 1, 256>}, {pipeline_mode = #tpu.pipeline_mode<synchronous>, transform_indices = @transform_3, window_bounds = array<i64: 1, 256>}, {pipeline_mode = #tpu.pipeline_mode<synchronous>, transform_indices = @transform_4, window_bounds = array<i64: 256, 512>}, {pipeline_mode = #tpu.pipeline_mode<synchronous>, transform_indices = @transform_5, window_bounds = array<i64: 1, 512>}, {pipeline_mode = #tpu.pipeline_mode<synchronous>, transform_indices = @transform_6, window_bounds = array<i64: 1, 512>}, {pipeline_mode = #tpu.pipeline_mode<synchronous>, transform_indices = @transform_7, window_bounds = array<i64: 512, 1024>}, {pipeline_mode = #tpu.pipeline_mode<synchronous>, transform_indices = @transform_8, window_bounds = array<i64: 1, 1024>}, {pipeline_mode = #tpu.pipeline_mode<synchronous>, transform_indices = @transform_9, window_bounds = array<i64: 1, 1024>}, {pipeline_mode = #tpu.pipeline_mode<synchronous>, transform_indices = @transform_10, window_bounds = array<i64: 1024, 512>}, {pipeline_mode = #tpu.pipeline_mode<synchronous>, transform_indices = @transform_11, window_bounds = array<i64: 1, 512>}, {pipeline_mode = #tpu.pipeline_mode<synchronous>, transform_indices = @transform_12, window_bounds = array<i64: 1, 512>}, {pipeline_mode = #tpu.pipeline_mode<synchronous>, transform_indices = @transform_13, window_bounds = array<i64: 512, 256>}, {pipeline_mode = #tpu.pipeline_mode<synchronous>, transform_indices = @transform_14, window_bounds = array<i64: 1, 256>}, {pipeline_mode = #tpu.pipeline_mode<synchronous>, transform_indices = @transform_15, window_bounds = array<i64: 1, 256>}, {pipeline_mode = #tpu.pipeline_mode<synchronous>, transform_indices = @transform_16, window_bounds = array<i64: 256, 128>}, {pipeline_mode = #tpu.pipeline_mode<synchronous>, transform_indices = @transform_17, window_bounds = array<i64: 1, 128>}, {transform_indices = @transform_18, window_bounds = array<i64: 8, 128>}]} {
    %c0 = arith.constant 0 : index
    %c0_0 = arith.constant 0 : index
    %0 = vector.load %arg1[%c0, %c0_0] : memref<8x32xf32, #tpu.memory_space<vmem>>, vector<8x32xf32>
    %1 = arith.truncf %0 : vector<8x32xf32> to vector<8x32xbf16>
    %c0_1 = arith.constant 0 : index
    %c0_2 = arith.constant 0 : index
    %2 = vector.load %arg2[%c0_1, %c0_2] : memref<32x256xi8, #tpu.memory_space<vmem>>, vector<32x256xi8>
    %3 = arith.sitofp %2 : vector<32x256xi8> to vector<32x256xbf16>
    %cst = arith.constant dense<0.000000e+00> : vector<8x256xf32>
    %4 = tpu.matmul %1, %3, %cst {dimension_numbers = #tpu.dot_dimension_numbers<[1], [0], [0], [1], [0, 0, 1, 1], [], []>} : vector<8x32xbf16>, vector<32x256xbf16>, vector<8x256xf32> -> vector<8x256xf32>
    %c0_3 = arith.constant 0 : index
    %c0_4 = arith.constant 0 : index
    %5 = vector.load %arg3[%c0_3, %c0_4] : memref<1x256xf32, #tpu.memory_space<vmem>>, vector<1x256xf32>
    %6 = vector.broadcast %5 : vector<1x256xf32> to vector<8x256xf32>
    %7 = arith.mulf %4, %6 : vector<8x256xf32>
    %c0_5 = arith.constant 0 : index
    %c0_6 = arith.constant 0 : index
    %8 = vector.load %arg4[%c0_5, %c0_6] : memref<1x256xf32, #tpu.memory_space<vmem>>, vector<1x256xf32>
    %9 = vector.broadcast %8 : vector<1x256xf32> to vector<8x256xf32>
    %10 = arith.addf %7, %9 : vector<8x256xf32>
    %cst_7 = arith.constant 0.000000e+00 : f32
    %11 = vector.broadcast %cst_7 : f32 to vector<8x256xf32>
    %12 = arith.maximumf %10, %11 : vector<8x256xf32>
    %13 = arith.truncf %12 : vector<8x256xf32> to vector<8x256xbf16>
    %c0_8 = arith.constant 0 : index
    %c0_9 = arith.constant 0 : index
    %14 = vector.load %arg5[%c0_8, %c0_9] : memref<256x512xi8, #tpu.memory_space<vmem>>, vector<256x512xi8>
    %15 = arith.sitofp %14 : vector<256x512xi8> to vector<256x512xbf16>
    %cst_10 = arith.constant dense<0.000000e+00> : vector<8x512xf32>
    %16 = tpu.matmul %13, %15, %cst_10 {dimension_numbers = #tpu.dot_dimension_numbers<[1], [0], [0], [1], [0, 0, 1, 1], [], []>} : vector<8x256xbf16>, vector<256x512xbf16>, vector<8x512xf32> -> vector<8x512xf32>
    %c0_11 = arith.constant 0 : index
    %c0_12 = arith.constant 0 : index
    %17 = vector.load %arg6[%c0_11, %c0_12] : memref<1x512xf32, #tpu.memory_space<vmem>>, vector<1x512xf32>
    %18 = vector.broadcast %17 : vector<1x512xf32> to vector<8x512xf32>
    %19 = arith.mulf %16, %18 : vector<8x512xf32>
    %c0_13 = arith.constant 0 : index
    %c0_14 = arith.constant 0 : index
    %20 = vector.load %arg7[%c0_13, %c0_14] : memref<1x512xf32, #tpu.memory_space<vmem>>, vector<1x512xf32>
    %21 = vector.broadcast %20 : vector<1x512xf32> to vector<8x512xf32>
    %22 = arith.addf %19, %21 : vector<8x512xf32>
    %cst_15 = arith.constant 0.000000e+00 : f32
    %23 = vector.broadcast %cst_15 : f32 to vector<8x512xf32>
    %24 = arith.maximumf %22, %23 : vector<8x512xf32>
    %25 = arith.truncf %24 : vector<8x512xf32> to vector<8x512xbf16>
    %c0_16 = arith.constant 0 : index
    %c0_17 = arith.constant 0 : index
    %26 = vector.load %arg8[%c0_16, %c0_17] : memref<512x1024xi8, #tpu.memory_space<vmem>>, vector<512x1024xi8>
    %27 = arith.sitofp %26 : vector<512x1024xi8> to vector<512x1024xbf16>
    %cst_18 = arith.constant dense<0.000000e+00> : vector<8x1024xf32>
    %28 = tpu.matmul %25, %27, %cst_18 {dimension_numbers = #tpu.dot_dimension_numbers<[1], [0], [0], [1], [0, 0, 1, 1], [], []>} : vector<8x512xbf16>, vector<512x1024xbf16>, vector<8x1024xf32> -> vector<8x1024xf32>
    %c0_19 = arith.constant 0 : index
    %c0_20 = arith.constant 0 : index
    %29 = vector.load %arg9[%c0_19, %c0_20] : memref<1x1024xf32, #tpu.memory_space<vmem>>, vector<1x1024xf32>
    %30 = vector.broadcast %29 : vector<1x1024xf32> to vector<8x1024xf32>
    %31 = arith.mulf %28, %30 : vector<8x1024xf32>
    %c0_21 = arith.constant 0 : index
    %c0_22 = arith.constant 0 : index
    %32 = vector.load %arg10[%c0_21, %c0_22] : memref<1x1024xf32, #tpu.memory_space<vmem>>, vector<1x1024xf32>
    %33 = vector.broadcast %32 : vector<1x1024xf32> to vector<8x1024xf32>
    %34 = arith.addf %31, %33 : vector<8x1024xf32>
    %cst_23 = arith.constant 0.000000e+00 : f32
    %35 = vector.broadcast %cst_23 : f32 to vector<8x1024xf32>
    %36 = arith.maximumf %34, %35 : vector<8x1024xf32>
    %37 = arith.truncf %36 : vector<8x1024xf32> to vector<8x1024xbf16>
    %c0_24 = arith.constant 0 : index
    %c0_25 = arith.constant 0 : index
    %38 = vector.load %arg11[%c0_24, %c0_25] : memref<1024x512xi8, #tpu.memory_space<vmem>>, vector<1024x512xi8>
    %39 = arith.sitofp %38 : vector<1024x512xi8> to vector<1024x512xbf16>
    %cst_26 = arith.constant dense<0.000000e+00> : vector<8x512xf32>
    %40 = tpu.matmul %37, %39, %cst_26 {dimension_numbers = #tpu.dot_dimension_numbers<[1], [0], [0], [1], [0, 0, 1, 1], [], []>} : vector<8x1024xbf16>, vector<1024x512xbf16>, vector<8x512xf32> -> vector<8x512xf32>
    %c0_27 = arith.constant 0 : index
    %c0_28 = arith.constant 0 : index
    %41 = vector.load %arg12[%c0_27, %c0_28] : memref<1x512xf32, #tpu.memory_space<vmem>>, vector<1x512xf32>
    %42 = vector.broadcast %41 : vector<1x512xf32> to vector<8x512xf32>
    %43 = arith.mulf %40, %42 : vector<8x512xf32>
    %c0_29 = arith.constant 0 : index
    %c0_30 = arith.constant 0 : index
    %44 = vector.load %arg13[%c0_29, %c0_30] : memref<1x512xf32, #tpu.memory_space<vmem>>, vector<1x512xf32>
    %45 = vector.broadcast %44 : vector<1x512xf32> to vector<8x512xf32>
    %46 = arith.addf %43, %45 : vector<8x512xf32>
    %cst_31 = arith.constant 0.000000e+00 : f32
    %47 = vector.broadcast %cst_31 : f32 to vector<8x512xf32>
    %48 = arith.maximumf %46, %47 : vector<8x512xf32>
    %49 = arith.truncf %48 : vector<8x512xf32> to vector<8x512xbf16>
    %c0_32 = arith.constant 0 : index
    %c0_33 = arith.constant 0 : index
    %50 = vector.load %arg14[%c0_32, %c0_33] : memref<512x256xi8, #tpu.memory_space<vmem>>, vector<512x256xi8>
    %51 = arith.sitofp %50 : vector<512x256xi8> to vector<512x256xbf16>
    %cst_34 = arith.constant dense<0.000000e+00> : vector<8x256xf32>
    %52 = tpu.matmul %49, %51, %cst_34 {dimension_numbers = #tpu.dot_dimension_numbers<[1], [0], [0], [1], [0, 0, 1, 1], [], []>} : vector<8x512xbf16>, vector<512x256xbf16>, vector<8x256xf32> -> vector<8x256xf32>
    %c0_35 = arith.constant 0 : index
    %c0_36 = arith.constant 0 : index
    %53 = vector.load %arg15[%c0_35, %c0_36] : memref<1x256xf32, #tpu.memory_space<vmem>>, vector<1x256xf32>
    %54 = vector.broadcast %53 : vector<1x256xf32> to vector<8x256xf32>
    %55 = arith.mulf %52, %54 : vector<8x256xf32>
    %c0_37 = arith.constant 0 : index
    %c0_38 = arith.constant 0 : index
    %56 = vector.load %arg16[%c0_37, %c0_38] : memref<1x256xf32, #tpu.memory_space<vmem>>, vector<1x256xf32>
    %57 = vector.broadcast %56 : vector<1x256xf32> to vector<8x256xf32>
    %58 = arith.addf %55, %57 : vector<8x256xf32>
    %cst_39 = arith.constant 0.000000e+00 : f32
    %59 = vector.broadcast %cst_39 : f32 to vector<8x256xf32>
    %60 = arith.maximumf %58, %59 : vector<8x256xf32>
    %61 = arith.truncf %60 : vector<8x256xf32> to vector<8x256xbf16>
    %c0_40 = arith.constant 0 : index
    %c0_41 = arith.constant 0 : index
    %62 = vector.load %arg17[%c0_40, %c0_41] : memref<256x128xi8, #tpu.memory_space<vmem>>, vector<256x128xi8>
    %63 = arith.sitofp %62 : vector<256x128xi8> to vector<256x128xbf16>
    %cst_42 = arith.constant dense<0.000000e+00> : vector<8x128xf32>
    %64 = tpu.matmul %61, %63, %cst_42 {dimension_numbers = #tpu.dot_dimension_numbers<[1], [0], [0], [1], [0, 0, 1, 1], [], []>} : vector<8x256xbf16>, vector<256x128xbf16>, vector<8x128xf32> -> vector<8x128xf32>
    %c0_43 = arith.constant 0 : index
    %c0_44 = arith.constant 0 : index
    %65 = vector.load %arg18[%c0_43, %c0_44] : memref<1x128xf32, #tpu.memory_space<vmem>>, vector<1x128xf32>
    %66 = vector.broadcast %65 : vector<1x128xf32> to vector<8x128xf32>
    %67 = arith.mulf %64, %66 : vector<8x128xf32>
    %c0_45 = arith.constant 0 : index
    %c0_46 = arith.constant 0 : index
    %68 = vector.load %arg19[%c0_45, %c0_46] : memref<8x128xf32, #tpu.memory_space<vmem>>, vector<8x128xf32>
    tpu.vector_store %arg19[%c0_45, %c0_46], %67 {strides = array<i32>} : memref<8x128xf32, #tpu.memory_space<vmem>>, vector<8x128xf32>,
    return
  }
  func.func @transform_0(%arg0: i32) -> (i32, i32) {
    %c0_i32 = arith.constant 0 : i32
    %c0_i32_0 = arith.constant 0 : i32
    return %arg0, %c0_i32 : i32, i32
  }
  func.func @transform_1(%arg0: i32) -> (i32, i32) {
    %c0_i32 = arith.constant 0 : i32
    %c0_i32_0 = arith.constant 0 : i32
    %c0_i32_1 = arith.constant 0 : i32
    return %c0_i32, %c0_i32_0 : i32, i32
  }
  func.func @transform_2(%arg0: i32) -> (i32, i32) {
    %c0_i32 = arith.constant 0 : i32
    %c0_i32_0 = arith.constant 0 : i32
    %c0_i32_1 = arith.constant 0 : i32
    return %c0_i32, %c0_i32_0 : i32, i32
  }
  func.func @transform_3(%arg0: i32) -> (i32, i32) {
    %c0_i32 = arith.constant 0 : i32
    %c0_i32_0 = arith.constant 0 : i32
    %c0_i32_1 = arith.constant 0 : i32
    return %c0_i32, %c0_i32_0 : i32, i32
  }
  func.func @transform_4(%arg0: i32) -> (i32, i32) {
    %c0_i32 = arith.constant 0 : i32
    %c0_i32_0 = arith.constant 0 : i32
    %c0_i32_1 = arith.constant 0 : i32
    return %c0_i32, %c0_i32_0 : i32, i32
  }
  func.func @transform_5(%arg0: i32) -> (i32, i32) {
    %c0_i32 = arith.constant 0 : i32
    %c0_i32_0 = arith.constant 0 : i32
    %c0_i32_1 = arith.constant 0 : i32
    return %c0_i32, %c0_i32_0 : i32, i32
  }
  func.func @transform_6(%arg0: i32) -> (i32, i32) {
    %c0_i32 = arith.constant 0 : i32
    %c0_i32_0 = arith.constant 0 : i32
    %c0_i32_1 = arith.constant 0 : i32
    return %c0_i32, %c0_i32_0 : i32, i32
  }
  func.func @transform_7(%arg0: i32) -> (i32, i32) {
    %c0_i32 = arith.constant 0 : i32
    %c0_i32_0 = arith.constant 0 : i32
    %c0_i32_1 = arith.constant 0 : i32
    return %c0_i32, %c0_i32_0 : i32, i32
  }
  func.func @transform_8(%arg0: i32) -> (i32, i32) {
    %c0_i32 = arith.constant 0 : i32
    %c0_i32_0 = arith.constant 0 : i32
    %c0_i32_1 = arith.constant 0 : i32
    return %c0_i32, %c0_i32_0 : i32, i32
  }
  func.func @transform_9(%arg0: i32) -> (i32, i32) {
    %c0_i32 = arith.constant 0 : i32
    %c0_i32_0 = arith.constant 0 : i32
    %c0_i32_1 = arith.constant 0 : i32
    return %c0_i32, %c0_i32_0 : i32, i32
  }
  func.func @transform_10(%arg0: i32) -> (i32, i32) {
    %c0_i32 = arith.constant 0 : i32
    %c0_i32_0 = arith.constant 0 : i32
    %c0_i32_1 = arith.constant 0 : i32
    return %c0_i32, %c0_i32_0 : i32, i32
  }
  func.func @transform_11(%arg0: i32) -> (i32, i32) {
    %c0_i32 = arith.constant 0 : i32
    %c0_i32_0 = arith.constant 0 : i32
    %c0_i32_1 = arith.constant 0 : i32
    return %c0_i32, %c0_i32_0 : i32, i32
  }
  func.func @transform_12(%arg0: i32) -> (i32, i32) {
    %c0_i32 = arith.constant 0 : i32
    %c0_i32_0 = arith.constant 0 : i32
    %c0_i32_1 = arith.constant 0 : i32
    return %c0_i32, %c0_i32_0 : i32, i32
  }
  func.func @transform_13(%arg0: i32) -> (i32, i32) {
    %c0_i32 = arith.constant 0 : i32
    %c0_i32_0 = arith.constant 0 : i32
    %c0_i32_1 = arith.constant 0 : i32
    return %c0_i32, %c0_i32_0 : i32, i32
  }
  func.func @transform_14(%arg0: i32) -> (i32, i32) {
    %c0_i32 = arith.constant 0 : i32
    %c0_i32_0 = arith.constant 0 : i32
    %c0_i32_1 = arith.constant 0 : i32
    return %c0_i32, %c0_i32_0 : i32, i32
  }
  func.func @transform_15(%arg0: i32) -> (i32, i32) {
    %c0_i32 = arith.constant 0 : i32
    %c0_i32_0 = arith.constant 0 : i32
    %c0_i32_1 = arith.constant 0 : i32
    return %c0_i32, %c0_i32_0 : i32, i32
  }
  func.func @transform_16(%arg0: i32) -> (i32, i32) {
    %c0_i32 = arith.constant 0 : i32
    %c0_i32_0 = arith.constant 0 : i32
    %c0_i32_1 = arith.constant 0 : i32
    return %c0_i32, %c0_i32_0 : i32, i32
  }
  func.func @transform_17(%arg0: i32) -> (i32, i32) {
    %c0_i32 = arith.constant 0 : i32
    %c0_i32_0 = arith.constant 0 : i32
    %c0_i32_1 = arith.constant 0 : i32
    return %c0_i32, %c0_i32_0 : i32, i32
  }
  func.func @transform_18(%arg0: i32) -> (i32, i32) {
    %c0_i32 = arith.constant 0 : i32
    %c0_i32_0 = arith.constant 0 : i32
    return %arg0, %c0_i32 : i32, i32
  }
}

</mosaic_0001>

<bundles_post_ra>
// kernel: poly_forward.1
= control target key start
LH: loop header
LB: loop body
LE: loop exit
PB: predicated region body
PF: predicated region fallthrough
CT: control target
= control target key end

     0   :  { %s3238_s0 = inlined_call_operand.vmem [shape: f32[8,32], index: 0, kind: input, shape index: {}]   ;;  %s3239_s1 = inlined_call_operand.hbm [shape: s8[32,256], index: 1, kind: input, shape index: {}]   ;;  %s3240_s2 = inlined_call_operand.hbm [shape: f32[1,256], index: 2, kind: input, shape index: {}]   ;;  %s3241_s3 = inlined_call_operand.hbm [shape: f32[1,256], index: 3, kind: input, shape index: {}]   ;;  %s3242_s4 = inlined_call_operand.vmem [shape: s8[256,512], index: 4, kind: input, shape index: {}]   ;;  %s3243_s5 = inlined_call_operand.hbm [shape: f32[1,512], index: 5, kind: input, shape index: {}]   ;;  %s3244_s6 = inlined_call_operand.hbm [shape: f32[1,512], index: 6, kind: input, shape index: {}]   ;;  %s3245_s7 = inlined_call_operand.hbm [shape: s8[512,1024], index: 7, kind: input, shape index: {}]   ;;  %s3246_s8 = inlined_call_operand.vmem [shape: f32[1,1024], index: 8, kind: input, shape index: {}]   ;;  %s3247_s9 = inlined_call_operand.hbm [shape: f32[1,1024], index: 9, kind: input, shape index: {}]   ;;  %s3248_s10 = inlined_call_operand.hbm [shape: s8[1024,512], index: 10, kind: input, shape index: {}]   ;;  %s3249_s11 = inlined_call_operand.hbm [shape: f32[1,512], index: 11, kind: input, shape index: {}]   ;;  %s3250_s12 = inlined_call_operand.hbm [shape: f32[1,512], index: 12, kind: input, shape index: {}]   ;;  %s3251_s13 = inlined_call_operand.hbm [shape: s8[512,256], index: 13, kind: input, shape index: {}]   ;;  %s3252_s14 = inlined_call_operand.hbm [shape: f32[1,256], index: 14, kind: input, shape index: {}]   ;;  %s3253_s15 = inlined_call_operand.hbm [shape: f32[1,256], index: 15, kind: input, shape index: {}]   ;;  %s3254_s16 = inlined_call_operand.hbm [shape: s8[256,128], index: 16, kind: input, shape index: {}]   ;;  %s3255_s17 = inlined_call_operand.vmem [shape: f32[1,128], index: 17, kind: input, shape index: {}]   ;;  %s3256_s18 = inlined_call_operand.vmem [shape: f32[8,128], index: 18, kind: output, shape index: {}]  }
   0x1   :  { %3257 = sst [smem:[#allocation32_spill]] %s3238_s0 }
   0x2   :  { %3258 = sst [smem:[#allocation33_spill]] %s3239_s1 }
   0x3   :  { %3259 = sst [smem:[#allocation34_spill]] %s3240_s2 }
   0x4   :  { %23 = vsyncpa [#allocation3], 0 }
   0x5   :  { %24 = vsyncpa [#allocation5], 0 }
   0x6   :  { %25 = vsyncpa [#allocation8], 0 }
   0x7   :  { %26 = vsyncpa [#allocation11], 0 }
   0x8   :  { %27 = vsyncpa [#allocation14], 0 }
   0x9   :  { %28 = vsyncpa [#allocation17], 0 }
   0xa   :  { %29 = vsyncpa [#allocation20], 0 }
   0xb   :  { %30 = vsyncpa [#allocation23], 0  ;;  %s2791_s27 = smov [#allocation4]   ;;  %s2792_s29 = smov [#allocation7]  }
   0xc   :  { %s49_s28 = sshll.u32 %s2791_s27, 4  ;;  %s71_s30 = sshll.u32 %s2792_s29, 4  ;;  %s50_s28 = int_to_ptr.vmem [resolvable:$true] %s49_s28  ;;  %s72_s30 = int_to_ptr.vmem [resolvable:$true] %s71_s30 }
   0xd   :  { %s2503_s0 = scalar_lea.vmem %s50_s28, 32  ;;  %p2508_p1 = scmp.lt.s32.totalorder %s50_s28, %s50_s28 }
   0xe   :  { %p2504_p0 = scmp.ne.s32.totalorder %s50_s28, %s2503_s0  ;;  %p2509_p2 = scmp.lt.s32.totalorder %s2503_s0, %s2503_s0 }
  0x10   :  { %p2510_p3 = por %p2509_p2, %p2508_p1 }
  0x12   :  { %p2511_p4 = pnand %p2510_p3, %p2504_p0 }
  0x14   :  { %2514 = shalt.err (!%p2511_p4)
}
  0x15   :  { %s3260_s20 = sld [smem:[#allocation34_spill]]  ;;  %s2523_s21 = scalar_lea.vmem %s72_s30, 64 }
  0x16   :  { %p2524_p5 = scmp.ne.s32.totalorder %s72_s30, %s2523_s21  ;;  %p2528_p6 = scmp.lt.s32.totalorder %s72_s30, %s72_s30 }
  0x17   :  { %p2529_p7 = scmp.lt.s32.totalorder %s2523_s21, %s2523_s21 }
  0x19   :  { %p2530_p8 = por %p2529_p7, %p2528_p6 }
  0x1b   :  { %52 = dma.hbm_to_vmem [thread:$0]  %s3260_s20, 32, %s50_s28, [#allocation5]  }
  0x1c   :  { %p2531_p9 = pnand %p2530_p8, %p2524_p5 }
  0x1e   :  { %2534 = shalt.err (!%p2531_p9)
}
  0x1f   :  { %74 = dma.hbm_to_vmem [thread:$0]  %s3243_s5, 64, %s72_s30, [#allocation8]  }
  0x20   :  { %s2793_s23 = smov [#allocation10]  }
  0x21   :  { %s90_s24 = sshll.u32 %s2793_s23, 4  ;;  %s91_s24 = int_to_ptr.vmem [resolvable:$true] %s90_s24 }
  0x22   :  { %s2543_s25 = scalar_lea.vmem %s91_s24, 16384  ;;  %p2548_p11 = scmp.lt.s32.totalorder %s91_s24, %s91_s24 }
  0x23   :  { %p2544_p10 = scmp.ne.s32.totalorder %s91_s24, %s2543_s25  ;;  %p2549_p12 = scmp.lt.s32.totalorder %s2543_s25, %s2543_s25 }
  0x25   :  { %p2550_p13 = por %p2549_p12, %p2548_p11 }
  0x27   :  { %p2551_p0 = pnand %p2550_p13, %p2544_p10 }
  0x29   :  { %2554 = shalt.err (!%p2551_p0)
}
  0x2a   :  { %s2794_s26 = smov 1024   ;;  %s2795_s27 = smov 64  }
  0x2b   :  { %96 = dma.hbm_to_vmem [thread:$0]  %s3245_s7, 16384, %s91_s24, [#allocation11], %s2794_s26, %s2794_s26, %s2795_s27  }
  0x2c   :  { %s2796_s0 = smov [#allocation13]  }
  0x2d   :  { %s114_s19 = sshll.u32 %s2796_s0, 4  ;;  %s115_s19 = int_to_ptr.vmem [resolvable:$true] %s114_s19 }
  0x2e   :  { %s2563_s5 = scalar_lea.vmem %s115_s19, 16384  ;;  %p2568_p2 = scmp.lt.s32.totalorder %s115_s19, %s115_s19 }
  0x2f   :  { %p2564_p1 = scmp.ne.s32.totalorder %s115_s19, %s2563_s5  ;;  %p2569_p3 = scmp.lt.s32.totalorder %s2563_s5, %s2563_s5 }
  0x31   :  { %p2570_p4 = por %p2569_p3, %p2568_p2 }
  0x33   :  { %p2571_p5 = pnand %p2570_p4, %p2564_p1 }
  0x35   :  { %2574 = shalt.err (!%p2571_p5)
}
  0x36   :  { %s2797_s30 = smov 512   ;;  %s2798_s1 = smov 32  }
  0x37   :  { %120 = dma.hbm_to_vmem [thread:$0]  %s3248_s10, 16384, %s115_s19, [#allocation14], %s2797_s30, %s2797_s30, %s2798_s1  }
  0x38   :  { %s2799_s22 = smov [#allocation16]   ;;  %s2800_s23 = smov [#allocation19]  }
  0x39   :  { %s137_s2 = sshll.u32 %s2799_s22, 4  ;;  %s159_s7 = sshll.u32 %s2800_s23, 4  ;;  %s138_s2 = int_to_ptr.vmem [resolvable:$true] %s137_s2  ;;  %s160_s7 = int_to_ptr.vmem [resolvable:$true] %s159_s7 }
  0x3a   :  { %s2583_s24 = scalar_lea.vmem %s138_s2, 64  ;;  %p2588_p7 = scmp.lt.s32.totalorder %s138_s2, %s138_s2 }
  0x3b   :  { %p2584_p6 = scmp.ne.s32.totalorder %s138_s2, %s2583_s24  ;;  %p2589_p8 = scmp.lt.s32.totalorder %s2583_s24, %s2583_s24 }
  0x3d   :  { %p2590_p9 = por %p2589_p8, %p2588_p7 }
  0x3f   :  { %p2591_p10 = pnand %p2590_p9, %p2584_p6 }
  0x41   :  { %2594 = shalt.err (!%p2591_p10)
}
  0x42   :  { %140 = dma.hbm_to_vmem [thread:$0]  %s3250_s12, 64, %s138_s2, [#allocation17]  }
  0x43   :  { %s2603_s27 = scalar_lea.vmem %s160_s7, 32  ;;  %p2608_p12 = scmp.lt.s32.totalorder %s160_s7, %s160_s7 }
  0x44   :  { %p2604_p11 = scmp.ne.s32.totalorder %s160_s7, %s2603_s27  ;;  %p2609_p13 = scmp.lt.s32.totalorder %s2603_s27, %s2603_s27 }
  0x46   :  { %p2610_p0 = por %p2609_p13, %p2608_p12 }
  0x48   :  { %p2611_p1 = pnand %p2610_p0, %p2604_p11 }
  0x4a   :  { %2614 = shalt.err (!%p2611_p1)
}
  0x4b   :  { %162 = dma.hbm_to_vmem [thread:$0]  %s3252_s14, 32, %s160_s7, [#allocation20]  }
  0x4c   :  { %s2801_s29 = smov [#allocation2]   ;;  %s2802_s19 = smov [#allocation6]  }
  0x4d   :  { %s39_s0 = sshll.u32 %s2801_s29, 4  ;;  %s59_s5 = sshll.u32 %s2802_s19, 4  ;;  %s40_s0 = int_to_ptr.vmem [resolvable:$true] %s39_s0  ;;  %s60_s5 = int_to_ptr.vmem [resolvable:$true] %s59_s5 }
  0x4e   :  { %s2623_s30 = scalar_lea.vmem %s40_s0, 256  ;;  %p2628_p3 = scmp.lt.s32.totalorder %s40_s0, %s40_s0 }
  0x4f   :  { %p2624_p2 = scmp.ne.s32.totalorder %s40_s0, %s2623_s30  ;;  %p2629_p4 = scmp.lt.s32.totalorder %s2623_s30, %s2623_s30 }
  0x51   :  { %p2630_p5 = por %p2629_p4, %p2628_p3 }
  0x53   :  { %p2631_p6 = pnand %p2630_p5, %p2624_p2 }
  0x55   :  { %2634 = shalt.err (!%p2631_p6)
}
  0x56   :  { %s3261_s20 = sld [smem:[#allocation33_spill]]  ;;  %s2643_s21 = scalar_lea.vmem %s60_s5, 32 }
  0x57   :  { %p2644_p7 = scmp.ne.s32.totalorder %s60_s5, %s2643_s21  ;;  %p2648_p8 = scmp.lt.s32.totalorder %s60_s5, %s60_s5 }
  0x58   :  { %p2649_p9 = scmp.lt.s32.totalorder %s2643_s21, %s2643_s21 }
  0x5a   :  { %p2650_p10 = por %p2649_p9, %p2648_p8 }
  0x5c   :  { %42 = dma.hbm_to_vmem [thread:$0]  %s3261_s20, 256, %s40_s0, [#allocation3]  }
  0x5d   :  { %p2651_p11 = pnand %p2650_p10, %p2644_p7 }
  0x5f   :  { %2654 = shalt.err (!%p2651_p11)
}
  0x60   :  { %62 = dma.hbm_to_vmem [thread:$0]  %s3241_s3, 32, %s60_s5, [#allocation5]  }
  0x61   :  { %s2803_s2 = smov [#allocation9]   ;;  %s2804_s7 = smov [#allocation12]  }
  0x62   :  { %s81_s23 = sshll.u32 %s2803_s2, 4  ;;  %s105_s24 = sshll.u32 %s2804_s7, 4  ;;  %s82_s23 = int_to_ptr.vmem [resolvable:$true] %s81_s23  ;;  %s106_s24 = int_to_ptr.vmem [resolvable:$true] %s105_s24 }
  0x63   :  { %s2663_s25 = scalar_lea.vmem %s82_s23, 64  ;;  %p2668_p13 = scmp.lt.s32.totalorder %s82_s23, %s82_s23 }
  0x64   :  { %p2664_p12 = scmp.ne.s32.totalorder %s82_s23, %s2663_s25  ;;  %p2669_p0 = scmp.lt.s32.totalorder %s2663_s25, %s2663_s25 }
  0x66   :  { %p2670_p1 = por %p2669_p0, %p2668_p13 }
  0x68   :  { %p2671_p2 = pnand %p2670_p1, %p2664_p12 }
  0x6a   :  { %2674 = shalt.err (!%p2671_p2)
}
  0x6b   :  { %84 = dma.hbm_to_vmem [thread:$0]  %s3244_s6, 64, %s82_s23, [#allocation8]  }
  0x6c   :  { %s2683_s10 = scalar_lea.vmem %s106_s24, 128  ;;  %p2688_p4 = scmp.lt.s32.totalorder %s106_s24, %s106_s24 }
  0x6d   :  { %p2684_p3 = scmp.ne.s32.totalorder %s106_s24, %s2683_s10  ;;  %p2689_p5 = scmp.lt.s32.totalorder %s2683_s10, %s2683_s10 }
  0x6f   :  { %p2690_p6 = por %p2689_p5, %p2688_p4 }
  0x71   :  { %p2691_p7 = pnand %p2690_p6, %p2684_p3 }
  0x73   :  { %2694 = shalt.err (!%p2691_p7)
}
  0x74   :  { %108 = dma.hbm_to_vmem [thread:$0]  %s3247_s9, 128, %s106_s24, [#allocation11]  }
  0x75   :  { %s2805_s29 = smov [#allocation15]   ;;  %s2806_s19 = smov [#allocation18]  }
  0x76   :  { %s127_s0 = sshll.u32 %s2805_s29, 4  ;;  %s146_s5 = sshll.u32 %s2806_s19, 4  ;;  %s128_s0 = int_to_ptr.vmem [resolvable:$true] %s127_s0  ;;  %s147_s5 = int_to_ptr.vmem [resolvable:$true] %s146_s5 }
  0x77   :  { %s2703_s30 = scalar_lea.vmem %s128_s0, 64  ;;  %p2708_p9 = scmp.lt.s32.totalorder %s128_s0, %s128_s0 }
  0x78   :  { %p2704_p8 = scmp.ne.s32.totalorder %s128_s0, %s2703_s30  ;;  %p2709_p10 = scmp.lt.s32.totalorder %s2703_s30, %s2703_s30 }
  0x7a   :  { %p2710_p11 = por %p2709_p10, %p2708_p9 }
  0x7c   :  { %p2711_p12 = pnand %p2710_p11, %p2704_p8 }
  0x7e   :  { %2714 = shalt.err (!%p2711_p12)
}
  0x7f   :  { %130 = dma.hbm_to_vmem [thread:$0]  %s3249_s11, 64, %s128_s0, [#allocation14]  }
  0x80   :  { %s2723_s1 = scalar_lea.vmem %s147_s5, 4096  ;;  %p2728_p0 = scmp.lt.s32.totalorder %s147_s5, %s147_s5 }
  0x81   :  { %p2724_p13 = scmp.ne.s32.totalorder %s147_s5, %s2723_s1  ;;  %p2729_p1 = scmp.lt.s32.totalorder %s2723_s1, %s2723_s1 }
  0x83   :  { %p2730_p2 = por %p2729_p1, %p2728_p0 }
  0x85   :  { %p2731_p3 = pnand %p2730_p2, %p2724_p13 }
  0x87   :  { %2734 = shalt.err (!%p2731_p3)
}
  0x88   :  { %s2807_s9 = smov 256   ;;  %s2808_s20 = smov 16  }
  0x89   :  { %152 = dma.hbm_to_vmem [thread:$0]  %s3251_s13, 4096, %s147_s5, [#allocation17], %s2807_s9, %s2807_s9, %s2808_s20  }
  0x8a   :  { %s2809_s22 = smov [#allocation21]   ;;  %s2810_s23 = smov [#allocation22]  }
  0x8b   :  { %s169_s2 = sshll.u32 %s2809_s22, 4  ;;  %s178_s7 = sshll.u32 %s2810_s23, 4  ;;  %s170_s2 = int_to_ptr.vmem [resolvable:$true] %s169_s2  ;;  %s179_s7 = int_to_ptr.vmem [resolvable:$true] %s178_s7 }
  0x8c   :  { %s2743_s11 = scalar_lea.vmem %s170_s2, 32  ;;  %p2748_p5 = scmp.lt.s32.totalorder %s170_s2, %s170_s2 }
  0x8d   :  { %p2744_p4 = scmp.ne.s32.totalorder %s170_s2, %s2743_s11  ;;  %p2749_p6 = scmp.lt.s32.totalorder %s2743_s11, %s2743_s11 }
  0x8f   :  { %p2750_p7 = por %p2749_p6, %p2748_p5 }
  0x91   :  { %p2751_p8 = pnand %p2750_p7, %p2744_p4 }
  0x93   :  { %2754 = shalt.err (!%p2751_p8)
}
  0x94   :  { %172 = dma.hbm_to_vmem [thread:$0]  %s3253_s15, 32, %s170_s2, [#allocation20]  }
  0x95   :  { %s2763_s26 = scalar_lea.vmem %s179_s7, 1024  ;;  %p2768_p10 = scmp.lt.s32.totalorder %s179_s7, %s179_s7 }
  0x96   :  { %p2764_p9 = scmp.ne.s32.totalorder %s179_s7, %s2763_s26  ;;  %p2769_p11 = scmp.lt.s32.totalorder %s2763_s26, %s2763_s26 }
  0x98   :  { %p2770_p12 = por %p2769_p11, %p2768_p10 }
  0x9a   :  { %p2771_p13 = pnand %p2770_p12, %p2764_p9 }
  0x9c   :  { %2774 = shalt.err (!%p2771_p13)
}
  0x9d   :  { %s2811_s13 = smov 128   ;;  %s2812_s27 = smov 8  }
  0x9e   :  { %184 = dma.hbm_to_vmem [thread:$0]  %s3254_s16, 1024, %s179_s7, [#allocation23], %s2811_s13, %s2811_s13, %s2812_s27  }
  0x9f   :  { %2775 = dma.done.wait [#allocation3], 256  }
  0xa0   :  { %2776 = vsyncadd [#allocation3], 4294967040 }
  0xa1   :  { %2777 = dma.done.wait [#allocation5], 64  }
  0xa2   :  { %2778 = vsyncadd [#allocation5], 4294967232 }
  0xa3   :  { %2779 = dma.done.wait [#allocation8], 128  }
  0xa4   :  { %2780 = vsyncadd [#allocation8], 4294967168 }
  0xa5   :  { %2781 = dma.done.wait [#allocation11], 16512  }
  0xa6   :  { %2782 = vsyncadd [#allocation11], 4294950784 }
  0xa7   :  { %2783 = dma.done.wait [#allocation14], 16448  }
  0xa8   :  { %2784 = vsyncadd [#allocation14], 4294950848 }
  0xa9   :  { %2785 = dma.done.wait [#allocation17], 4160  }
  0xaa   :  { %2786 = vsyncadd [#allocation17], 4294963136 }
  0xab   :  { %2787 = dma.done.wait [#allocation20], 64  }
  0xac   :  { %2788 = vsyncadd [#allocation20], 4294967232 }
  0xad   :  { %2789 = dma.done.wait [#allocation23], 1024  }
  0xae   :  { %2790 = vsyncadd [#allocation23], 4294966272  ;;  %v2813_v0 = vmov 0   ;;  %v233_v1 = vld [vmem:[#allocation2 + $0x8] sm:$0xff]  ;;  %v232_v2 = vld [vmem:[#allocation2] sm:$0xff]  ;;  %s3262_s1 = sld [smem:[#allocation32_spill]] }
  0xaf   :  { %274 = vmatprep.mubr.bf16.mxu0 %v2813_v0  ;;  %v235_v3 = vunpack.c.l.s8.bf16 %v233_v1  ;;  %v237_v4 = vunpack.c.h.s8.bf16 %v233_v1  ;;  %v236_v5 = vunpack.c.h.s8.bf16 %v232_v2  ;;  %v328_v6 = vld [vmem:[%s3242_s4 + $0x68] sm:$0xff]  ;;  %v327_v7 = vld [vmem:[%s3242_s4 + $0x60] sm:$0xff]  ;;  %v330_v10 = vld [vmem:[%s3242_s4 + $0x78] sm:$0xff]  ;;  %v234_v13 = vunpack.c.l.s8.bf16 %v232_v2 }
  0xb0   :  { %v372_v8 = vunpack.c.l.s8.bf16 %v328_v6  ;;  %v376_v9 = vunpack.c.h.s8.bf16 %v328_v6  ;;  %v375_v11 = vunpack.c.h.s8.bf16 %v327_v7  ;;  %v324_v12 = vld [vmem:[%s3242_s4 + $0x48] sm:$0xff]  ;;  %v378_v15 = vunpack.c.h.s8.bf16 %v330_v10  ;;  %v329_v17 = vld [vmem:[%s3242_s4 + $0x70] sm:$0xff]  ;;  %v323_v19 = vld [vmem:[%s3242_s4 + $0x40] sm:$0xff] }
  0xb1   :  { %254 = vmatprep.subr.bf16.mxu0 %v237_v4  ;;  %v371_v16 = vunpack.c.l.s8.bf16 %v327_v7  ;;  %v368_v18 = vunpack.c.h.s8.bf16 %v324_v12  ;;  %vm238_vm0 = vcmask 261120   ;;  %v377_v21 = vunpack.c.h.s8.bf16 %v329_v17  ;;  %v326_v24 = vld [vmem:[%s3242_s4 + $0x58] sm:$0xff]  ;;  %v320_v26 = vld [vmem:[%s3242_s4 + $0x28] sm:$0xff]  ;;  %v325_v29 = vld [vmem:[%s3242_s4 + $0x50] sm:$0xff] }
  0xb2   :  { %255 = vmatpush1.bf16.msra.mxu0 %v236_v5  ;;  %411 = vmatprep.subr.bf16.mxu1 %v376_v9  ;;  %v374_v22 = vunpack.c.l.s8.bf16 %v330_v10  ;;  %v367_v23 = vunpack.c.h.s8.bf16 %v323_v19  ;;  %v364_v25 = vunpack.c.l.s8.bf16 %v324_v12  ;;  %v373_v27 = vunpack.c.l.s8.bf16 %v329_v17  ;;  %v319_v32 = vld [vmem:[%s3242_s4 + $0x20] sm:$0xff]  ;;  %v322_v36 = vld [vmem:[%s3242_s4 + $0x38] sm:$0xff]  ;;  %v316_v38 = vld [vmem:[%s3242_s4 + $0x8] sm:$0xff] }
  0xb3   :  { %256 = vmatprep.subr.bf16.mxu0 %v235_v3  ;;  %412 = vmatpush1.bf16.msra.mxu1 %v375_v11  ;;  %v370_v28 = vunpack.c.h.s8.bf16 %v326_v24  ;;  %v363_v30 = vunpack.c.l.s8.bf16 %v323_v19  ;;  %v360_v31 = vunpack.c.h.s8.bf16 %v320_v26  ;;  %v369_v33 = vunpack.c.h.s8.bf16 %v325_v29  ;;  %v321_v41 = vld [vmem:[%s3242_s4 + $0x30] sm:$0xff]  ;;  %v315_v44 = vld [vmem:[%s3242_s4] sm:$0xff]  ;;  %v318_v48 = vld [vmem:[%s3242_s4 + $0x18] sm:$0xff] }
  0xb4   :  { %v230_v14 = vld [vmem:[%s3262_s1] sm:$0xff]  ;;  %413 = vmatprep.subr.bf16.mxu1 %v372_v8  ;;  %v366_v34 = vunpack.c.l.s8.bf16 %v326_v24  ;;  %v359_v35 = vunpack.c.h.s8.bf16 %v319_v32  ;;  %v356_v37 = vunpack.c.l.s8.bf16 %v320_v26  ;;  %v365_v39 = vunpack.c.l.s8.bf16 %v325_v29  ;;  %v344_v50 = vld [vmem:[%s3242_s4 + $0xe8] sm:$0xff]  ;;  %v317_v53 = vld [vmem:[%s3242_s4 + $0x10] sm:$0xff] }
  0xb5   :  { %v231_v20 = vpack.c.bf16 %v230_v14, %v230_v14  ;;  %v362_v40 = vunpack.c.h.s8.bf16 %v322_v36  ;;  %v355_v42 = vunpack.c.l.s8.bf16 %v319_v32  ;;  %v352_v43 = vunpack.c.h.s8.bf16 %v316_v38  ;;  %v343_v56 = vld [vmem:[%s3242_s4 + $0xe0] sm:$0xff]  ;;  %v346_v60 = vld [vmem:[%s3242_s4 + $0xf8] sm:$0xff]  ;;  %v340_v62 = vld [vmem:[%s3242_s4 + $0xc8] sm:$0xff] }
  0xb6   :  { %257 = vmatpush1.bf16.msra.mxu0 %v234_v13  ;;  %v361_v45 = vunpack.c.h.s8.bf16 %v321_v41  ;;  %v358_v46 = vunpack.c.l.s8.bf16 %v322_v36  ;;  %v351_v47 = vunpack.c.h.s8.bf16 %v315_v44  ;;  %v348_v49 = vunpack.c.l.s8.bf16 %v316_v38  ;;  %v345_v1 = vld [vmem:[%s3242_s4 + $0xf0] sm:$0xff]  ;;  %v339_v4 = vld [vmem:[%s3242_s4 + $0xc0] sm:$0xff]  ;;  %v342_v8 = vld [vmem:[%s3242_s4 + $0xd8] sm:$0xff] }
  0xb7   :  { %452 = vmatprep.subr.bf16.mxu0 %v378_v15  ;;  %414 = vmatpush1.bf16.msra.mxu1 %v371_v16  ;;  %v357_v51 = vunpack.c.l.s8.bf16 %v321_v41  ;;  %v354_v52 = vunpack.c.h.s8.bf16 %v318_v48  ;;  %v347_v54 = vunpack.c.l.s8.bf16 %v315_v44  ;;  %v408_v55 = vunpack.c.h.s8.bf16 %v344_v50  ;;  %v336_v10 = vld [vmem:[%s3242_s4 + $0xa8] sm:$0xff]  ;;  %v341_v13 = vld [vmem:[%s3242_s4 + $0xd0] sm:$0xff]  ;;  %v335_v16 = vld [vmem:[%s3242_s4 + $0xa0] sm:$0xff] }
  0xb8   :  { %415 = vmatprep.subr.bf16.mxu1 %v368_v18  ;;  %v353_v57 = vunpack.c.h.s8.bf16 %v317_v53  ;;  %v350_v58 = vunpack.c.l.s8.bf16 %v318_v48  ;;  %v407_v59 = vunpack.c.h.s8.bf16 %v343_v56  ;;  %v404_v61 = vunpack.c.l.s8.bf16 %v344_v50  ;;  %v332_v29 = vld [vmem:[%s3242_s4 + $0x88] sm:$0xff]  ;;  %v283_v48 = vld [vmem:[#allocation4] sm:$0x3]  ;;  %v297_v50 = vld [vmem:[#allocation6] sm:$0x3] }
  0xb9   :  { %2448 = vmatmul.mubr.msk.bf16.vlgmr.msra.gmra.mxu0 %vm238_vm0, %v231_v20  ;;  %v349_v63 = vunpack.c.l.s8.bf16 %v317_v53  ;;  %v410_v0 = vunpack.c.h.s8.bf16 %v346_v60  ;;  %v403_v2 = vunpack.c.l.s8.bf16 %v343_v56  ;;  %v400_v3 = vunpack.c.h.s8.bf16 %v340_v62  ;;  %v338_v20 = vld [vmem:[%s3242_s4 + $0xb8] sm:$0xff]  ;;  %v578_v41 = vld [vmem:[#allocation10 + $0xc8] sm:$0xff] }
  0xba   :  { %453 = vmatpush1.bf16.msra.mxu0 %v377_v21  ;;  %v409_v5 = vunpack.c.h.s8.bf16 %v345_v1  ;;  %v406_v6 = vunpack.c.l.s8.bf16 %v346_v60  ;;  %v399_v7 = vunpack.c.h.s8.bf16 %v339_v4  ;;  %v396_v9 = vunpack.c.l.s8.bf16 %v340_v62 }
  0xbb   :  { %454 = vmatprep.subr.bf16.mxu0 %v374_v22  ;;  %416 = vmatpush1.bf16.msra.mxu1 %v367_v23  ;;  %v405_v11 = vunpack.c.l.s8.bf16 %v345_v1  ;;  %v402_v12 = vunpack.c.h.s8.bf16 %v342_v8  ;;  %v395_v14 = vunpack.c.l.s8.bf16 %v339_v4  ;;  %v392_v15 = vunpack.c.h.s8.bf16 %v336_v10  ;;  %v337_v23 = vld [vmem:[%s3242_s4 + $0xb0] sm:$0xff]  ;;  %v641_v1 = vld [vmem:[#allocation10 + $0x2c0] sm:$0xff] }
  0xbc   :  { %417 = vmatprep.subr.bf16.mxu1 %v364_v25  ;;  %v401_v17 = vunpack.c.h.s8.bf16 %v341_v13  ;;  %v398_v18 = vunpack.c.l.s8.bf16 %v342_v8  ;;  %v391_v19 = vunpack.c.h.s8.bf16 %v335_v16  ;;  %v397_v21 = vunpack.c.l.s8.bf16 %v341_v13 }
  0xbd   :  { %v394_v22 = vunpack.c.h.s8.bf16 %v338_v20  ;;  %v393_v24 = vunpack.c.h.s8.bf16 %v337_v23  ;;  %v388_v25 = vunpack.c.l.s8.bf16 %v336_v10  ;;  %v390_v26 = vunpack.c.l.s8.bf16 %v338_v20  ;;  %v634_v10 = vld [vmem:[#allocation10 + $0x288] sm:$0xff] }
  0xbe   :  { %455 = vmatpush1.bf16.msra.mxu0 %v373_v27  ;;  %v387_v27 = vunpack.c.l.s8.bf16 %v335_v16  ;;  %v633_v16 = vld [vmem:[#allocation10 + $0x280] sm:$0xff]  ;;  %v842_v20 = vunpack.c.l.s8.bf16 %v634_v10 }
  0xbf   :  { %456 = vmatprep.subr.bf16.mxu0 %v370_v28  ;;  %418 = vmatpush1.bf16.msra.mxu1 %v363_v30  ;;  %v389_v28 = vunpack.c.l.s8.bf16 %v337_v23  ;;  %v334_v30 = vld [vmem:[%s3242_s4 + $0x98] sm:$0xff] }
  0xc0   :  { %419 = vmatprep.subr.bf16.mxu1 %v360_v31  ;;  %v384_v31 = vunpack.c.h.s8.bf16 %v332_v29  ;;  %v386_v32 = vunpack.c.h.s8.bf16 %v334_v30  ;;  %v382_v38 = vunpack.c.l.s8.bf16 %v334_v30 }
  0xc2   :  { %457 = vmatpush1.bf16.msra.mxu0 %v369_v33  ;;  %v331_v33 = vld [vmem:[%s3242_s4 + $0x80] sm:$0xff] }
  0xc3   :  { %458 = vmatprep.subr.bf16.mxu0 %v366_v34  ;;  %420 = vmatpush1.bf16.msra.mxu1 %v359_v35  ;;  %v333_v34 = vld [vmem:[%s3242_s4 + $0x90] sm:$0xff]  ;;  %v383_v35 = vunpack.c.h.s8.bf16 %v331_v33 }
  0xc4   :  { %421 = vmatprep.subr.bf16.mxu1 %v356_v37  ;;  %v385_v36 = vunpack.c.h.s8.bf16 %v333_v34  ;;  %v380_v37 = vunpack.c.l.s8.bf16 %v332_v29 }
  0xc6   :  { %459 = vmatpush1.bf16.msra.mxu0 %v365_v39  ;;  %v379_v39 = vunpack.c.l.s8.bf16 %v331_v33  ;;  %v554_v33 = vld [vmem:[#allocation10 + $0x8] sm:$0xff] }
  0xc7   :  { %460 = vmatprep.subr.bf16.mxu0 %v362_v40  ;;  %422 = vmatpush1.bf16.msra.mxu1 %v355_v42  ;;  %v381_v40 = vunpack.c.l.s8.bf16 %v333_v34  ;;  %v642_v42 = vld [vmem:[#allocation10 + $0x2c8] sm:$0xff] }
  0xc8   :  { %423 = vmatprep.subr.bf16.mxu1 %v352_v43  ;;  %v738_v43 = vunpack.c.h.s8.bf16 %v578_v41  ;;  %v866_v44 = vunpack.c.h.s8.bf16 %v642_v42  ;;  %v858_v8 = vunpack.c.l.s8.bf16 %v642_v42  ;;  %v618_v34 = vld [vmem:[#allocation10 + $0x208] sm:$0xff] }
  0xca   :  { %461 = vmatpush1.bf16.msra.mxu0 %v361_v45  ;;  %v285_v45 = vlaneseq }
  0xcb   :  { %462 = vmatprep.subr.bf16.mxu0 %v358_v46  ;;  %424 = vmatpush1.bf16.msra.mxu1 %v351_v47 }
  0xcc   :  { %425 = vmatprep.subr.bf16.mxu1 %v348_v49  ;;  %v3050_v46 = vshrl.u32 %v285_v45, 7  ;;  %v610_v45 = vld [vmem:[#allocation10 + $0x1c8] sm:$0xff] }
  0xce   :  { %463 = vmatpush1.bf16.msra.mxu0 %v357_v51  ;;  %v3053_v47 = vsub.s32 0, %v3050_v46  ;;  %v3056_v49 = vsub.s32 1, %v3050_v46 }
  0xcf   :  { %464 = vmatprep.subr.bf16.mxu0 %v354_v52  ;;  %426 = vmatpush1.bf16.msra.mxu1 %v347_v54 }
  0xd0   :  { %427 = vmatprep.subr.bf16.mxu1 %v408_v55  ;;  %v288_v51 = vrot.slane %v283_v48, %v3053_v47  ;;  %v302_v52 = vrot.slane %v297_v50, %v3053_v47  ;;  %v292_v53 = vrot.slane %v283_v48, %v3056_v49  ;;  %v306_v56 = vrot.slane %v297_v50, %v3056_v49  ;;  %v674_v48 = vld [vmem:[#allocation10 + $0x3c8] sm:$0xff] }
  0xd2   :  { %465 = vmatpush1.bf16.msra.mxu0 %v353_v57 }
  0xd3   :  { %466 = vmatprep.subr.bf16.mxu0 %v350_v58  ;;  %428 = vmatpush2.bf16.msra.mxu1 %v407_v59 }
  0xd4   :  { %429 = vmatprep.subr.bf16.mxu1 %v404_v61 }
  0xd6   :  { %467 = vmatpush1.bf16.msra.mxu0 %v349_v63 }
  0xd7   :  { %468 = vmatprep.subr.bf16.mxu0 %v410_v0  ;;  %430 = vmatpush2.bf16.msra.mxu1 %v403_v2  ;;  %v577_v0 = vld [vmem:[#allocation10 + $0xc0] sm:$0xff] }
  0xd8   :  { %431 = vmatprep.subr.bf16.mxu1 %v400_v3  ;;  %v737_v4 = vunpack.c.h.s8.bf16 %v577_v0 }
  0xda   :  { %469 = vmatpush2.bf16.msra.mxu0 %v409_v5  ;;  %v865_v5 = vunpack.c.h.s8.bf16 %v641_v1 }
  0xdb   :  { %470 = vmatprep.subr.bf16.mxu0 %v406_v6  ;;  %432 = vmatpush2.bf16.msra.mxu1 %v399_v7  ;;  %v730_v7 = vunpack.c.l.s8.bf16 %v578_v41 }
  0xdc   :  { %433 = vmatprep.subr.bf16.mxu1 %v396_v9  ;;  %v570_v9 = vld [vmem:[#allocation10 + $0x88] sm:$0xff] }
  0xdd   :  { %v722_v13 = vunpack.c.h.s8.bf16 %v570_v9 }
  0xde   :  { %471 = vmatpush2.bf16.msra.mxu0 %v405_v11  ;;  %v729_v11 = vunpack.c.l.s8.bf16 %v577_v0 }
  0xdf   :  { %472 = vmatprep.subr.bf16.mxu0 %v402_v12  ;;  %434 = vmatpush2.bf16.msra.mxu1 %v395_v14  ;;  %v857_v12 = vunpack.c.l.s8.bf16 %v641_v1  ;;  %v850_v14 = vunpack.c.h.s8.bf16 %v634_v10 }
  0xe0   :  { %435 = vmatprep.subr.bf16.mxu1 %v392_v15  ;;  %v569_v15 = vld [vmem:[#allocation10 + $0x80] sm:$0xff] }
  0xe1   :  { %v713_v23 = vunpack.c.l.s8.bf16 %v569_v15 }
  0xe2   :  { %473 = vmatpush2.bf16.msra.mxu0 %v401_v17  ;;  %v721_v17 = vunpack.c.h.s8.bf16 %v569_v15  ;;  %v657_v15 = vld [vmem:[#allocation10 + $0x340] sm:$0xff] }
  0xe3   :  { %474 = vmatprep.subr.bf16.mxu0 %v398_v18  ;;  %436 = vmatpush2.bf16.msra.mxu1 %v391_v19  ;;  %v849_v18 = vunpack.c.h.s8.bf16 %v633_v16  ;;  %v714_v19 = vunpack.c.l.s8.bf16 %v570_v9  ;;  %v658_v9 = vld [vmem:[#allocation10 + $0x348] sm:$0xff] }
  0xe4   :  { %437 = vmatprep.subr.bf16.mxu1 %v388_v25 }
  0xe6   :  { %475 = vmatpush2.bf16.msra.mxu0 %v397_v21  ;;  %v562_v21 = vld [vmem:[#allocation10 + $0x48] sm:$0xff] }
  0xe7   :  { %476 = vmatprep.subr.bf16.mxu0 %v394_v22  ;;  %438 = vmatpush2.bf16.msra.mxu1 %v387_v27  ;;  %v626_v22 = vld [vmem:[#allocation10 + $0x248] sm:$0xff]  ;;  %v706_v25 = vunpack.c.h.s8.bf16 %v562_v21  ;;  %v561_v27 = vld [vmem:[#allocation10 + $0x40] sm:$0xff] }
  0xe8   :  { %439 = vmatprep.subr.bf16.mxu1 %v384_v31  ;;  %v705_v29 = vunpack.c.h.s8.bf16 %v561_v27  ;;  %v698_v31 = vunpack.c.l.s8.bf16 %v562_v21  ;;  %v889_v21 = vunpack.c.l.s8.bf16 %v657_v15 }
  0xea   :  { %477 = vmatpush2.bf16.msra.mxu0 %v393_v24  ;;  %v841_v24 = vunpack.c.l.s8.bf16 %v633_v16 }
  0xeb   :  { %478 = vmatprep.subr.bf16.mxu0 %v390_v26  ;;  %440 = vmatpush2.bf16.msra.mxu1 %v383_v35  ;;  %v834_v26 = vunpack.c.h.s8.bf16 %v626_v22  ;;  %v697_v35 = vunpack.c.l.s8.bf16 %v561_v27 }
  0xec   :  { %441 = vmatprep.subr.bf16.mxu1 %v380_v37  ;;  %v690_v37 = vunpack.c.h.s8.bf16 %v554_v33 }
  0xee   :  { %479 = vmatpush2.bf16.msra.mxu0 %v389_v28  ;;  %v625_v28 = vld [vmem:[#allocation10 + $0x240] sm:$0xff] }
  0xef   :  { %480 = vmatprep.subr.bf16.mxu0 %v386_v32  ;;  %442 = vmatpush2.bf16.msra.mxu1 %v379_v39  ;;  %v833_v30 = vunpack.c.h.s8.bf16 %v625_v28  ;;  %v826_v32 = vunpack.c.l.s8.bf16 %v626_v22  ;;  %v553_v39 = vld [vmem:[#allocation10] sm:$0xff]  ;;  %v586_v22 = vld [vmem:[#allocation10 + $0x108] sm:$0xff] }
  0xf0   :  { %937 = vmatprep.subr.bf16.mxu1 %v738_v43  ;;  %v689_v41 = vunpack.c.h.s8.bf16 %v553_v39  ;;  %v682_v43 = vunpack.c.l.s8.bf16 %v554_v33  ;;  %v681_v50 = vunpack.c.l.s8.bf16 %v553_v39  ;;  %v493_v39 = vld [vmem:[#allocation7] sm:$0xf] }
  0xf2   :  { %481 = vmatpush2.bf16.msra.mxu0 %v385_v36  ;;  %v825_v36 = vunpack.c.l.s8.bf16 %v625_v28 }
  0xf3   :  { %482 = vmatprep.subr.bf16.mxu0 %v382_v38  ;;  %v818_v38 = vunpack.c.h.s8.bf16 %v618_v34 }
  0xf6   :  { %483 = vmatpush2.bf16.msra.mxu0 %v381_v40  ;;  %v617_v40 = vld [vmem:[#allocation10 + $0x200] sm:$0xff] }
  0xf7   :  { %978 = vmatprep.subr.bf16.mxu0 %v866_v44  ;;  %v817_v42 = vunpack.c.h.s8.bf16 %v617_v40  ;;  %v810_v44 = vunpack.c.l.s8.bf16 %v618_v34  ;;  %v3062_v34 = vld [vmem:[#allocation10 + $0xd8] sm:$0xff] }
 0x179   :  { %v276_v54 = vpop.f32.mrf.mxu0 }
 0x17a   :  { %v295_v55 = vmul.f32 %v288_v51, %v276_v54  ;;  %v809_v51 = vunpack.c.l.s8.bf16 %v617_v40  ;;  %v609_v54 = vld [vmem:[#allocation10 + $0x1c0] sm:$0xff]  ;;  %v3072_v40 = vsub.s32 3, %v3050_v46 }
 0x17b   :  { %v278_v57 = vpop.f32.mrf.mxu0 }
 0x17c   :  { %v309_v58 = vadd.f32 %v302_v52, %v295_v55  ;;  %v296_v59 = vmul.f32 %v292_v53, %v278_v57  ;;  %v802_v52 = vunpack.c.h.s8.bf16 %v610_v45  ;;  %v930_v53 = vunpack.c.h.s8.bf16 %v674_v48  ;;  %v673_v55 = vld [vmem:[#allocation10 + $0x3c0] sm:$0xff] }
 0x17d   :  { %v280_v60 = vpop.f32.mrf.mxu0  ;;  %v929_v57 = vunpack.c.h.s8.bf16 %v673_v55 }
 0x17e   :  { %v310_v61 = vadd.f32 %v306_v56, %v296_v59  ;;  %v311_v62 = vmax.f32 %v309_v58, 0.0  ;;  %v801_v56 = vunpack.c.h.s8.bf16 %v609_v54  ;;  %v794_v58 = vunpack.c.l.s8.bf16 %v610_v45  ;;  %v602_v60 = vld [vmem:[#allocation10 + $0x188] sm:$0xff] }
 0x17f   :  { %v281_v63 = vpop.f32.mrf.mxu0  ;;  %v922_v59 = vunpack.c.l.s8.bf16 %v674_v48  ;;  %v786_v0 = vunpack.c.h.s8.bf16 %v602_v60  ;;  %v502_v48 = vrot.slane %v493_v39, %v3056_v49 }
 0x180   :  { %v312_v2 = vmax.f32 %v310_v61, 0.0  ;;  %v313_v6 = vpack.c.bf16 %v311_v62, %v311_v62  ;;  %v666_v61 = vld [vmem:[#allocation10 + $0x388] sm:$0xff]  ;;  %v793_v62 = vunpack.c.l.s8.bf16 %v609_v54  ;;  %v921_v63 = vunpack.c.l.s8.bf16 %v673_v55 }
 0x181   :  { %v914_v1 = vunpack.c.h.s8.bf16 %v666_v61 }
 0x182   :  { %v314_v3 = vpack.c.bf16 %v312_v2, %v312_v2  ;;  %v601_v2 = vld [vmem:[#allocation10 + $0x180] sm:$0xff] }
 0x183   :  { %v777_v10 = vunpack.c.l.s8.bf16 %v601_v2 }
 0x184   :  { %443 = vmatprep.mubr.bf16.mxu1 %v314_v3  ;;  %484 = vmatprep.mubr.bf16.mxu0 %v314_v3  ;;  %v665_v3 = vld [vmem:[#allocation10 + $0x380] sm:$0xff] }
 0x185   :  { %444 = vmatmul.mubr.bf16.vlgmr.msra.gmra.mxu1 %v313_v6  ;;  %485 = vmatmul.mubr.bf16.vlgmr.msra.gmra.mxu0 %v313_v6  ;;  %v778_v6 = vunpack.c.l.s8.bf16 %v602_v60 }
 0x186   :  { %938 = vmatpush1.bf16.msra.mxu1 %v737_v4  ;;  %979 = vmatpush1.bf16.msra.mxu0 %v865_v5  ;;  %v785_v4 = vunpack.c.h.s8.bf16 %v601_v2  ;;  %v913_v5 = vunpack.c.h.s8.bf16 %v665_v3 }
 0x187   :  { %939 = vmatprep.subr.bf16.mxu1 %v730_v7  ;;  %980 = vmatprep.subr.bf16.mxu0 %v858_v8  ;;  %v906_v7 = vunpack.c.l.s8.bf16 %v666_v61  ;;  %v594_v8 = vld [vmem:[#allocation10 + $0x148] sm:$0xff] }
 0x18a   :  { %940 = vmatpush1.bf16.msra.mxu1 %v729_v11  ;;  %981 = vmatpush1.bf16.msra.mxu0 %v857_v12  ;;  %v905_v11 = vunpack.c.l.s8.bf16 %v665_v3  ;;  %v770_v12 = vunpack.c.h.s8.bf16 %v594_v8 }
 0x18b   :  { %941 = vmatprep.subr.bf16.mxu1 %v722_v13  ;;  %982 = vmatprep.subr.bf16.mxu0 %v850_v14  ;;  %v898_v13 = vunpack.c.h.s8.bf16 %v658_v9  ;;  %v593_v14 = vld [vmem:[#allocation10 + $0x140] sm:$0xff] }
 0x18c   :  { %v769_v16 = vunpack.c.h.s8.bf16 %v593_v14 }
 0x18e   :  { %942 = vmatpush1.bf16.msra.mxu1 %v721_v17  ;;  %983 = vmatpush1.bf16.msra.mxu0 %v849_v18  ;;  %v897_v17 = vunpack.c.h.s8.bf16 %v657_v15  ;;  %v762_v18 = vunpack.c.l.s8.bf16 %v594_v8  ;;  %v643_v8 = vld [vmem:[#allocation10 + $0x2d0] sm:$0xff] }
 0x18f   :  { %943 = vmatprep.subr.bf16.mxu1 %v714_v19  ;;  %984 = vmatprep.subr.bf16.mxu0 %v842_v20  ;;  %v890_v19 = vunpack.c.l.s8.bf16 %v658_v9  ;;  %v761_v20 = vunpack.c.l.s8.bf16 %v593_v14  ;;  %v867_v14 = vunpack.c.h.s8.bf16 %v643_v8 }
 0x192   :  { %944 = vmatpush1.bf16.msra.mxu1 %v713_v23  ;;  %985 = vmatpush1.bf16.msra.mxu0 %v841_v24  ;;  %v650_v23 = vld [vmem:[#allocation10 + $0x308] sm:$0xff]  ;;  %v585_v24 = vld [vmem:[#allocation10 + $0x100] sm:$0xff] }
 0x193   :  { %945 = vmatprep.subr.bf16.mxu1 %v706_v25  ;;  %986 = vmatprep.subr.bf16.mxu0 %v834_v26  ;;  %v649_v25 = vld [vmem:[#allocation10 + $0x300] sm:$0xff]  ;;  %v754_v26 = vunpack.c.h.s8.bf16 %v586_v22  ;;  %v882_v27 = vunpack.c.h.s8.bf16 %v650_v23  ;;  %v753_v28 = vunpack.c.h.s8.bf16 %v585_v24 }
 0x194   :  { %v873_v33 = vunpack.c.l.s8.bf16 %v649_v25 }
 0x196   :  { %946 = vmatpush1.bf16.msra.mxu1 %v705_v29  ;;  %987 = vmatpush1.bf16.msra.mxu0 %v833_v30  ;;  %v881_v29 = vunpack.c.h.s8.bf16 %v649_v25  ;;  %v746_v30 = vunpack.c.l.s8.bf16 %v586_v22  ;;  %v859_v22 = vunpack.c.l.s8.bf16 %v643_v8  ;;  %v571_v25 = vld [vmem:[#allocation10 + $0x90] sm:$0xff]  ;;  %v604_v8 = vld [vmem:[#allocation10 + $0x198] sm:$0xff] }
 0x197   :  { %947 = vmatprep.subr.bf16.mxu1 %v698_v31  ;;  %988 = vmatprep.subr.bf16.mxu0 %v826_v32  ;;  %v874_v31 = vunpack.c.l.s8.bf16 %v650_v23  ;;  %v745_v32 = vunpack.c.l.s8.bf16 %v585_v24 }
 0x19a   :  { %948 = vmatpush1.bf16.msra.mxu1 %v697_v35  ;;  %989 = vmatpush1.bf16.msra.mxu0 %v825_v36  ;;  %v3064_v35 = vld [vmem:[#allocation10 + $0x2d8] sm:$0xff]  ;;  %v740_v36 = vunpack.c.h.s8.bf16 %v3062_v34 }
 0x19b   :  { %949 = vmatprep.subr.bf16.mxu1 %v690_v37  ;;  %990 = vmatprep.subr.bf16.mxu0 %v818_v38  ;;  %v868_v37 = vunpack.c.h.s8.bf16 %v3064_v35  ;;  %v3069_v38 = vsub.s32 2, %v3050_v46 }
 0x19e   :  { %950 = vmatpush1.bf16.msra.mxu1 %v689_v41  ;;  %991 = vmatpush1.bf16.msra.mxu0 %v817_v42  ;;  %v519_v41 = vld [vmem:[#allocation9] sm:$0xf]  ;;  %v498_v42 = vrot.slane %v493_v39, %v3053_v47 }
 0x19f   :  { %951 = vmatprep.subr.bf16.mxu1 %v682_v43  ;;  %992 = vmatprep.subr.bf16.mxu0 %v810_v44  ;;  %v506_v43 = vrot.slane %v493_v39, %v3069_v38  ;;  %v524_v44 = vrot.slane %v519_v41, %v3053_v47  ;;  %v532_v45 = vrot.slane %v519_v41, %v3069_v38 }
 0x1a0   :  { %v528_v55 = vrot.slane %v519_v41, %v3056_v49 }
 0x1a2   :  { %952 = vmatpush1.bf16.msra.mxu1 %v681_v50  ;;  %993 = vmatpush1.bf16.msra.mxu0 %v809_v51  ;;  %v510_v50 = vrot.slane %v493_v39, %v3072_v40  ;;  %v627_v39 = vld [vmem:[#allocation10 + $0x250] sm:$0xff] }
 0x1a3   :  { %953 = vmatprep.subr.bf16.mxu1 %v802_v52  ;;  %994 = vmatprep.subr.bf16.mxu0 %v930_v53 }
 0x1a6   :  { %954 = vmatpush2.bf16.msra.mxu1 %v801_v56  ;;  %995 = vmatpush2.bf16.msra.mxu0 %v929_v57  ;;  %v536_v56 = vrot.slane %v519_v41, %v3072_v40 }
 0x1a7   :  { %955 = vmatprep.subr.bf16.mxu1 %v794_v58  ;;  %996 = vmatprep.subr.bf16.mxu0 %v922_v59 }
 0x1aa   :  { %956 = vmatpush2.bf16.msra.mxu1 %v793_v62  ;;  %997 = vmatpush2.bf16.msra.mxu0 %v921_v63 }
 0x1ab   :  { %957 = vmatprep.subr.bf16.mxu1 %v786_v0  ;;  %998 = vmatprep.subr.bf16.mxu0 %v914_v1 }
 0x1ae   :  { %958 = vmatpush2.bf16.msra.mxu1 %v785_v4  ;;  %999 = vmatpush2.bf16.msra.mxu0 %v913_v5 }
 0x1af   :  { %959 = vmatprep.subr.bf16.mxu1 %v778_v6  ;;  %1000 = vmatprep.subr.bf16.mxu0 %v906_v7  ;;  %v579_v7 = vld [vmem:[#allocation10 + $0xd0] sm:$0xff] }
 0x1b2   :  { %960 = vmatpush2.bf16.msra.mxu1 %v777_v10  ;;  %1001 = vmatpush2.bf16.msra.mxu0 %v905_v11 }
 0x1b3   :  { %961 = vmatprep.subr.bf16.mxu1 %v770_v12  ;;  %1002 = vmatprep.subr.bf16.mxu0 %v898_v13  ;;  %v739_v13 = vunpack.c.h.s8.bf16 %v579_v7 }
 0x1b6   :  { %962 = vmatpush2.bf16.msra.mxu1 %v769_v16  ;;  %1003 = vmatpush2.bf16.msra.mxu0 %v897_v17  ;;  %v732_v17 = vunpack.c.l.s8.bf16 %v3062_v34 }
 0x1b7   :  { %963 = vmatprep.subr.bf16.mxu1 %v762_v18  ;;  %1004 = vmatprep.subr.bf16.mxu0 %v890_v19  ;;  %v860_v18 = vunpack.c.l.s8.bf16 %v3064_v35  ;;  %v572_v19 = vld [vmem:[#allocation10 + $0x98] sm:$0xff] }
 0x1b8   :  { %v724_v23 = vunpack.c.h.s8.bf16 %v572_v19 }
 0x1ba   :  { %964 = vmatpush2.bf16.msra.mxu1 %v761_v20  ;;  %1005 = vmatpush2.bf16.msra.mxu0 %v889_v21  ;;  %v636_v20 = vld [vmem:[#allocation10 + $0x298] sm:$0xff]  ;;  %v731_v21 = vunpack.c.l.s8.bf16 %v579_v7 }
 0x1bb   :  { %965 = vmatprep.subr.bf16.mxu1 %v754_v26  ;;  %1006 = vmatprep.subr.bf16.mxu0 %v882_v27  ;;  %v852_v24 = vunpack.c.h.s8.bf16 %v636_v20  ;;  %v635_v26 = vld [vmem:[#allocation10 + $0x290] sm:$0xff]  ;;  %v723_v27 = vunpack.c.h.s8.bf16 %v571_v25 }
 0x1bc   :  { %v843_v34 = vunpack.c.l.s8.bf16 %v635_v26 }
 0x1be   :  { %966 = vmatpush2.bf16.msra.mxu1 %v753_v28  ;;  %1007 = vmatpush2.bf16.msra.mxu0 %v881_v29  ;;  %v851_v28 = vunpack.c.h.s8.bf16 %v635_v26  ;;  %v716_v29 = vunpack.c.l.s8.bf16 %v572_v19  ;;  %v667_v19 = vld [vmem:[#allocation10 + $0x390] sm:$0xff] }
 0x1bf   :  { %967 = vmatprep.subr.bf16.mxu1 %v746_v30  ;;  %1008 = vmatprep.subr.bf16.mxu0 %v874_v31  ;;  %v844_v30 = vunpack.c.l.s8.bf16 %v636_v20  ;;  %v564_v31 = vld [vmem:[#allocation10 + $0x58] sm:$0xff] }
 0x1c0   :  { %v708_v35 = vunpack.c.h.s8.bf16 %v564_v31 }
 0x1c2   :  { %968 = vmatpush2.bf16.msra.mxu1 %v745_v32  ;;  %1009 = vmatpush2.bf16.msra.mxu0 %v873_v33  ;;  %v628_v32 = vld [vmem:[#allocation10 + $0x258] sm:$0xff]  ;;  %v715_v33 = vunpack.c.l.s8.bf16 %v571_v25 }
 0x1c3   :  { %1019 = vmatprep.subr.bf16.mxu1 %v740_v36  ;;  %1060 = vmatprep.subr.bf16.mxu0 %v868_v37  ;;  %v836_v36 = vunpack.c.h.s8.bf16 %v628_v32  ;;  %v563_v37 = vld [vmem:[#allocation10 + $0x50] sm:$0xff]  ;;  %v660_v25 = vld [vmem:[#allocation10 + $0x358] sm:$0xff] }
 0x1c4   :  { %v707_v41 = vunpack.c.h.s8.bf16 %v563_v37 }
 0x245   :  { %v445_v51 = vpop.f32.mrf.mxu1  ;;  %v486_v52 = vpop.f32.mrf.mxu0 }
 0x246   :  { %v515_v53 = vmul.f32 %v498_v42, %v445_v51  ;;  %v517_v54 = vmul.f32 %v506_v43, %v486_v52  ;;  %v835_v42 = vunpack.c.h.s8.bf16 %v627_v39  ;;  %v700_v43 = vunpack.c.l.s8.bf16 %v564_v31  ;;  %v659_v31 = vld [vmem:[#allocation10 + $0x350] sm:$0xff] }
 0x247   :  { %v447_v57 = vpop.f32.mrf.mxu1  ;;  %v488_v58 = vpop.f32.mrf.mxu0  ;;  %v827_v51 = vunpack.c.l.s8.bf16 %v627_v39 }
 0x248   :  { %v541_v59 = vadd.f32 %v524_v44, %v515_v53  ;;  %v543_v60 = vadd.f32 %v532_v45, %v517_v54  ;;  %v516_v61 = vmul.f32 %v502_v48, %v447_v57  ;;  %v518_v62 = vmul.f32 %v510_v50, %v488_v58  ;;  %v556_v45 = vld [vmem:[#allocation10 + $0x18] sm:$0xff]  ;;  %v555_v54 = vld [vmem:[#allocation10 + $0x10] sm:$0xff] }
 0x249   :  { %v449_v63 = vpop.f32.mrf.mxu1  ;;  %v490_v0 = vpop.f32.mrf.mxu0  ;;  %v828_v44 = vunpack.c.l.s8.bf16 %v628_v32  ;;  %v620_v48 = vld [vmem:[#allocation10 + $0x218] sm:$0xff]  ;;  %v699_v50 = vunpack.c.l.s8.bf16 %v563_v37  ;;  %v692_v52 = vunpack.c.h.s8.bf16 %v556_v45  ;;  %v684_v58 = vunpack.c.l.s8.bf16 %v556_v45  ;;  %v651_v45 = vld [vmem:[#allocation10 + $0x310] sm:$0xff] }
 0x24a   :  { %v542_v1 = vadd.f32 %v528_v55, %v516_v61  ;;  %v544_v2 = vadd.f32 %v536_v56, %v518_v62  ;;  %v545_v3 = vmax.f32 %v541_v59, 0.0  ;;  %v547_v4 = vmax.f32 %v543_v60, 0.0  ;;  %v619_v55 = vld [vmem:[#allocation10 + $0x210] sm:$0xff]  ;;  %v612_v60 = vld [vmem:[#allocation10 + $0x1d8] sm:$0xff] }
 0x24b   :  { %v450_v5 = vpop.f32.mrf.mxu1  ;;  %v491_v6 = vpop.f32.mrf.mxu0  ;;  %v820_v53 = vunpack.c.h.s8.bf16 %v620_v48  ;;  %v691_v56 = vunpack.c.h.s8.bf16 %v555_v54  ;;  %v819_v57 = vunpack.c.h.s8.bf16 %v619_v55  ;;  %v812_v59 = vunpack.c.l.s8.bf16 %v620_v48  ;;  %v676_v61 = vld [vmem:[#allocation10 + $0x3d8] sm:$0xff] }
 0x24c   :  { %v546_v9 = vmax.f32 %v542_v1, 0.0  ;;  %v548_v10 = vmax.f32 %v544_v2, 0.0  ;;  %v3086_v15 = vpack.c.bf16 %v545_v3, %v545_v3  ;;  %v3088_v16 = vpack.c.bf16 %v547_v4, %v547_v4  ;;  %v611_v2 = vld [vmem:[#allocation10 + $0x1d0] sm:$0xff]  ;;  %v652_v37 = vld [vmem:[#allocation10 + $0x318] sm:$0xff] }
 0x24d   :  { %v683_v62 = vunpack.c.l.s8.bf16 %v555_v54  ;;  %v811_v63 = vunpack.c.l.s8.bf16 %v619_v55  ;;  %v804_v0 = vunpack.c.h.s8.bf16 %v612_v60  ;;  %v932_v1 = vunpack.c.h.s8.bf16 %v676_v61  ;;  %v675_v3 = vld [vmem:[#allocation10 + $0x3d0] sm:$0xff]  ;;  %v646_v54 = vld [vmem:[#allocation10 + $0x2e8] sm:$0xff] }
 0x24e   :  { %v3082_v11 = vpack.c.bf16 %v546_v9, %v546_v9  ;;  %v3084_v12 = vpack.c.bf16 %v548_v10, %v548_v10  ;;  %v803_v4 = vunpack.c.h.s8.bf16 %v611_v2  ;;  %v931_v5 = vunpack.c.h.s8.bf16 %v675_v3  ;;  %v668_v9 = vld [vmem:[#allocation10 + $0x398] sm:$0xff] }
 0x24f   :  { %v796_v6 = vunpack.c.l.s8.bf16 %v612_v60  ;;  %v924_v7 = vunpack.c.l.s8.bf16 %v676_v61  ;;  %v795_v10 = vunpack.c.l.s8.bf16 %v611_v2  ;;  %v645_v60 = vld [vmem:[#allocation10 + $0x2e0] sm:$0xff]  ;;  %v638_v2 = vld [vmem:[#allocation10 + $0x2a8] sm:$0xff] }
 0x250   :  { %969 = vmatprep.mubr.bf16.mxu1 %v3082_v11  ;;  %1010 = vmatprep.mubr.bf16.mxu0 %v3084_v12 }
 0x251   :  { %970 = vmatmul.mubr.bf16.vlgmr.msra.gmra.mxu1 %v3086_v15  ;;  %1011 = vmatmul.mubr.bf16.vlgmr.msra.gmra.mxu0 %v3088_v16 }
 0x252   :  { %1020 = vmatpush1.bf16.msra.mxu1 %v739_v13  ;;  %1061 = vmatpush1.bf16.msra.mxu0 %v867_v14  ;;  %v923_v13 = vunpack.c.l.s8.bf16 %v675_v3  ;;  %v788_v14 = vunpack.c.h.s8.bf16 %v604_v8 }
 0x253   :  { %1051 = vmatprep.mubr.bf16.mxu1 %v3082_v11  ;;  %1092 = vmatprep.mubr.bf16.mxu0 %v3084_v12 }
 0x254   :  { %1021 = vmatprep.subr.bf16.mxu1 %v732_v17  ;;  %1062 = vmatprep.subr.bf16.mxu0 %v860_v18  ;;  %v916_v17 = vunpack.c.h.s8.bf16 %v668_v9  ;;  %v603_v18 = vld [vmem:[#allocation10 + $0x190] sm:$0xff] }
 0x255   :  { %v787_v20 = vunpack.c.h.s8.bf16 %v603_v18  ;;  %v779_v26 = vunpack.c.l.s8.bf16 %v603_v18  ;;  %v630_v18 = vld [vmem:[#allocation10 + $0x268] sm:$0xff] }
 0x256   :  { %1022 = vmatpush1.bf16.msra.mxu1 %v731_v21  ;;  %1063 = vmatpush1.bf16.msra.mxu0 %v859_v22  ;;  %v915_v21 = vunpack.c.h.s8.bf16 %v667_v19  ;;  %v780_v22 = vunpack.c.l.s8.bf16 %v604_v8  ;;  %v637_v8 = vld [vmem:[#allocation10 + $0x2a0] sm:$0xff] }
 0x257   :  { %1023 = vmatprep.subr.bf16.mxu1 %v724_v23  ;;  %1064 = vmatprep.subr.bf16.mxu0 %v852_v24  ;;  %v908_v23 = vunpack.c.l.s8.bf16 %v668_v9  ;;  %v596_v24 = vld [vmem:[#allocation10 + $0x158] sm:$0xff] }
 0x25a   :  { %1024 = vmatpush1.bf16.msra.mxu1 %v723_v27  ;;  %1065 = vmatpush1.bf16.msra.mxu0 %v851_v28  ;;  %v907_v27 = vunpack.c.l.s8.bf16 %v667_v19  ;;  %v772_v28 = vunpack.c.h.s8.bf16 %v596_v24 }
 0x25b   :  { %1025 = vmatprep.subr.bf16.mxu1 %v716_v29  ;;  %1066 = vmatprep.subr.bf16.mxu0 %v844_v30  ;;  %v900_v29 = vunpack.c.h.s8.bf16 %v660_v25  ;;  %v595_v30 = vld [vmem:[#allocation10 + $0x150] sm:$0xff] }
 0x25c   :  { %v771_v32 = vunpack.c.h.s8.bf16 %v595_v30  ;;  %v763_v39 = vunpack.c.l.s8.bf16 %v595_v30  ;;  %v622_v30 = vld [vmem:[#allocation10 + $0x228] sm:$0xff] }
 0x25e   :  { %1026 = vmatpush1.bf16.msra.mxu1 %v715_v33  ;;  %1067 = vmatpush1.bf16.msra.mxu0 %v843_v34  ;;  %v899_v33 = vunpack.c.h.s8.bf16 %v659_v31  ;;  %v764_v34 = vunpack.c.l.s8.bf16 %v596_v24  ;;  %v629_v24 = vld [vmem:[#allocation10 + $0x260] sm:$0xff] }
 0x25f   :  { %1027 = vmatprep.subr.bf16.mxu1 %v708_v35  ;;  %1068 = vmatprep.subr.bf16.mxu0 %v836_v36  ;;  %v892_v35 = vunpack.c.l.s8.bf16 %v660_v25  ;;  %v588_v36 = vld [vmem:[#allocation10 + $0x118] sm:$0xff] }
 0x262   :  { %1028 = vmatpush1.bf16.msra.mxu1 %v707_v41  ;;  %1069 = vmatpush1.bf16.msra.mxu0 %v835_v42  ;;  %v891_v41 = vunpack.c.l.s8.bf16 %v659_v31  ;;  %v756_v42 = vunpack.c.h.s8.bf16 %v588_v36 }
 0x263   :  { %1029 = vmatprep.subr.bf16.mxu1 %v700_v43  ;;  %1070 = vmatprep.subr.bf16.mxu0 %v828_v44  ;;  %v884_v43 = vunpack.c.h.s8.bf16 %v652_v37  ;;  %v587_v44 = vld [vmem:[#allocation10 + $0x110] sm:$0xff] }
 0x264   :  { %v755_v48 = vunpack.c.h.s8.bf16 %v587_v44  ;;  %v747_v55 = vunpack.c.l.s8.bf16 %v587_v44  ;;  %v678_v44 = vld [vmem:[#allocation10 + $0x3e8] sm:$0xff] }
 0x266   :  { %1030 = vmatpush1.bf16.msra.mxu1 %v699_v50  ;;  %1071 = vmatpush1.bf16.msra.mxu0 %v827_v51  ;;  %v883_v50 = vunpack.c.h.s8.bf16 %v651_v45  ;;  %v748_v51 = vunpack.c.l.s8.bf16 %v588_v36  ;;  %v621_v36 = vld [vmem:[#allocation10 + $0x220] sm:$0xff] }
 0x267   :  { %1031 = vmatprep.subr.bf16.mxu1 %v692_v52  ;;  %1072 = vmatprep.subr.bf16.mxu0 %v820_v53  ;;  %v876_v52 = vunpack.c.l.s8.bf16 %v652_v37  ;;  %v582_v53 = vld [vmem:[#allocation10 + $0xe8] sm:$0xff] }
 0x26a   :  { %1032 = vmatpush1.bf16.msra.mxu1 %v691_v56  ;;  %1073 = vmatpush1.bf16.msra.mxu0 %v819_v57  ;;  %v875_v56 = vunpack.c.l.s8.bf16 %v651_v45  ;;  %v742_v57 = vunpack.c.h.s8.bf16 %v582_v53 }
 0x26b   :  { %1033 = vmatprep.subr.bf16.mxu1 %v684_v58  ;;  %1074 = vmatprep.subr.bf16.mxu0 %v812_v59  ;;  %v870_v58 = vunpack.c.h.s8.bf16 %v646_v54  ;;  %v581_v59 = vld [vmem:[#allocation10 + $0xe0] sm:$0xff] }
 0x26c   :  { %v741_v61 = vunpack.c.h.s8.bf16 %v581_v59  ;;  %v733_v3 = vunpack.c.l.s8.bf16 %v581_v59  ;;  %v670_v59 = vld [vmem:[#allocation10 + $0x3a8] sm:$0xff] }
 0x26e   :  { %1034 = vmatpush1.bf16.msra.mxu1 %v683_v62  ;;  %1075 = vmatpush1.bf16.msra.mxu0 %v811_v63  ;;  %v869_v62 = vunpack.c.h.s8.bf16 %v645_v60  ;;  %v734_v63 = vunpack.c.l.s8.bf16 %v582_v53  ;;  %v677_v53 = vld [vmem:[#allocation10 + $0x3e0] sm:$0xff] }
 0x26f   :  { %1035 = vmatprep.subr.bf16.mxu1 %v804_v0  ;;  %1076 = vmatprep.subr.bf16.mxu0 %v932_v1  ;;  %v862_v0 = vunpack.c.l.s8.bf16 %v646_v54  ;;  %v574_v1 = vld [vmem:[#allocation10 + $0xa8] sm:$0xff] }
 0x272   :  { %1036 = vmatpush2.bf16.msra.mxu1 %v803_v4  ;;  %1077 = vmatpush2.bf16.msra.mxu0 %v931_v5  ;;  %v861_v4 = vunpack.c.l.s8.bf16 %v645_v60  ;;  %v726_v5 = vunpack.c.h.s8.bf16 %v574_v1 }
 0x273   :  { %1037 = vmatprep.subr.bf16.mxu1 %v796_v6  ;;  %1078 = vmatprep.subr.bf16.mxu0 %v924_v7  ;;  %v573_v6 = vld [vmem:[#allocation10 + $0xa0] sm:$0xff]  ;;  %v854_v7 = vunpack.c.h.s8.bf16 %v638_v2 }
 0x274   :  { %v725_v9 = vunpack.c.h.s8.bf16 %v573_v6  ;;  %v717_v19 = vunpack.c.l.s8.bf16 %v573_v6  ;;  %v598_v6 = vld [vmem:[#allocation10 + $0x168] sm:$0xff] }
 0x276   :  { %1038 = vmatpush2.bf16.msra.mxu1 %v795_v10  ;;  %1079 = vmatpush2.bf16.msra.mxu0 %v923_v13  ;;  %v853_v10 = vunpack.c.h.s8.bf16 %v637_v8  ;;  %v718_v13 = vunpack.c.l.s8.bf16 %v574_v1  ;;  %v669_v1 = vld [vmem:[#allocation10 + $0x3a0] sm:$0xff] }
 0x277   :  { %1039 = vmatprep.subr.bf16.mxu1 %v788_v14  ;;  %1080 = vmatprep.subr.bf16.mxu0 %v916_v17  ;;  %v846_v14 = vunpack.c.l.s8.bf16 %v638_v2  ;;  %v566_v17 = vld [vmem:[#allocation10 + $0x68] sm:$0xff] }
 0x27a   :  { %1040 = vmatpush2.bf16.msra.mxu1 %v787_v20  ;;  %1081 = vmatpush2.bf16.msra.mxu0 %v915_v21  ;;  %v845_v20 = vunpack.c.l.s8.bf16 %v637_v8  ;;  %v710_v21 = vunpack.c.h.s8.bf16 %v566_v17 }
 0x27b   :  { %1041 = vmatprep.subr.bf16.mxu1 %v780_v22  ;;  %1082 = vmatprep.subr.bf16.mxu0 %v908_v23  ;;  %v565_v22 = vld [vmem:[#allocation10 + $0x60] sm:$0xff]  ;;  %v838_v23 = vunpack.c.h.s8.bf16 %v630_v18 }
 0x27c   :  { %v709_v25 = vunpack.c.h.s8.bf16 %v565_v22  ;;  %v701_v31 = vunpack.c.l.s8.bf16 %v565_v22  ;;  %v590_v22 = vld [vmem:[#allocation10 + $0x128] sm:$0xff] }
 0x27e   :  { %1042 = vmatpush2.bf16.msra.mxu1 %v779_v26  ;;  %1083 = vmatpush2.bf16.msra.mxu0 %v907_v27  ;;  %v837_v26 = vunpack.c.h.s8.bf16 %v629_v24  ;;  %v702_v27 = vunpack.c.l.s8.bf16 %v566_v17  ;;  %v661_v17 = vld [vmem:[#allocation10 + $0x360] sm:$0xff] }
 0x27f   :  { %1043 = vmatprep.subr.bf16.mxu1 %v772_v28  ;;  %1084 = vmatprep.subr.bf16.mxu0 %v900_v29  ;;  %v830_v28 = vunpack.c.l.s8.bf16 %v630_v18  ;;  %v558_v29 = vld [vmem:[#allocation10 + $0x28] sm:$0xff] }
 0x282   :  { %1044 = vmatpush2.bf16.msra.mxu1 %v771_v32  ;;  %1085 = vmatpush2.bf16.msra.mxu0 %v899_v33  ;;  %v829_v32 = vunpack.c.l.s8.bf16 %v629_v24  ;;  %v694_v33 = vunpack.c.h.s8.bf16 %v558_v29 }
 0x283   :  { %1045 = vmatprep.subr.bf16.mxu1 %v764_v34  ;;  %1086 = vmatprep.subr.bf16.mxu0 %v892_v35  ;;  %v557_v34 = vld [vmem:[#allocation10 + $0x20] sm:$0xff]  ;;  %v822_v35 = vunpack.c.h.s8.bf16 %v622_v30 }
 0x284   :  { %v693_v37 = vunpack.c.h.s8.bf16 %v557_v34  ;;  %v685_v45 = vunpack.c.l.s8.bf16 %v557_v34  ;;  %v584_v34 = vld [vmem:[#allocation10 + $0xf8] sm:$0xff] }
 0x286   :  { %1046 = vmatpush2.bf16.msra.mxu1 %v763_v39  ;;  %1087 = vmatpush2.bf16.msra.mxu0 %v891_v41  ;;  %v821_v39 = vunpack.c.h.s8.bf16 %v621_v36  ;;  %v686_v41 = vunpack.c.l.s8.bf16 %v558_v29  ;;  %v653_v29 = vld [vmem:[#allocation10 + $0x320] sm:$0xff] }
 0x287   :  { %1047 = vmatprep.subr.bf16.mxu1 %v756_v42  ;;  %1088 = vmatprep.subr.bf16.mxu0 %v884_v43  ;;  %v814_v42 = vunpack.c.l.s8.bf16 %v622_v30  ;;  %v614_v43 = vld [vmem:[#allocation10 + $0x1e8] sm:$0xff] }
 0x28a   :  { %1048 = vmatpush2.bf16.msra.mxu1 %v755_v48  ;;  %1089 = vmatpush2.bf16.msra.mxu0 %v883_v50  ;;  %v813_v48 = vunpack.c.l.s8.bf16 %v621_v36  ;;  %v806_v50 = vunpack.c.h.s8.bf16 %v614_v43 }
 0x28b   :  { %1049 = vmatprep.subr.bf16.mxu1 %v748_v51  ;;  %1090 = vmatprep.subr.bf16.mxu0 %v876_v52  ;;  %v613_v51 = vld [vmem:[#allocation10 + $0x1e0] sm:$0xff]  ;;  %v934_v52 = vunpack.c.h.s8.bf16 %v678_v44 }
 0x28c   :  { %v805_v54 = vunpack.c.h.s8.bf16 %v613_v51  ;;  %v797_v60 = vunpack.c.l.s8.bf16 %v613_v51 }
 0x28e   :  { %1050 = vmatpush2.bf16.msra.mxu1 %v747_v55  ;;  %1091 = vmatpush2.bf16.msra.mxu0 %v875_v56  ;;  %v933_v55 = vunpack.c.h.s8.bf16 %v677_v53  ;;  %v798_v56 = vunpack.c.l.s8.bf16 %v614_v43  ;;  %v647_v43 = vld [vmem:[#allocation10 + $0x2f0] sm:$0xff] }
 0x28f   :  { %1101 = vmatprep.subr.bf16.mxu1 %v742_v57  ;;  %1142 = vmatprep.subr.bf16.mxu0 %v870_v58  ;;  %v926_v57 = vunpack.c.l.s8.bf16 %v678_v44  ;;  %v606_v58 = vld [vmem:[#allocation10 + $0x1a8] sm:$0xff] }
 0x291   :  { %1052 = vmatmul.mubr.bf16.vlgmr.msra.gmra.mxu1 %v3086_v15  ;;  %1093 = vmatmul.mubr.bf16.vlgmr.msra.gmra.mxu0 %v3088_v16 }
 0x292   :  { %1102 = vmatpush1.bf16.msra.mxu1 %v741_v61  ;;  %1133 = vmatprep.mubr.bf16.mxu1 %v3082_v11  ;;  %v925_v61 = vunpack.c.l.s8.bf16 %v677_v53 }
 0x293   :  { %1143 = vmatpush1.bf16.msra.mxu0 %v869_v62  ;;  %1174 = vmatprep.mubr.bf16.mxu0 %v3084_v12  ;;  %v790_v62 = vunpack.c.h.s8.bf16 %v606_v58 }
 0x294   :  { %1103 = vmatprep.subr.bf16.mxu1 %v734_v63  ;;  %1144 = vmatprep.subr.bf16.mxu0 %v862_v0  ;;  %v605_v63 = vld [vmem:[#allocation10 + $0x1a0] sm:$0xff]  ;;  %v918_v0 = vunpack.c.h.s8.bf16 %v670_v59 }
 0x295   :  { %v789_v2 = vunpack.c.h.s8.bf16 %v605_v63  ;;  %v781_v8 = vunpack.c.l.s8.bf16 %v605_v63  ;;  %v568_v63 = vld [vmem:[#allocation10 + $0x78] sm:$0xff] }
 0x296   :  { %1104 = vmatpush1.bf16.msra.mxu1 %v733_v3  ;;  %v917_v3 = vunpack.c.h.s8.bf16 %v669_v1 }
 0x297   :  { %1145 = vmatpush1.bf16.msra.mxu0 %v861_v4  ;;  %1105 = vmatprep.subr.bf16.mxu1 %v726_v5  ;;  %v782_v4 = vunpack.c.l.s8.bf16 %v606_v58  ;;  %v910_v5 = vunpack.c.l.s8.bf16 %v670_v59  ;;  %v639_v58 = vld [vmem:[#allocation10 + $0x2b0] sm:$0xff] }
 0x298   :  { %1146 = vmatprep.subr.bf16.mxu0 %v854_v7  ;;  %v662_v7 = vld [vmem:[#allocation10 + $0x368] sm:$0xff] }
 0x29a   :  { %1106 = vmatpush1.bf16.msra.mxu1 %v725_v9  ;;  %v909_v9 = vunpack.c.l.s8.bf16 %v669_v1  ;;  %v847_v1 = vunpack.c.l.s8.bf16 %v639_v58 }
 0x29b   :  { %1147 = vmatpush1.bf16.msra.mxu0 %v853_v10  ;;  %1107 = vmatprep.subr.bf16.mxu1 %v718_v13  ;;  %v774_v10 = vunpack.c.h.s8.bf16 %v598_v6  ;;  %v597_v13 = vld [vmem:[#allocation10 + $0x160] sm:$0xff] }
 0x29c   :  { %1148 = vmatprep.subr.bf16.mxu0 %v846_v14  ;;  %v902_v14 = vunpack.c.h.s8.bf16 %v662_v7  ;;  %v773_v18 = vunpack.c.h.s8.bf16 %v597_v13  ;;  %v765_v24 = vunpack.c.l.s8.bf16 %v597_v13 }
 0x29e   :  { %1108 = vmatpush1.bf16.msra.mxu1 %v717_v19  ;;  %v901_v19 = vunpack.c.h.s8.bf16 %v661_v17 }
 0x29f   :  { %1149 = vmatpush1.bf16.msra.mxu0 %v845_v20  ;;  %1109 = vmatprep.subr.bf16.mxu1 %v710_v21  ;;  %v766_v20 = vunpack.c.l.s8.bf16 %v598_v6  ;;  %v894_v21 = vunpack.c.l.s8.bf16 %v662_v7  ;;  %v704_v7 = vunpack.c.l.s8.bf16 %v568_v63 }
 0x2a0   :  { %1150 = vmatprep.subr.bf16.mxu0 %v838_v23  ;;  %v654_v23 = vld [vmem:[#allocation10 + $0x328] sm:$0xff] }
 0x2a2   :  { %1110 = vmatpush1.bf16.msra.mxu1 %v709_v25  ;;  %v893_v25 = vunpack.c.l.s8.bf16 %v661_v17 }
 0x2a3   :  { %1151 = vmatpush1.bf16.msra.mxu0 %v837_v26  ;;  %1111 = vmatprep.subr.bf16.mxu1 %v702_v27  ;;  %v758_v26 = vunpack.c.h.s8.bf16 %v590_v22  ;;  %v589_v27 = vld [vmem:[#allocation10 + $0x120] sm:$0xff] }
 0x2a4   :  { %1152 = vmatprep.subr.bf16.mxu0 %v830_v28  ;;  %v886_v28 = vunpack.c.h.s8.bf16 %v654_v23  ;;  %v757_v30 = vunpack.c.h.s8.bf16 %v589_v27  ;;  %v749_v36 = vunpack.c.l.s8.bf16 %v589_v27 }
 0x2a6   :  { %1112 = vmatpush1.bf16.msra.mxu1 %v701_v31  ;;  %v885_v31 = vunpack.c.h.s8.bf16 %v653_v29 }
 0x2a7   :  { %1153 = vmatpush1.bf16.msra.mxu0 %v829_v32  ;;  %1113 = vmatprep.subr.bf16.mxu1 %v694_v33  ;;  %v750_v32 = vunpack.c.l.s8.bf16 %v590_v22  ;;  %v878_v33 = vunpack.c.l.s8.bf16 %v654_v23 }
 0x2a8   :  { %1154 = vmatprep.subr.bf16.mxu0 %v822_v35  ;;  %v648_v35 = vld [vmem:[#allocation10 + $0x2f8] sm:$0xff] }
 0x2a9   :  { %v864_v51 = vunpack.c.l.s8.bf16 %v648_v35 }
 0x2aa   :  { %1114 = vmatpush1.bf16.msra.mxu1 %v693_v37  ;;  %v877_v37 = vunpack.c.l.s8.bf16 %v653_v29 }
 0x2ab   :  { %1155 = vmatpush1.bf16.msra.mxu0 %v821_v39  ;;  %1115 = vmatprep.subr.bf16.mxu1 %v686_v41  ;;  %v744_v39 = vunpack.c.h.s8.bf16 %v584_v34  ;;  %v583_v41 = vld [vmem:[#allocation10 + $0xf0] sm:$0xff] }
 0x2ac   :  { %1156 = vmatprep.subr.bf16.mxu0 %v814_v42  ;;  %v872_v42 = vunpack.c.h.s8.bf16 %v648_v35  ;;  %v743_v44 = vunpack.c.h.s8.bf16 %v583_v41  ;;  %v735_v53 = vunpack.c.l.s8.bf16 %v583_v41 }
 0x2ae   :  { %1116 = vmatpush1.bf16.msra.mxu1 %v685_v45  ;;  %v871_v45 = vunpack.c.h.s8.bf16 %v647_v43 }
 0x2af   :  { %1157 = vmatpush1.bf16.msra.mxu0 %v813_v48  ;;  %1117 = vmatprep.subr.bf16.mxu1 %v806_v50  ;;  %v736_v48 = vunpack.c.l.s8.bf16 %v584_v34  ;;  %v576_v50 = vld [vmem:[#allocation10 + $0xb8] sm:$0xff] }
 0x2b0   :  { %1158 = vmatprep.subr.bf16.mxu0 %v934_v52  ;;  %v640_v52 = vld [vmem:[#allocation10 + $0x2b8] sm:$0xff] }
 0x2b2   :  { %1118 = vmatpush2.bf16.msra.mxu1 %v805_v54  ;;  %v863_v54 = vunpack.c.l.s8.bf16 %v647_v43 }
 0x2b3   :  { %1159 = vmatpush2.bf16.msra.mxu0 %v933_v55  ;;  %1119 = vmatprep.subr.bf16.mxu1 %v798_v56  ;;  %v728_v55 = vunpack.c.h.s8.bf16 %v576_v50  ;;  %v575_v56 = vld [vmem:[#allocation10 + $0xb0] sm:$0xff] }
 0x2b4   :  { %1160 = vmatprep.subr.bf16.mxu0 %v926_v57  ;;  %v856_v57 = vunpack.c.h.s8.bf16 %v640_v52  ;;  %v727_v59 = vunpack.c.h.s8.bf16 %v575_v56 }
 0x2b6   :  { %1120 = vmatpush2.bf16.msra.mxu1 %v797_v60  ;;  %v855_v60 = vunpack.c.h.s8.bf16 %v639_v58 }
 0x2b7   :  { %1161 = vmatpush2.bf16.msra.mxu0 %v925_v61  ;;  %1121 = vmatprep.subr.bf16.mxu1 %v790_v62  ;;  %v720_v61 = vunpack.c.l.s8.bf16 %v576_v50  ;;  %v848_v62 = vunpack.c.l.s8.bf16 %v640_v52 }
 0x2b8   :  { %1162 = vmatprep.subr.bf16.mxu0 %v918_v0  ;;  %v719_v0 = vunpack.c.l.s8.bf16 %v575_v56 }
 0x2ba   :  { %1122 = vmatpush2.bf16.msra.mxu1 %v789_v2  ;;  %v567_v2 = vld [vmem:[#allocation10 + $0x70] sm:$0xff] }
 0x2bb   :  { %1163 = vmatpush2.bf16.msra.mxu0 %v917_v3  ;;  %1123 = vmatprep.subr.bf16.mxu1 %v782_v4  ;;  %v631_v4 = vld [vmem:[#allocation10 + $0x270] sm:$0xff]  ;;  %v703_v13 = vunpack.c.l.s8.bf16 %v567_v2 }
 0x2bc   :  { %1164 = vmatprep.subr.bf16.mxu0 %v910_v5  ;;  %v711_v5 = vunpack.c.h.s8.bf16 %v567_v2  ;;  %v839_v6 = vunpack.c.h.s8.bf16 %v631_v4 }
 0x2be   :  { %1124 = vmatpush2.bf16.msra.mxu1 %v781_v8 }
 0x2bf   :  { %1165 = vmatpush2.bf16.msra.mxu0 %v909_v9  ;;  %1125 = vmatprep.subr.bf16.mxu1 %v774_v10  ;;  %v560_v9 = vld [vmem:[#allocation10 + $0x38] sm:$0xff] }
 0x2c0   :  { %1166 = vmatprep.subr.bf16.mxu0 %v902_v14  ;;  %v624_v10 = vld [vmem:[#allocation10 + $0x238] sm:$0xff]  ;;  %v831_v14 = vunpack.c.l.s8.bf16 %v631_v4  ;;  %v696_v17 = vunpack.c.h.s8.bf16 %v560_v9  ;;  %v688_v23 = vunpack.c.l.s8.bf16 %v560_v9 }
 0x2c2   :  { %1126 = vmatpush2.bf16.msra.mxu1 %v773_v18  ;;  %v559_v18 = vld [vmem:[#allocation10 + $0x30] sm:$0xff] }
 0x2c3   :  { %1167 = vmatpush2.bf16.msra.mxu0 %v901_v19  ;;  %1127 = vmatprep.subr.bf16.mxu1 %v766_v20  ;;  %v824_v19 = vunpack.c.h.s8.bf16 %v624_v10  ;;  %v623_v20 = vld [vmem:[#allocation10 + $0x230] sm:$0xff]  ;;  %v687_v27 = vunpack.c.l.s8.bf16 %v559_v18 }
 0x2c4   :  { %1168 = vmatprep.subr.bf16.mxu0 %v894_v21  ;;  %v695_v21 = vunpack.c.h.s8.bf16 %v559_v18  ;;  %v823_v22 = vunpack.c.h.s8.bf16 %v623_v20 }
 0x2c6   :  { %1128 = vmatpush2.bf16.msra.mxu1 %v765_v24  ;;  %v816_v24 = vunpack.c.l.s8.bf16 %v624_v10 }
 0x2c7   :  { %1169 = vmatpush2.bf16.msra.mxu0 %v893_v25  ;;  %1129 = vmatprep.subr.bf16.mxu1 %v758_v26  ;;  %v616_v25 = vld [vmem:[#allocation10 + $0x1f8] sm:$0xff] }
 0x2c8   :  { %1170 = vmatprep.subr.bf16.mxu0 %v886_v28  ;;  %v680_v26 = vld [vmem:[#allocation10 + $0x3f8] sm:$0xff]  ;;  %v815_v28 = vunpack.c.l.s8.bf16 %v623_v20  ;;  %v808_v29 = vunpack.c.h.s8.bf16 %v616_v25  ;;  %v800_v35 = vunpack.c.l.s8.bf16 %v616_v25 }
 0x2ca   :  { %1130 = vmatpush2.bf16.msra.mxu1 %v757_v30  ;;  %v615_v30 = vld [vmem:[#allocation10 + $0x1f0] sm:$0xff] }
 0x2cb   :  { %1171 = vmatpush2.bf16.msra.mxu0 %v885_v31  ;;  %1131 = vmatprep.subr.bf16.mxu1 %v750_v32  ;;  %v936_v31 = vunpack.c.h.s8.bf16 %v680_v26  ;;  %v679_v32 = vld [vmem:[#allocation10 + $0x3f0] sm:$0xff]  ;;  %v799_v41 = vunpack.c.l.s8.bf16 %v615_v30 }
 0x2cc   :  { %1172 = vmatprep.subr.bf16.mxu0 %v878_v33  ;;  %v807_v33 = vunpack.c.h.s8.bf16 %v615_v30  ;;  %v935_v34 = vunpack.c.h.s8.bf16 %v679_v32 }
 0x2ce   :  { %1132 = vmatpush2.bf16.msra.mxu1 %v749_v36  ;;  %v928_v36 = vunpack.c.l.s8.bf16 %v680_v26 }
 0x2cf   :  { %1173 = vmatpush2.bf16.msra.mxu0 %v877_v37  ;;  %1183 = vmatprep.subr.bf16.mxu1 %v744_v39  ;;  %v608_v37 = vld [vmem:[#allocation10 + $0x1b8] sm:$0xff] }
 0x2d0   :  { %1224 = vmatprep.subr.bf16.mxu0 %v872_v42  ;;  %v672_v39 = vld [vmem:[#allocation10 + $0x3b8] sm:$0xff]  ;;  %v927_v42 = vunpack.c.l.s8.bf16 %v679_v32  ;;  %v792_v43 = vunpack.c.h.s8.bf16 %v608_v37  ;;  %v784_v52 = vunpack.c.l.s8.bf16 %v608_v37  ;;  %v1422_v32 = vld [vmem:[#allocation13 + $0x148] sm:$0xff] }
 0x2d1   :  { %1134 = vmatmul.mubr.bf16.vlgmr.msra.gmra.mxu1 %v3086_v15 }
 0x2d2   :  { %1175 = vmatmul.mubr.bf16.vlgmr.msra.gmra.mxu0 %v3088_v16  ;;  %1184 = vmatpush1.bf16.msra.mxu1 %v743_v44  ;;  %v607_v44 = vld [vmem:[#allocation10 + $0x1b0] sm:$0xff] }
 0x2d3   :  { %1215 = vmatprep.mubr.bf16.mxu1 %v3082_v11  ;;  %1225 = vmatpush1.bf16.msra.mxu0 %v871_v45  ;;  %v632_v11 = vld [vmem:[#allocation10 + $0x278] sm:$0xff]  ;;  %v920_v45 = vunpack.c.h.s8.bf16 %v672_v39  ;;  %v791_v50 = vunpack.c.h.s8.bf16 %v607_v44  ;;  %v783_v56 = vunpack.c.l.s8.bf16 %v607_v44  ;;  %v1421_v44 = vld [vmem:[#allocation13 + $0x140] sm:$0xff] }
 0x2d4   :  { %1256 = vmatprep.mubr.bf16.mxu0 %v3084_v12  ;;  %1185 = vmatprep.subr.bf16.mxu1 %v736_v48  ;;  %v712_v12 = vunpack.c.h.s8.bf16 %v568_v63  ;;  %v840_v3 = vunpack.c.h.s8.bf16 %v632_v11  ;;  %v832_v8 = vunpack.c.l.s8.bf16 %v632_v11  ;;  %v671_v48 = vld [vmem:[#allocation10 + $0x3b0] sm:$0xff] }
 0x2d5   :  { %1226 = vmatprep.subr.bf16.mxu0 %v864_v51  ;;  %v919_v51 = vunpack.c.h.s8.bf16 %v671_v48 }
 0x2d6   :  { %1186 = vmatpush1.bf16.msra.mxu1 %v735_v53  ;;  %v912_v53 = vunpack.c.l.s8.bf16 %v672_v39  ;;  %v1389_v39 = vld [vmem:[#allocation13 + $0x40] sm:$0xff] }
 0x2d7   :  { %1227 = vmatpush1.bf16.msra.mxu0 %v863_v54  ;;  %1187 = vmatprep.subr.bf16.mxu1 %v728_v55  ;;  %v600_v54 = vld [vmem:[#allocation10 + $0x178] sm:$0xff] }
 0x2d8   :  { %1228 = vmatprep.subr.bf16.mxu0 %v856_v57  ;;  %v664_v55 = vld [vmem:[#allocation10 + $0x378] sm:$0xff]  ;;  %v911_v57 = vunpack.c.l.s8.bf16 %v671_v48  ;;  %v776_v58 = vunpack.c.h.s8.bf16 %v600_v54  ;;  %v768_v11 = vunpack.c.l.s8.bf16 %v600_v54 }
 0x2da   :  { %1188 = vmatpush1.bf16.msra.mxu1 %v727_v59  ;;  %v599_v59 = vld [vmem:[#allocation10 + $0x170] sm:$0xff] }
 0x2db   :  { %1229 = vmatpush1.bf16.msra.mxu0 %v855_v60  ;;  %1189 = vmatprep.subr.bf16.mxu1 %v720_v61  ;;  %v904_v60 = vunpack.c.h.s8.bf16 %v664_v55  ;;  %v663_v61 = vld [vmem:[#allocation10 + $0x370] sm:$0xff]  ;;  %v767_v2 = vunpack.c.l.s8.bf16 %v599_v59 }
 0x2dc   :  { %1230 = vmatprep.subr.bf16.mxu0 %v848_v62  ;;  %v775_v62 = vunpack.c.h.s8.bf16 %v599_v59  ;;  %v903_v63 = vunpack.c.h.s8.bf16 %v663_v61  ;;  %v1418_v59 = vld [vmem:[#allocation13 + $0x128] sm:$0xff] }
 0x2de   :  { %1190 = vmatpush1.bf16.msra.mxu1 %v719_v0  ;;  %v896_v0 = vunpack.c.l.s8.bf16 %v664_v55  ;;  %v1593_v55 = vunpack.c.h.s8.bf16 %v1421_v44 }
 0x2df   :  { %1231 = vmatpush1.bf16.msra.mxu0 %v847_v1  ;;  %1191 = vmatprep.subr.bf16.mxu1 %v712_v12  ;;  %v592_v1 = vld [vmem:[#allocation10 + $0x138] sm:$0xff] }
 0x2e0   :  { %1232 = vmatprep.subr.bf16.mxu0 %v840_v3  ;;  %v656_v12 = vld [vmem:[#allocation10 + $0x338] sm:$0xff]  ;;  %v895_v3 = vunpack.c.l.s8.bf16 %v663_v61  ;;  %v760_v4 = vunpack.c.h.s8.bf16 %v592_v1  ;;  %v752_v10 = vunpack.c.l.s8.bf16 %v592_v1  ;;  %v1586_v1 = vunpack.c.h.s8.bf16 %v1418_v59 }
 0x2e2   :  { %1192 = vmatpush1.bf16.msra.mxu1 %v711_v5  ;;  %v591_v5 = vld [vmem:[#allocation10 + $0x130] sm:$0xff] }
 0x2e3   :  { %1233 = vmatpush1.bf16.msra.mxu0 %v839_v6  ;;  %1193 = vmatprep.subr.bf16.mxu1 %v704_v7  ;;  %v888_v6 = vunpack.c.h.s8.bf16 %v656_v12  ;;  %v655_v7 = vld [vmem:[#allocation10 + $0x330] sm:$0xff]  ;;  %v751_v18 = vunpack.c.l.s8.bf16 %v591_v5 }
 0x2e4   :  { %1234 = vmatprep.subr.bf16.mxu0 %v832_v8  ;;  %v759_v8 = vunpack.c.h.s8.bf16 %v591_v5  ;;  %v887_v9 = vunpack.c.h.s8.bf16 %v655_v7  ;;  %v1382_v5 = vld [vmem:[#allocation13 + $0x8] sm:$0xff] }
 0x2e6   :  { %1194 = vmatpush1.bf16.msra.mxu1 %v703_v13  ;;  %v880_v13 = vunpack.c.l.s8.bf16 %v656_v12  ;;  %v1417_v12 = vld [vmem:[#allocation13 + $0x120] sm:$0xff] }
 0x2e7   :  { %1235 = vmatpush1.bf16.msra.mxu0 %v831_v14  ;;  %1195 = vmatprep.subr.bf16.mxu1 %v696_v17  ;;  %v1394_v14 = vld [vmem:[#allocation13 + $0x68] sm:$0xff] }
 0x2e8   :  { %1236 = vmatprep.subr.bf16.mxu0 %v824_v19  ;;  %v1426_v17 = vld [vmem:[#allocation13 + $0x168] sm:$0xff]  ;;  %v879_v19 = vunpack.c.l.s8.bf16 %v655_v7  ;;  %v1538_v20 = vunpack.c.h.s8.bf16 %v1394_v14  ;;  %v1534_v25 = vunpack.c.l.s8.bf16 %v1394_v14 }
 0x2e9   :  { %v1414_v7 = vld [vmem:[#allocation13 + $0x108] sm:$0xff] }
 0x2ea   :  { %1196 = vmatpush1.bf16.msra.mxu1 %v695_v21  ;;  %v1393_v21 = vld [vmem:[#allocation13 + $0x60] sm:$0xff]  ;;  %v1578_v14 = vunpack.c.h.s8.bf16 %v1414_v7 }
 0x2eb   :  { %1237 = vmatpush1.bf16.msra.mxu0 %v823_v22  ;;  %1197 = vmatprep.subr.bf16.mxu1 %v688_v23  ;;  %v1602_v22 = vunpack.c.h.s8.bf16 %v1426_v17  ;;  %v1425_v23 = vld [vmem:[#allocation13 + $0x160] sm:$0xff] }
 0x2ec   :  { %1238 = vmatprep.subr.bf16.mxu0 %v816_v24  ;;  %v1537_v24 = vunpack.c.h.s8.bf16 %v1393_v21  ;;  %v1601_v26 = vunpack.c.h.s8.bf16 %v1425_v23 }
 0x2ee   :  { %1198 = vmatpush1.bf16.msra.mxu1 %v687_v27  ;;  %v1390_v27 = vld [vmem:[#allocation13 + $0x48] sm:$0xff] }
 0x2ef   :  { %1239 = vmatpush1.bf16.msra.mxu0 %v815_v28  ;;  %1199 = vmatprep.subr.bf16.mxu1 %v808_v29  ;;  %v1598_v28 = vunpack.c.l.s8.bf16 %v1426_v17  ;;  %v1530_v37 = vunpack.c.h.s8.bf16 %v1390_v27  ;;  %v1526_v54 = vunpack.c.l.s8.bf16 %v1390_v27  ;;  %v1413_v17 = vld [vmem:[#allocation13 + $0x100] sm:$0xff] }
 0x2f0   :  { %1240 = vmatprep.subr.bf16.mxu0 %v936_v31  ;;  %v3114_v31 = vld [vmem:[%s3246_s8] sm:$0xff]  ;;  %v1573_v27 = vunpack.c.l.s8.bf16 %v1413_v17 }
 0x2f2   :  { %1200 = vmatpush2.bf16.msra.mxu1 %v807_v33  ;;  %v1274_v33 = vrot.slane %v3114_v31, %v3056_v49 }
 0x2f3   :  { %1241 = vmatpush2.bf16.msra.mxu0 %v935_v34  ;;  %1201 = vmatprep.subr.bf16.mxu1 %v800_v35  ;;  %v1533_v34 = vunpack.c.l.s8.bf16 %v1393_v21  ;;  %v3119_v35 = vld [vmem:[#allocation12] sm:$0xff]  ;;  %v1410_v21 = vld [vmem:[#allocation13 + $0xe8] sm:$0xff] }
 0x2f4   :  { %1242 = vmatprep.subr.bf16.mxu0 %v928_v36 }
 0x2f6   :  { %1202 = vmatpush2.bf16.msra.mxu1 %v799_v41  ;;  %v1597_v41 = vunpack.c.l.s8.bf16 %v1425_v23  ;;  %v1442_v23 = vld [vmem:[#allocation13 + $0x1e8] sm:$0xff] }
 0x2f7   :  { %1243 = vmatpush2.bf16.msra.mxu0 %v927_v42  ;;  %1203 = vmatprep.subr.bf16.mxu1 %v792_v43  ;;  %v1324_v43 = vrot.slane %v3119_v35, %v3056_v49 }
 0x2f8   :  { %1244 = vmatprep.subr.bf16.mxu0 %v920_v45 }
 0x2fa   :  { %1204 = vmatpush2.bf16.msra.mxu1 %v791_v50 }
 0x2fb   :  { %1245 = vmatpush2.bf16.msra.mxu0 %v919_v51  ;;  %1205 = vmatprep.subr.bf16.mxu1 %v784_v52  ;;  %v1529_v51 = vunpack.c.h.s8.bf16 %v1389_v39 }
 0x2fc   :  { %1246 = vmatprep.subr.bf16.mxu0 %v912_v53 }
 0x2fe   :  { %1206 = vmatpush2.bf16.msra.mxu1 %v783_v56 }
 0x2ff   :  { %1247 = vmatpush2.bf16.msra.mxu0 %v911_v57  ;;  %1207 = vmatprep.subr.bf16.mxu1 %v776_v58  ;;  %v1386_v57 = vld [vmem:[#allocation13 + $0x28] sm:$0xff]  ;;  %v1590_v58 = vunpack.c.l.s8.bf16 %v1422_v32 }
 0x300   :  { %1248 = vmatprep.subr.bf16.mxu0 %v904_v60  ;;  %v1525_v60 = vunpack.c.l.s8.bf16 %v1389_v39  ;;  %v1438_v39 = vld [vmem:[#allocation13 + $0x1c8] sm:$0xff] }
 0x302   :  { %1208 = vmatpush2.bf16.msra.mxu1 %v775_v62  ;;  %v1522_v62 = vunpack.c.h.s8.bf16 %v1386_v57 }
 0x303   :  { %1249 = vmatpush2.bf16.msra.mxu0 %v903_v63  ;;  %1209 = vmatprep.subr.bf16.mxu1 %v768_v11  ;;  %v1385_v63 = vld [vmem:[#allocation13 + $0x20] sm:$0xff]  ;;  %v1589_v11 = vunpack.c.l.s8.bf16 %v1421_v44  ;;  %v1626_v44 = vunpack.c.h.s8.bf16 %v1438_v39 }
 0x304   :  { %1250 = vmatprep.subr.bf16.mxu0 %v896_v0 }
 0x306   :  { %1210 = vmatpush2.bf16.msra.mxu1 %v767_v2  ;;  %v1521_v2 = vunpack.c.h.s8.bf16 %v1385_v63 }
 0x307   :  { %1251 = vmatpush2.bf16.msra.mxu0 %v895_v3  ;;  %1211 = vmatprep.subr.bf16.mxu1 %v760_v4  ;;  %v1518_v3 = vunpack.c.l.s8.bf16 %v1386_v57  ;;  %v1585_v4 = vunpack.c.h.s8.bf16 %v1417_v12  ;;  %v1401_v57 = vld [vmem:[#allocation13 + $0xa0] sm:$0xff] }
 0x308   :  { %1252 = vmatprep.subr.bf16.mxu0 %v888_v6  ;;  %v1582_v6 = vunpack.c.l.s8.bf16 %v1418_v59 }
 0x30a   :  { %1212 = vmatpush2.bf16.msra.mxu1 %v759_v8  ;;  %v1517_v8 = vunpack.c.l.s8.bf16 %v1385_v63  ;;  %v1270_v63 = vrot.slane %v3114_v31, %v3053_v47 }
 0x30b   :  { %1253 = vmatpush2.bf16.msra.mxu0 %v887_v9  ;;  %1213 = vmatprep.subr.bf16.mxu1 %v752_v10  ;;  %v1514_v9 = vunpack.c.h.s8.bf16 %v1382_v5  ;;  %v1381_v10 = vld [vmem:[#allocation13] sm:$0xff] }
 0x30c   :  { %1254 = vmatprep.subr.bf16.mxu0 %v880_v13  ;;  %v1581_v13 = vunpack.c.l.s8.bf16 %v1417_v12  ;;  %v1398_v12 = vld [vmem:[#allocation13 + $0x88] sm:$0xff] }
 0x30e   :  { %1214 = vmatpush2.bf16.msra.mxu1 %v751_v18  ;;  %v1513_v18 = vunpack.c.h.s8.bf16 %v1381_v10 }
 0x30f   :  { %1255 = vmatpush2.bf16.msra.mxu0 %v879_v19  ;;  %1765 = vmatprep.subr.bf16.mxu1 %v1538_v20  ;;  %v1510_v19 = vunpack.c.l.s8.bf16 %v1382_v5  ;;  %v1577_v20 = vunpack.c.h.s8.bf16 %v1413_v17 }
 0x310   :  { %1806 = vmatprep.subr.bf16.mxu0 %v1602_v22  ;;  %v1574_v22 = vunpack.c.l.s8.bf16 %v1414_v7  ;;  %v1546_v7 = vunpack.c.h.s8.bf16 %v1398_v12 }
 0x311   :  { %1216 = vmatmul.mubr.bf16.vlgmr.msra.gmra.mxu1 %v3086_v15  ;;  %v3107_v29 = vpop.f32.mrf.mxu1  ;;  %v3109_v30 = vpop.f32.mrf.mxu0 }
 0x312   :  { %1257 = vmatmul.mubr.bf16.vlgmr.msra.gmra.mxu0 %v3088_v16  ;;  %1766 = vmatpush1.bf16.msra.mxu1 %v1537_v24  ;;  %v1594_v16 = vunpack.c.h.s8.bf16 %v1422_v32  ;;  %v1509_v24 = vunpack.c.l.s8.bf16 %v1381_v10  ;;  %v1441_v32 = vld [vmem:[#allocation13 + $0x1e0] sm:$0xff] }
 0x313   :  { %v973_v15 = vpop.f32.mrf.mxu1  ;;  %v1014_v36 = vpop.f32.mrf.mxu0  ;;  %1767 = vmatprep.subr.bf16.mxu1 %v1534_v25  ;;  %1807 = vmatpush1.bf16.msra.mxu0 %v1601_v26  ;;  %v1570_v25 = vunpack.c.h.s8.bf16 %v1410_v21  ;;  %v1409_v26 = vld [vmem:[#allocation13 + $0xe0] sm:$0xff] }
 0x314   :  { %v1015_v42 = vadd.f32 %v1014_v36, %v973_v15  ;;  %1808 = vmatprep.subr.bf16.mxu0 %v1598_v28  ;;  %v1634_v28 = vunpack.c.h.s8.bf16 %v1442_v23  ;;  %v1633_v15 = vunpack.c.h.s8.bf16 %v1441_v32  ;;  %v1406_v36 = vld [vmem:[#allocation13 + $0xc8] sm:$0xff] }
 0x315   :  { %v975_v45 = vpop.f32.mrf.mxu1  ;;  %v1016_v48 = vpop.f32.mrf.mxu0 }
 0x316   :  { %v1308_v50 = vmul.f32 %v1274_v33, %v1015_v42  ;;  %1768 = vmatpush1.bf16.msra.mxu1 %v1533_v34  ;;  %v1569_v33 = vunpack.c.h.s8.bf16 %v1409_v26  ;;  %v1566_v34 = vunpack.c.l.s8.bf16 %v1410_v21  ;;  %v1562_v42 = vunpack.c.h.s8.bf16 %v1406_v36  ;;  %v1437_v45 = vld [vmem:[#allocation13 + $0x1c0] sm:$0xff] }
 0x317   :  { %v976_v52 = vpop.f32.mrf.mxu1  ;;  %v1017_v53 = vpop.f32.mrf.mxu0  ;;  %1769 = vmatprep.subr.bf16.mxu1 %v1530_v37  ;;  %1809 = vmatpush1.bf16.msra.mxu0 %v1597_v41  ;;  %v1630_v37 = vunpack.c.l.s8.bf16 %v1442_v23  ;;  %v1565_v41 = vunpack.c.l.s8.bf16 %v1409_v26 }
 0x318   :  { %v1358_v56 = vadd.f32 %v1324_v43, %v1308_v50  ;;  %1810 = vmatprep.subr.bf16.mxu0 %v1594_v16  ;;  %v1405_v43 = vld [vmem:[#allocation13 + $0xc0] sm:$0xff]  ;;  %v1629_v16 = vunpack.c.l.s8.bf16 %v1441_v32  ;;  %v1558_v50 = vunpack.c.l.s8.bf16 %v1406_v36  ;;  %v1402_v52 = vld [vmem:[#allocation13 + $0xa8] sm:$0xff]  ;;  %v1622_v53 = vunpack.c.l.s8.bf16 %v1438_v39 }
 0x319   :  { %v1561_v48 = vunpack.c.h.s8.bf16 %v1405_v43  ;;  %v1328_v39 = vrot.slane %v3119_v35, %v3069_v38 }
 0x31a   :  { %1770 = vmatpush1.bf16.msra.mxu1 %v1529_v51  ;;  %v1366_v61 = vmax.f32 %v1358_v56, 0.0  ;;  %v1625_v51 = vunpack.c.h.s8.bf16 %v1437_v45  ;;  %v1554_v56 = vunpack.c.h.s8.bf16 %v1402_v52 }
 0x31b   :  { %1771 = vmatprep.subr.bf16.mxu1 %v1526_v54  ;;  %1811 = vmatpush1.bf16.msra.mxu0 %v1593_v55  ;;  %v1434_v54 = vld [vmem:[#allocation13 + $0x1a8] sm:$0xff]  ;;  %v1557_v55 = vunpack.c.l.s8.bf16 %v1405_v43 }
 0x31c   :  { %v3123_v0 = vpack.c.bf16 %v1366_v61, %v1366_v61  ;;  %1812 = vmatprep.subr.bf16.mxu0 %v1590_v58  ;;  %v1621_v58 = vunpack.c.l.s8.bf16 %v1437_v45  ;;  %v1618_v59 = vunpack.c.h.s8.bf16 %v1434_v54  ;;  %v1553_v61 = vunpack.c.h.s8.bf16 %v1401_v57  ;;  %v1453_v45 = vld [vmem:[#allocation13 + $0x240] sm:$0xff] }
 0x31e   :  { %1772 = vmatpush1.bf16.msra.mxu1 %v1525_v60  ;;  %1797 = vmatprep.mubr.bf16.mxu1 %v3123_v0  ;;  %v1433_v60 = vld [vmem:[#allocation13 + $0x1a0] sm:$0xff] }
 0x31f   :  { %1773 = vmatprep.subr.bf16.mxu1 %v1522_v62  ;;  %1813 = vmatpush1.bf16.msra.mxu0 %v1589_v11  ;;  %v1013_v62 = vadd.f32 %v3109_v30, %v3107_v29  ;;  %v1550_v11 = vunpack.c.l.s8.bf16 %v1402_v52  ;;  %v1397_v29 = vld [vmem:[#allocation13 + $0x80] sm:$0xff]  ;;  %v1613_v30 = vunpack.c.l.s8.bf16 %v1433_v60 }
 0x320   :  { %1814 = vmatprep.subr.bf16.mxu0 %v1586_v1  ;;  %v1617_v1 = vunpack.c.h.s8.bf16 %v1433_v60  ;;  %v1545_v10 = vunpack.c.h.s8.bf16 %v1397_v29  ;;  %v1541_v21 = vunpack.c.l.s8.bf16 %v1397_v29  ;;  %v1486_v29 = vld [vmem:[#allocation13 + $0x348] sm:$0xff] }
 0x321   :  { %v1307_v5 = vmul.f32 %v1270_v63, %v1013_v62  ;;  %v1489_v63 = vld [vmem:[#allocation13 + $0x360] sm:$0xff] }
 0x322   :  { %1774 = vmatpush1.bf16.msra.mxu1 %v1521_v2  ;;  %v1614_v2 = vunpack.c.l.s8.bf16 %v1434_v54 }
 0x323   :  { %1775 = vmatprep.subr.bf16.mxu1 %v1518_v3  ;;  %1815 = vmatpush1.bf16.msra.mxu0 %v1585_v4  ;;  %v1430_v3 = vld [vmem:[#allocation13 + $0x188] sm:$0xff]  ;;  %v1549_v4 = vunpack.c.l.s8.bf16 %v1401_v57 }
 0x324   :  { %1816 = vmatprep.subr.bf16.mxu0 %v1582_v6  ;;  %v1320_v6 = vrot.slane %v3119_v35, %v3053_v47 }
 0x326   :  { %1776 = vmatpush1.bf16.msra.mxu1 %v1517_v8  ;;  %v1610_v8 = vunpack.c.h.s8.bf16 %v1430_v3 }
 0x327   :  { %1777 = vmatprep.subr.bf16.mxu1 %v1514_v9  ;;  %1817 = vmatpush1.bf16.msra.mxu0 %v1581_v13  ;;  %v1429_v9 = vld [vmem:[#allocation13 + $0x180] sm:$0xff]  ;;  %v1357_v13 = vadd.f32 %v1320_v6, %v1307_v5 }
 0x328   :  { %1818 = vmatprep.subr.bf16.mxu0 %v1578_v14  ;;  %v1542_v14 = vunpack.c.l.s8.bf16 %v1398_v12  ;;  %v1609_v17 = vunpack.c.h.s8.bf16 %v1429_v9  ;;  %v1605_v23 = vunpack.c.l.s8.bf16 %v1429_v9  ;;  %v1725_v9 = vunpack.c.l.s8.bf16 %v1489_v63 }
 0x32a   :  { %1778 = vmatpush1.bf16.msra.mxu1 %v1513_v18  ;;  %v1606_v18 = vunpack.c.l.s8.bf16 %v1430_v3 }
 0x32b   :  { %1779 = vmatprep.subr.bf16.mxu1 %v1510_v19  ;;  %1819 = vmatpush1.bf16.msra.mxu0 %v1577_v20  ;;  %v1458_v19 = vld [vmem:[#allocation13 + $0x268] sm:$0xff] }
 0x32c   :  { %1820 = vmatprep.subr.bf16.mxu0 %v1574_v22  ;;  %v3132_v20 = vld [vmem:[#allocation13 + $0x368] sm:$0xff]  ;;  %v1365_v22 = vmax.f32 %v1357_v13, 0.0  ;;  %v1662_v32 = vunpack.c.l.s8.bf16 %v1458_v19  ;;  %v1485_v13 = vld [vmem:[#allocation13 + $0x340] sm:$0xff] }
 0x32d   :  { %v1730_v26 = vunpack.c.h.s8.bf16 %v3132_v20  ;;  %v1726_v6 = vunpack.c.l.s8.bf16 %v3132_v20  ;;  %v1718_v20 = vunpack.c.l.s8.bf16 %v1486_v29 }
 0x32e   :  { %1780 = vmatpush1.bf16.msra.mxu1 %v1509_v24  ;;  %v1666_v24 = vunpack.c.h.s8.bf16 %v1458_v19  ;;  %v1721_v19 = vunpack.c.h.s8.bf16 %v1485_v13 }
 0x32f   :  { %1781 = vmatprep.subr.bf16.mxu1 %v1570_v25  ;;  %1821 = vmatpush1.bf16.msra.mxu0 %v1573_v27  ;;  %v1457_v25 = vld [vmem:[#allocation13 + $0x260] sm:$0xff] }
 0x330   :  { %1822 = vmatprep.subr.bf16.mxu0 %v1634_v28  ;;  %v1665_v27 = vunpack.c.h.s8.bf16 %v1457_v25  ;;  %v3135_v28 = vpack.c.bf16 %v1365_v22, %v1365_v22  ;;  %v1482_v22 = vld [vmem:[#allocation13 + $0x328] sm:$0xff] }
 0x332   :  { %1782 = vmatpush2.bf16.msra.mxu1 %v1569_v33  ;;  %v1278_v33 = vrot.slane %v3114_v31, %v3069_v38 }
 0x333   :  { %1783 = vmatprep.subr.bf16.mxu1 %v1566_v34  ;;  %1823 = vmatpush2.bf16.msra.mxu0 %v1633_v15  ;;  %v1454_v34 = vld [vmem:[#allocation13 + $0x248] sm:$0xff] }
 0x334   :  { %1824 = vmatprep.subr.bf16.mxu0 %v1630_v37 }
 0x336   :  { %1784 = vmatpush2.bf16.msra.mxu1 %v1565_v41  ;;  %v1282_v41 = vrot.slane %v3114_v31, %v3072_v40 }
 0x337   :  { %1785 = vmatprep.subr.bf16.mxu1 %v1562_v42  ;;  %1825 = vmatpush2.bf16.msra.mxu0 %v1629_v16  ;;  %v1661_v42 = vunpack.c.l.s8.bf16 %v1457_v25  ;;  %v1717_v25 = vunpack.c.l.s8.bf16 %v1485_v13 }
 0x338   :  { %1826 = vmatprep.subr.bf16.mxu0 %v1626_v44  ;;  %v1658_v44 = vunpack.c.h.s8.bf16 %v1454_v34 }
 0x33a   :  { %1786 = vmatpush2.bf16.msra.mxu1 %v1561_v48 }
 0x33b   :  { %1787 = vmatprep.subr.bf16.mxu1 %v1558_v50  ;;  %1827 = vmatpush2.bf16.msra.mxu0 %v1625_v51  ;;  %v1332_v51 = vrot.slane %v3119_v35, %v3072_v40 }
 0x33c   :  { %1828 = vmatprep.subr.bf16.mxu0 %v1622_v53 }
 0x33e   :  { %1788 = vmatpush2.bf16.msra.mxu1 %v1557_v55 }
 0x33f   :  { %1789 = vmatprep.subr.bf16.mxu1 %v1554_v56  ;;  %1829 = vmatpush2.bf16.msra.mxu0 %v1621_v58  ;;  %v1657_v56 = vunpack.c.h.s8.bf16 %v1453_v45 }
 0x340   :  { %1830 = vmatprep.subr.bf16.mxu0 %v1618_v59  ;;  %v1654_v59 = vunpack.c.l.s8.bf16 %v1454_v34  ;;  %v1473_v34 = vld [vmem:[#allocation13 + $0x2e0] sm:$0xff] }
 0x342   :  { %1790 = vmatpush2.bf16.msra.mxu1 %v1553_v61  ;;  %v1450_v61 = vld [vmem:[#allocation13 + $0x228] sm:$0xff] }
 0x343   :  { %1791 = vmatprep.subr.bf16.mxu1 %v1550_v11  ;;  %1831 = vmatpush2.bf16.msra.mxu0 %v1617_v1  ;;  %v1653_v1 = vunpack.c.l.s8.bf16 %v1453_v45  ;;  %v1650_v12 = vunpack.c.h.s8.bf16 %v1450_v61  ;;  %v1693_v45 = vunpack.c.l.s8.bf16 %v1473_v34 }
 0x344   :  { %1832 = vmatprep.subr.bf16.mxu0 %v1614_v2  ;;  %v1449_v2 = vld [vmem:[#allocation13 + $0x220] sm:$0xff] }
 0x346   :  { %1792 = vmatpush2.bf16.msra.mxu1 %v1549_v4  ;;  %v1729_v4 = vunpack.c.h.s8.bf16 %v1489_v63 }
 0x347   :  { %1793 = vmatprep.subr.bf16.mxu1 %v1546_v7  ;;  %1833 = vmatpush2.bf16.msra.mxu0 %v1613_v30  ;;  %v1649_v7 = vunpack.c.h.s8.bf16 %v1449_v2  ;;  %v1646_v30 = vunpack.c.l.s8.bf16 %v1450_v61 }
 0x348   :  { %1834 = vmatprep.subr.bf16.mxu0 %v1610_v8  ;;  %v1446_v8 = vld [vmem:[#allocation13 + $0x208] sm:$0xff] }
 0x34a   :  { %1794 = vmatpush2.bf16.msra.mxu1 %v1545_v10  ;;  %v1722_v10 = vunpack.c.h.s8.bf16 %v1486_v29  ;;  %v1501_v29 = vld [vmem:[#allocation13 + $0x3c0] sm:$0xff] }
 0x34b   :  { %1795 = vmatprep.subr.bf16.mxu1 %v1542_v14  ;;  %1835 = vmatpush2.bf16.msra.mxu0 %v1609_v17  ;;  %v1645_v14 = vunpack.c.l.s8.bf16 %v1449_v2  ;;  %v1642_v17 = vunpack.c.h.s8.bf16 %v1446_v8 }
 0x34c   :  { %1836 = vmatprep.subr.bf16.mxu0 %v1606_v18  ;;  %v1445_v18 = vld [vmem:[#allocation13 + $0x200] sm:$0xff] }
 0x34e   :  { %1796 = vmatpush2.bf16.msra.mxu1 %v1541_v21  ;;  %v1641_v21 = vunpack.c.h.s8.bf16 %v1445_v18 }
 0x34f   :  { %1837 = vmatpush2.bf16.msra.mxu0 %v1605_v23  ;;  %1847 = vmatprep.subr.bf16.mxu1 %v1666_v24  ;;  %v1638_v23 = vunpack.c.l.s8.bf16 %v1446_v8  ;;  %v1474_v24 = vld [vmem:[#allocation13 + $0x2e8] sm:$0xff] }
 0x350   :  { %1888 = vmatprep.subr.bf16.mxu0 %v1730_v26  ;;  %v1714_v26 = vunpack.c.h.s8.bf16 %v1482_v22 }
 0x351   :  { %v1053_v15 = vpop.f32.mrf.mxu1  ;;  %v1094_v36 = vpop.f32.mrf.mxu0  ;;  %1798 = vmatmul.mubr.bf16.vlgmr.msra.gmra.mxu1 %v3135_v28 }
 0x352   :  { %v1095_v37 = vadd.f32 %v1094_v36, %v1053_v15  ;;  %1848 = vmatpush1.bf16.msra.mxu1 %v1665_v27  ;;  %v1481_v27 = vld [vmem:[#allocation13 + $0x320] sm:$0xff]  ;;  %v1710_v36 = vunpack.c.l.s8.bf16 %v1482_v22 }
 0x353   :  { %v1055_v43 = vpop.f32.mrf.mxu1  ;;  %v1096_v16 = vpop.f32.mrf.mxu0  ;;  %1849 = vmatprep.subr.bf16.mxu1 %v1662_v32  ;;  %v1637_v32 = vunpack.c.l.s8.bf16 %v1445_v18  ;;  %v1713_v15 = vunpack.c.h.s8.bf16 %v1481_v27  ;;  %v1497_v22 = vld [vmem:[#allocation13 + $0x3a0] sm:$0xff] }
 0x354   :  { %v1309_v48 = vmul.f32 %v1278_v33, %v1095_v37  ;;  %v1097_v50 = vadd.f32 %v1096_v16, %v1055_v43  ;;  %v1698_v33 = vunpack.c.h.s8.bf16 %v1474_v24  ;;  %v1697_v37 = vunpack.c.h.s8.bf16 %v1473_v34 }
 0x355   :  { %v1057_v52 = vpop.f32.mrf.mxu1  ;;  %v1098_v53 = vpop.f32.mrf.mxu0  ;;  %v1709_v43 = vunpack.c.l.s8.bf16 %v1481_v27  ;;  %v1741_v34 = vunpack.c.l.s8.bf16 %v1497_v22 }
 0x356   :  { %v1359_v54 = vadd.f32 %v1328_v39, %v1309_v48  ;;  %v1310_v55 = vmul.f32 %v1282_v41, %v1097_v50  ;;  %1850 = vmatpush1.bf16.msra.mxu1 %v1661_v42  ;;  %v1478_v39 = vld [vmem:[#allocation13 + $0x308] sm:$0xff]  ;;  %v1694_v41 = vunpack.c.l.s8.bf16 %v1474_v24  ;;  %v1469_v50 = vld [vmem:[#allocation13 + $0x2c0] sm:$0xff] }
 0x357   :  { %v1058_v57 = vpop.f32.mrf.mxu1  ;;  %v1099_v58 = vpop.f32.mrf.mxu0  ;;  %1851 = vmatprep.subr.bf16.mxu1 %v1658_v44  ;;  %v1470_v42 = vld [vmem:[#allocation13 + $0x2c8] sm:$0xff]  ;;  %v1706_v16 = vunpack.c.h.s8.bf16 %v1478_v39  ;;  %v1477_v44 = vld [vmem:[#allocation13 + $0x300] sm:$0xff]  ;;  %v1702_v52 = vunpack.c.l.s8.bf16 %v1478_v39  ;;  %v1689_v53 = vunpack.c.h.s8.bf16 %v1469_v50 }
 0x358   :  { %v1360_v60 = vadd.f32 %v1332_v51, %v1310_v55  ;;  %v1367_v62 = vmax.f32 %v1359_v54, 0.0  ;;  %v1690_v48 = vunpack.c.h.s8.bf16 %v1470_v42  ;;  %v1705_v51 = vunpack.c.h.s8.bf16 %v1477_v44  ;;  %v1506_v54 = vld [vmem:[#allocation13 + $0x3e8] sm:$0xff]  ;;  %v1493_v39 = vld [vmem:[#allocation13 + $0x380] sm:$0xff] }
 0x359   :  { %v1686_v55 = vunpack.c.l.s8.bf16 %v1470_v42  ;;  %v1701_v57 = vunpack.c.l.s8.bf16 %v1477_v44  ;;  %v1762_v58 = vunpack.c.h.s8.bf16 %v1506_v54 }
 0x35a   :  { %v1368_v11 = vmax.f32 %v1360_v60, 0.0  ;;  %1852 = vmatpush1.bf16.msra.mxu1 %v1657_v56  ;;  %v3148_v5 = vpack.c.bf16 %v1367_v62, %v1367_v62  ;;  %v1466_v56 = vld [vmem:[#allocation13 + $0x2a8] sm:$0xff]  ;;  %v1685_v60 = vunpack.c.l.s8.bf16 %v1469_v50  ;;  %v1465_v62 = vld [vmem:[#allocation13 + $0x2a0] sm:$0xff] }
 0x35b   :  { %1853 = vmatprep.subr.bf16.mxu1 %v1654_v59  ;;  %v1505_v59 = vld [vmem:[#allocation13 + $0x3e0] sm:$0xff]  ;;  %v1682_v61 = vunpack.c.h.s8.bf16 %v1466_v56  ;;  %v1678_v2 = vunpack.c.l.s8.bf16 %v1466_v56  ;;  %v3162_v56 = vld [vmem:[#allocation13 + $0x178] sm:$0xff] }
 0x35c   :  { %v3146_v3 = vpack.c.bf16 %v1368_v11, %v1368_v11  ;;  %v1761_v63 = vunpack.c.h.s8.bf16 %v1505_v59  ;;  %v1758_v11 = vunpack.c.l.s8.bf16 %v1506_v54 }
 0x35e   :  { %1838 = vmatprep.mubr.bf16.mxu0 %v3146_v3  ;;  %1854 = vmatpush1.bf16.msra.mxu1 %v1653_v1  ;;  %v1681_v1 = vunpack.c.h.s8.bf16 %v1465_v62 }
 0x35f   :  { %1839 = vmatmul.mubr.bf16.vlgmr.msra.gmra.mxu0 %v3148_v5  ;;  %1855 = vmatprep.subr.bf16.mxu1 %v1650_v12  ;;  %v1502_v12 = vld [vmem:[#allocation13 + $0x3c8] sm:$0xff] }
 0x360   :  { %1889 = vmatpush1.bf16.msra.mxu0 %v1729_v4  ;;  %v1462_v4 = vld [vmem:[#allocation13 + $0x288] sm:$0xff]  ;;  %v1750_v13 = vunpack.c.l.s8.bf16 %v1502_v12 }
 0x361   :  { %1890 = vmatprep.subr.bf16.mxu0 %v1726_v6  ;;  %v1757_v6 = vunpack.c.l.s8.bf16 %v1505_v59  ;;  %v1674_v8 = vunpack.c.h.s8.bf16 %v1462_v4  ;;  %v1670_v18 = vunpack.c.l.s8.bf16 %v1462_v4 }
 0x362   :  { %1856 = vmatpush1.bf16.msra.mxu1 %v1649_v7  ;;  %v1754_v7 = vunpack.c.h.s8.bf16 %v1502_v12 }
 0x363   :  { %1857 = vmatprep.subr.bf16.mxu1 %v1646_v30  ;;  %v1677_v30 = vunpack.c.l.s8.bf16 %v1465_v62 }
 0x364   :  { %1891 = vmatpush1.bf16.msra.mxu0 %v1725_v9  ;;  %v1461_v9 = vld [vmem:[#allocation13 + $0x280] sm:$0xff] }
 0x365   :  { %1892 = vmatprep.subr.bf16.mxu0 %v1722_v10  ;;  %v1753_v10 = vunpack.c.h.s8.bf16 %v1501_v29 }
 0x366   :  { %1858 = vmatpush1.bf16.msra.mxu1 %v1645_v14  ;;  %v1673_v14 = vunpack.c.h.s8.bf16 %v1461_v9 }
 0x367   :  { %1859 = vmatprep.subr.bf16.mxu1 %v1642_v17  ;;  %v1498_v17 = vld [vmem:[#allocation13 + $0x3a8] sm:$0xff] }
 0x368   :  { %1893 = vmatpush1.bf16.msra.mxu0 %v1721_v19  ;;  %v3153_v19 = vld [vmem:[#allocation13 + $0x78] sm:$0xff]  ;;  %v1742_v27 = vunpack.c.l.s8.bf16 %v1498_v17 }
 0x369   :  { %1894 = vmatprep.subr.bf16.mxu0 %v1718_v20  ;;  %v1749_v20 = vunpack.c.l.s8.bf16 %v1501_v29  ;;  %v1540_v24 = vunpack.c.h.s8.bf16 %v3153_v19  ;;  %v1392_v29 = vld [vmem:[#allocation13 + $0x58] sm:$0xff] }
 0x36a   :  { %1860 = vmatpush1.bf16.msra.mxu1 %v1641_v21  ;;  %v1746_v21 = vunpack.c.h.s8.bf16 %v1498_v17 }
 0x36b   :  { %1861 = vmatprep.subr.bf16.mxu1 %v1638_v23  ;;  %v1669_v23 = vunpack.c.l.s8.bf16 %v1461_v9  ;;  %v1391_v9 = vld [vmem:[#allocation13 + $0x50] sm:$0xff] }
 0x36c   :  { %1895 = vmatpush1.bf16.msra.mxu0 %v1717_v25  ;;  %v1745_v25 = vunpack.c.h.s8.bf16 %v1497_v22  ;;  %v1527_v17 = vunpack.c.l.s8.bf16 %v1391_v9  ;;  %v1384_v22 = vld [vmem:[#allocation13 + $0x18] sm:$0xff] }
 0x36d   :  { %1896 = vmatprep.subr.bf16.mxu0 %v1714_v26  ;;  %v1285_v26 = vsub.s32 4, %v3050_v46 }
 0x36e   :  { %1862 = vmatpush1.bf16.msra.mxu1 %v1637_v32  ;;  %v1494_v32 = vld [vmem:[#allocation13 + $0x388] sm:$0xff] }
 0x36f   :  { %1863 = vmatprep.subr.bf16.mxu1 %v1698_v33  ;;  %v1289_v33 = vsub.s32 5, %v3050_v46  ;;  %v1734_v54 = vunpack.c.l.s8.bf16 %v1494_v32 }
 0x370   :  { %1897 = vmatpush1.bf16.msra.mxu0 %v1713_v15 }
 0x371   :  { %1898 = vmatprep.subr.bf16.mxu0 %v1710_v36  ;;  %v1286_v36 = vrot.slane %v3114_v31, %v1285_v26  ;;  %v1290_v44 = vrot.slane %v3114_v31, %v1289_v33 }
 0x372   :  { %1864 = vmatpush2.bf16.msra.mxu1 %v1697_v37  ;;  %v1738_v37 = vunpack.c.h.s8.bf16 %v1494_v32 }
 0x373   :  { %1865 = vmatprep.subr.bf16.mxu1 %v1694_v41 }
 0x374   :  { %1899 = vmatpush1.bf16.msra.mxu0 %v1709_v43  ;;  %v1336_v43 = vrot.slane %v3119_v35, %v1285_v26  ;;  %v1512_v26 = vunpack.c.l.s8.bf16 %v1384_v22 }
 0x375   :  { %1900 = vmatprep.subr.bf16.mxu0 %v1706_v16 }
 0x376   :  { %1866 = vmatpush2.bf16.msra.mxu1 %v1693_v45 }
 0x377   :  { %1867 = vmatprep.subr.bf16.mxu1 %v1690_v48  ;;  %v1737_v48 = vunpack.c.h.s8.bf16 %v1493_v39 }
 0x378   :  { %1901 = vmatpush1.bf16.msra.mxu0 %v1705_v51 }
 0x379   :  { %1902 = vmatprep.subr.bf16.mxu0 %v1702_v52  ;;  %v1340_v52 = vrot.slane %v3119_v35, %v1289_v33 }
 0x37a   :  { %1868 = vmatpush2.bf16.msra.mxu1 %v1689_v53 }
 0x37b   :  { %1869 = vmatprep.subr.bf16.mxu1 %v1686_v55 }
 0x37c   :  { %1903 = vmatpush1.bf16.msra.mxu0 %v1701_v57 }
 0x37d   :  { %1904 = vmatprep.subr.bf16.mxu0 %v1762_v58 }
 0x37e   :  { %1870 = vmatpush2.bf16.msra.mxu1 %v1685_v60 }
 0x37f   :  { %1871 = vmatprep.subr.bf16.mxu1 %v1682_v61  ;;  %v1733_v61 = vunpack.c.l.s8.bf16 %v1493_v39 }
 0x380   :  { %1905 = vmatpush2.bf16.msra.mxu0 %v1761_v63  ;;  %v1604_v63 = vunpack.c.h.s8.bf16 %v3162_v56 }
 0x381   :  { %1906 = vmatprep.subr.bf16.mxu0 %v1758_v11 }
 0x382   :  { %1872 = vmatpush2.bf16.msra.mxu1 %v1681_v1  ;;  %v1395_v1 = vld [vmem:[#allocation13 + $0x70] sm:$0xff] }
 0x383   :  { %1873 = vmatprep.subr.bf16.mxu1 %v1678_v2  ;;  %v1539_v4 = vunpack.c.h.s8.bf16 %v1395_v1 }
 0x384   :  { %1907 = vmatpush2.bf16.msra.mxu0 %v1757_v6 }
 0x385   :  { %1908 = vmatprep.subr.bf16.mxu0 %v1754_v7  ;;  %v1536_v7 = vunpack.c.l.s8.bf16 %v3153_v19  ;;  %v1387_v19 = vld [vmem:[#allocation13 + $0x30] sm:$0xff] }
 0x386   :  { %1874 = vmatpush2.bf16.msra.mxu1 %v1677_v30  ;;  %v1535_v30 = vunpack.c.l.s8.bf16 %v1395_v1 }
 0x387   :  { %1875 = vmatprep.subr.bf16.mxu1 %v1674_v8  ;;  %v1532_v8 = vunpack.c.h.s8.bf16 %v1392_v29 }
 0x388   :  { %1909 = vmatpush2.bf16.msra.mxu0 %v1753_v10  ;;  %v1531_v10 = vunpack.c.h.s8.bf16 %v1391_v9 }
 0x389   :  { %1910 = vmatprep.subr.bf16.mxu0 %v1750_v13  ;;  %v1528_v13 = vunpack.c.l.s8.bf16 %v1392_v29 }
 0x38a   :  { %1876 = vmatpush2.bf16.msra.mxu1 %v1673_v14  ;;  %v1388_v14 = vld [vmem:[#allocation13 + $0x38] sm:$0xff] }
 0x38b   :  { %1877 = vmatprep.subr.bf16.mxu1 %v1670_v18  ;;  %v1524_v18 = vunpack.c.h.s8.bf16 %v1388_v14 }
 0x38c   :  { %1911 = vmatpush2.bf16.msra.mxu0 %v1749_v20  ;;  %v1523_v20 = vunpack.c.h.s8.bf16 %v1387_v19 }
 0x38d   :  { %1912 = vmatprep.subr.bf16.mxu0 %v1746_v21  ;;  %v1520_v21 = vunpack.c.l.s8.bf16 %v1388_v14 }
 0x38e   :  { %1878 = vmatpush2.bf16.msra.mxu1 %v1669_v23  ;;  %v1516_v23 = vunpack.c.h.s8.bf16 %v1384_v22 }
 0x38f   :  { %1929 = vmatprep.subr.bf16.mxu1 %v1540_v24  ;;  %v1383_v24 = vld [vmem:[#allocation13 + $0x10] sm:$0xff] }
 0x390   :  { %1913 = vmatpush2.bf16.msra.mxu0 %v1745_v25  ;;  %v1515_v25 = vunpack.c.h.s8.bf16 %v1383_v24  ;;  %v1511_v32 = vunpack.c.l.s8.bf16 %v1383_v24 }
 0x391   :  { %v1135_v15 = vpop.f32.mrf.mxu1  ;;  %1914 = vmatprep.subr.bf16.mxu0 %v1742_v27  ;;  %v1412_v27 = vld [vmem:[#allocation13 + $0xf8] sm:$0xff] }
 0x392   :  { %v1176_v41 = vpop.f32.mrf.mxu0  ;;  %v1572_v33 = vunpack.c.h.s8.bf16 %v1412_v27 }
 0x393   :  { %v1177_v42 = vadd.f32 %v1176_v41, %v1135_v15  ;;  %v1137_v16 = vpop.f32.mrf.mxu1 }
 0x394   :  { %v1178_v45 = vpop.f32.mrf.mxu0  ;;  %1915 = vmatpush2.bf16.msra.mxu0 %v1741_v34  ;;  %v1411_v34 = vld [vmem:[#allocation13 + $0xf0] sm:$0xff] }
 0x395   :  { %v1311_v50 = vmul.f32 %v1286_v36, %v1177_v42  ;;  %v1179_v51 = vadd.f32 %v1178_v45, %v1137_v16  ;;  %v1139_v53 = vpop.f32.mrf.mxu1  ;;  %1916 = vmatprep.subr.bf16.mxu0 %v1738_v37  ;;  %v1571_v15 = vunpack.c.h.s8.bf16 %v1411_v34  ;;  %v1568_v36 = vunpack.c.l.s8.bf16 %v1412_v27  ;;  %v1408_v37 = vld [vmem:[#allocation13 + $0xd8] sm:$0xff]  ;;  %v1407_v42 = vld [vmem:[#allocation13 + $0xd0] sm:$0xff] }
 0x396   :  { %v1180_v55 = vpop.f32.mrf.mxu0  ;;  %v1567_v39 = vunpack.c.l.s8.bf16 %v1411_v34  ;;  %v1564_v41 = vunpack.c.h.s8.bf16 %v1408_v37  ;;  %v1560_v16 = vunpack.c.l.s8.bf16 %v1408_v37  ;;  %v1559_v45 = vunpack.c.l.s8.bf16 %v1407_v42  ;;  %v1424_v34 = vld [vmem:[#allocation13 + $0x158] sm:$0xff] }
 0x397   :  { %v1361_v57 = vadd.f32 %v1336_v43, %v1311_v50  ;;  %v1312_v58 = vmul.f32 %v1290_v44, %v1179_v51  ;;  %v1140_v59 = vpop.f32.mrf.mxu1  ;;  %v1563_v43 = vunpack.c.h.s8.bf16 %v1407_v42  ;;  %v1404_v44 = vld [vmem:[#allocation13 + $0xb8] sm:$0xff]  ;;  %v1403_v50 = vld [vmem:[#allocation13 + $0xb0] sm:$0xff] }
 0x398   :  { %v1181_v60 = vpop.f32.mrf.mxu0  ;;  %1917 = vmatpush2.bf16.msra.mxu0 %v1737_v48  ;;  %v1556_v48 = vunpack.c.h.s8.bf16 %v1404_v44  ;;  %v1555_v51 = vunpack.c.h.s8.bf16 %v1403_v50  ;;  %v1552_v53 = vunpack.c.l.s8.bf16 %v1404_v44  ;;  %v1400_v55 = vld [vmem:[#allocation13 + $0x98] sm:$0xff]  ;;  %v1551_v59 = vunpack.c.l.s8.bf16 %v1403_v50  ;;  %v1423_v42 = vld [vmem:[#allocation13 + $0x150] sm:$0xff] }
 0x399   :  { %v1362_v62 = vadd.f32 %v1340_v52, %v1312_v58  ;;  %1918 = vmatprep.subr.bf16.mxu0 %v1734_v54  ;;  %v1369_v11 = vmax.f32 %v1361_v57, 0.0  ;;  %v1293_v52 = vsub.s32 6, %v3050_v46  ;;  %v1297_v54 = vsub.s32 7, %v3050_v46 }
 0x39b   :  { %v1370_v12 = vmax.f32 %v1362_v62, 0.0  ;;  %v3167_v6 = vpack.c.bf16 %v1369_v11, %v1369_v11  ;;  %v1294_v58 = vrot.slane %v3114_v31, %v1293_v52  ;;  %v1399_v62 = vld [vmem:[#allocation13 + $0x90] sm:$0xff]  ;;  %v1344_v11 = vrot.slane %v3119_v35, %v1293_v52 }
 0x39c   :  { %1919 = vmatpush2.bf16.msra.mxu0 %v1733_v61  ;;  %v1548_v61 = vunpack.c.h.s8.bf16 %v1400_v55  ;;  %v1348_v46 = vrot.slane %v3119_v35, %v1297_v54  ;;  %v1419_v52 = vld [vmem:[#allocation13 + $0x130] sm:$0xff] }
 0x39d   :  { %v3165_v2 = vpack.c.bf16 %v1370_v12, %v1370_v12  ;;  %1970 = vmatprep.subr.bf16.mxu0 %v1604_v63  ;;  %v1298_v12 = vrot.slane %v3114_v31, %v1297_v54  ;;  %v1587_v54 = vunpack.c.h.s8.bf16 %v1419_v52 }
 0x39f   :  { %1879 = vmatprep.mubr.bf16.mxu1 %v3165_v2 }
 0x3a0   :  { %1880 = vmatmul.mubr.bf16.vlgmr.msra.gmra.mxu1 %v3167_v6 }
 0x3a1   :  { %1930 = vmatpush1.bf16.msra.mxu1 %v1539_v4  ;;  %1961 = vmatprep.mubr.bf16.mxu1 %v3123_v0  ;;  %v1519_v0 = vunpack.c.l.s8.bf16 %v1387_v19 }
 0x3a2   :  { %1931 = vmatprep.subr.bf16.mxu1 %v1536_v7 }
 0x3a5   :  { %1932 = vmatpush1.bf16.msra.mxu1 %v1535_v30 }
 0x3a6   :  { %1933 = vmatprep.subr.bf16.mxu1 %v1532_v8  ;;  %v1547_v8 = vunpack.c.h.s8.bf16 %v1399_v62 }
 0x3a9   :  { %1934 = vmatpush1.bf16.msra.mxu1 %v1531_v10  ;;  %v1544_v10 = vunpack.c.l.s8.bf16 %v1400_v55 }
 0x3aa   :  { %1935 = vmatprep.subr.bf16.mxu1 %v1528_v13 }
 0x3ad   :  { %1936 = vmatpush1.bf16.msra.mxu1 %v1527_v17 }
 0x3ae   :  { %1937 = vmatprep.subr.bf16.mxu1 %v1524_v18  ;;  %v1460_v18 = vld [vmem:[#allocation13 + $0x278] sm:$0xff] }
 0x3af   :  { %v1668_v22 = vunpack.c.h.s8.bf16 %v1460_v18 }
 0x3b1   :  { %1938 = vmatpush1.bf16.msra.mxu1 %v1523_v20 }
 0x3b2   :  { %1939 = vmatprep.subr.bf16.mxu1 %v1520_v21  ;;  %v1543_v21 = vunpack.c.l.s8.bf16 %v1399_v62 }
 0x3b5   :  { %1940 = vmatpush1.bf16.msra.mxu1 %v1519_v0  ;;  %v1427_v0 = vld [vmem:[#allocation13 + $0x170] sm:$0xff] }
 0x3b6   :  { %1941 = vmatprep.subr.bf16.mxu1 %v1516_v23  ;;  %v1459_v23 = vld [vmem:[#allocation13 + $0x270] sm:$0xff] }
 0x3b7   :  { %v1663_v37 = vunpack.c.l.s8.bf16 %v1459_v23 }
 0x3b9   :  { %1942 = vmatpush1.bf16.msra.mxu1 %v1515_v25  ;;  %v1603_v25 = vunpack.c.h.s8.bf16 %v1427_v0 }
 0x3ba   :  { %1943 = vmatprep.subr.bf16.mxu1 %v1512_v26  ;;  %v1667_v26 = vunpack.c.h.s8.bf16 %v1459_v23 }
 0x3bd   :  { %1944 = vmatpush1.bf16.msra.mxu1 %v1511_v32  ;;  %v1600_v32 = vunpack.c.l.s8.bf16 %v3162_v56  ;;  %v1595_v56 = vunpack.c.h.s8.bf16 %v1423_v42 }
 0x3be   :  { %1945 = vmatprep.subr.bf16.mxu1 %v1572_v33  ;;  %v1664_v33 = vunpack.c.l.s8.bf16 %v1460_v18  ;;  %v1475_v18 = vld [vmem:[#allocation13 + $0x2f0] sm:$0xff] }
 0x3c1   :  { %1946 = vmatpush2.bf16.msra.mxu1 %v1571_v15  ;;  %v1456_v15 = vld [vmem:[#allocation13 + $0x258] sm:$0xff] }
 0x3c2   :  { %1947 = vmatprep.subr.bf16.mxu1 %v1568_v36  ;;  %v1599_v36 = vunpack.c.l.s8.bf16 %v1427_v0  ;;  %v1656_v44 = vunpack.c.l.s8.bf16 %v1456_v15  ;;  %v1472_v0 = vld [vmem:[#allocation13 + $0x2d8] sm:$0xff] }
 0x3c5   :  { %1948 = vmatpush2.bf16.msra.mxu1 %v1567_v39  ;;  %v1596_v39 = vunpack.c.h.s8.bf16 %v1424_v34 }
 0x3c6   :  { %1949 = vmatprep.subr.bf16.mxu1 %v1564_v41  ;;  %v1660_v41 = vunpack.c.h.s8.bf16 %v1456_v15 }
 0x3c9   :  { %1950 = vmatpush2.bf16.msra.mxu1 %v1563_v43  ;;  %v1455_v43 = vld [vmem:[#allocation13 + $0x250] sm:$0xff] }
 0x3ca   :  { %1951 = vmatprep.subr.bf16.mxu1 %v1560_v16  ;;  %v1592_v16 = vunpack.c.l.s8.bf16 %v1424_v34 }
 0x3cd   :  { %1952 = vmatpush2.bf16.msra.mxu1 %v1559_v45  ;;  %v1420_v45 = vld [vmem:[#allocation13 + $0x138] sm:$0xff] }
 0x3ce   :  { %1953 = vmatprep.subr.bf16.mxu1 %v1556_v48  ;;  %v1452_v48 = vld [vmem:[#allocation13 + $0x238] sm:$0xff]  ;;  %v1588_v50 = vunpack.c.h.s8.bf16 %v1420_v45 }
 0x3d1   :  { %1954 = vmatpush2.bf16.msra.mxu1 %v1555_v51  ;;  %v1217_v57 = vpop.f32.mrf.mxu1  ;;  %v1652_v51 = vunpack.c.h.s8.bf16 %v1452_v48 }
 0x3d2   :  { %v1258_v60 = vpop.f32.mrf.mxu0  ;;  %1955 = vmatprep.subr.bf16.mxu1 %v1552_v53  ;;  %v1451_v53 = vld [vmem:[#allocation13 + $0x230] sm:$0xff] }
 0x3d3   :  { %v1259_v63 = vadd.f32 %v1258_v60, %v1217_v57  ;;  %v1219_v1 = vpop.f32.mrf.mxu1  ;;  %v1651_v55 = vunpack.c.h.s8.bf16 %v1451_v53  ;;  %v1584_v57 = vunpack.c.l.s8.bf16 %v1420_v45  ;;  %v1448_v60 = vld [vmem:[#allocation13 + $0x218] sm:$0xff]  ;;  %v1647_v62 = vunpack.c.l.s8.bf16 %v1451_v53 }
 0x3d4   :  { %v1260_v4 = vpop.f32.mrf.mxu0 }
 0x3d5   :  { %v1313_v7 = vmul.f32 %v1294_v58, %v1259_v63  ;;  %v1261_v29 = vadd.f32 %v1260_v4, %v1219_v1  ;;  %1956 = vmatpush2.bf16.msra.mxu1 %v1551_v59  ;;  %v1221_v30 = vpop.f32.mrf.mxu1  ;;  %v1648_v58 = vunpack.c.l.s8.bf16 %v1452_v48  ;;  %v1416_v59 = vld [vmem:[#allocation13 + $0x118] sm:$0xff]  ;;  %v1415_v1 = vld [vmem:[#allocation13 + $0x110] sm:$0xff] }
 0x3d6   :  { %v1262_v9 = vpop.f32.mrf.mxu0  ;;  %1957 = vmatprep.subr.bf16.mxu1 %v1548_v61  ;;  %v1583_v61 = vunpack.c.l.s8.bf16 %v1419_v52  ;;  %v1580_v63 = vunpack.c.h.s8.bf16 %v1416_v59  ;;  %v1579_v4 = vunpack.c.h.s8.bf16 %v1415_v1  ;;  %v1444_v30 = vld [vmem:[#allocation13 + $0x1f8] sm:$0xff] }
 0x3d7   :  { %v1363_v13 = vadd.f32 %v1344_v11, %v1313_v7  ;;  %v1314_v14 = vmul.f32 %v1298_v12, %v1261_v29  ;;  %v1222_v17 = vpop.f32.mrf.mxu1  ;;  %v1644_v11 = vunpack.c.h.s8.bf16 %v1448_v60  ;;  %v1447_v12 = vld [vmem:[#allocation13 + $0x210] sm:$0xff]  ;;  %v1576_v29 = vunpack.c.l.s8.bf16 %v1416_v59 }
 0x3d8   :  { %v1263_v19 = vpop.f32.mrf.mxu0  ;;  %v1643_v7 = vunpack.c.h.s8.bf16 %v1447_v12  ;;  %v1575_v9 = vunpack.c.l.s8.bf16 %v1415_v1  ;;  %v1443_v17 = vld [vmem:[#allocation13 + $0x1f0] sm:$0xff] }
 0x3d9   :  { %v1364_v20 = vadd.f32 %v1348_v46, %v1314_v14  ;;  %1958 = vmatpush2.bf16.msra.mxu1 %v1547_v8  ;;  %v1371_v31 = vmax.f32 %v1363_v13, 0.0  ;;  %v1640_v46 = vunpack.c.l.s8.bf16 %v1448_v60  ;;  %v1476_v8 = vld [vmem:[#allocation13 + $0x2f8] sm:$0xff]  ;;  %v1636_v13 = vunpack.c.h.s8.bf16 %v1444_v30  ;;  %v1463_v59 = vld [vmem:[#allocation13 + $0x290] sm:$0xff] }
 0x3da   :  { %1959 = vmatprep.subr.bf16.mxu1 %v1544_v10  ;;  %v1639_v10 = vunpack.c.l.s8.bf16 %v1447_v12  ;;  %v1700_v14 = vunpack.c.h.s8.bf16 %v1476_v8  ;;  %v1635_v19 = vunpack.c.h.s8.bf16 %v1443_v17  ;;  %v1631_v23 = vunpack.c.l.s8.bf16 %v1443_v17 }
 0x3db   :  { %v1372_v35 = vmax.f32 %v1364_v20, 0.0  ;;  %v3181_v27 = vpack.c.bf16 %v1371_v31, %v1371_v31  ;;  %v1699_v20 = vunpack.c.h.s8.bf16 %v1475_v18  ;;  %v1696_v31 = vunpack.c.l.s8.bf16 %v1476_v8  ;;  %v1491_v8 = vld [vmem:[#allocation13 + $0x370] sm:$0xff] }
 0x3dd   :  { %1960 = vmatpush2.bf16.msra.mxu1 %v1543_v21  ;;  %v3179_v24 = vpack.c.bf16 %v1372_v35, %v1372_v35  ;;  %v1632_v21 = vunpack.c.l.s8.bf16 %v1444_v30  ;;  %v1695_v35 = vunpack.c.l.s8.bf16 %v1475_v18 }
 0x3de   :  { %2011 = vmatprep.subr.bf16.mxu1 %v1668_v22  ;;  %v1440_v22 = vld [vmem:[#allocation13 + $0x1d8] sm:$0xff] }
 0x3df   :  { %1920 = vmatprep.mubr.bf16.mxu0 %v3179_v24 }
 0x3e0   :  { %1962 = vmatmul.mubr.bf16.vlgmr.msra.gmra.mxu1 %v3135_v28  ;;  %1921 = vmatmul.mubr.bf16.vlgmr.msra.gmra.mxu0 %v3181_v27  ;;  %v1659_v28 = vunpack.c.h.s8.bf16 %v1455_v43 }
 0x3e1   :  { %1971 = vmatpush1.bf16.msra.mxu0 %v1603_v25  ;;  %2012 = vmatpush1.bf16.msra.mxu1 %v1667_v26  ;;  %v1628_v25 = vunpack.c.h.s8.bf16 %v1440_v22  ;;  %v1692_v26 = vunpack.c.h.s8.bf16 %v1472_v0 }
 0x3e2   :  { %2043 = vmatprep.mubr.bf16.mxu1 %v3165_v2  ;;  %2002 = vmatprep.mubr.bf16.mxu0 %v3146_v3  ;;  %v1591_v2 = vunpack.c.l.s8.bf16 %v1423_v42  ;;  %v1655_v3 = vunpack.c.l.s8.bf16 %v1455_v43 }
 0x3e3   :  { %1972 = vmatprep.subr.bf16.mxu0 %v1600_v32  ;;  %2013 = vmatprep.subr.bf16.mxu1 %v1664_v33  ;;  %v1439_v32 = vld [vmem:[#allocation13 + $0x1d0] sm:$0xff] }
 0x3e4   :  { %v1471_v33 = vld [vmem:[#allocation13 + $0x2d0] sm:$0xff]  ;;  %v1627_v34 = vunpack.c.h.s8.bf16 %v1439_v32  ;;  %v1623_v42 = vunpack.c.l.s8.bf16 %v1439_v32 }
 0x3e5   :  { %1973 = vmatpush1.bf16.msra.mxu0 %v1599_v36  ;;  %2014 = vmatpush1.bf16.msra.mxu1 %v1663_v37  ;;  %v1691_v15 = vunpack.c.h.s8.bf16 %v1471_v33  ;;  %v1624_v36 = vunpack.c.l.s8.bf16 %v1440_v22  ;;  %v1688_v37 = vunpack.c.l.s8.bf16 %v1472_v0  ;;  %v1687_v43 = vunpack.c.l.s8.bf16 %v1471_v33  ;;  %v2157_v33 = vld [vmem:[#allocation18 + $0x20] sm:$0xff] }
 0x3e6   :  { %1974 = vmatprep.subr.bf16.mxu0 %v1596_v39  ;;  %2015 = vmatprep.subr.bf16.mxu1 %v1660_v41  ;;  %v1436_v39 = vld [vmem:[#allocation13 + $0x1b8] sm:$0xff]  ;;  %v1727_v0 = vunpack.c.l.s8.bf16 %v1491_v8 }
 0x3e7   :  { %v1468_v41 = vld [vmem:[#allocation13 + $0x2b8] sm:$0xff] }
 0x3e9   :  { %1975 = vmatpush1.bf16.msra.mxu0 %v1595_v56  ;;  %2016 = vmatpush1.bf16.msra.mxu1 %v1659_v28  ;;  %v1620_v56 = vunpack.c.h.s8.bf16 %v1436_v39  ;;  %v1684_v28 = vunpack.c.h.s8.bf16 %v1468_v41 }
 0x3ea   :  { %1976 = vmatprep.subr.bf16.mxu0 %v1592_v16  ;;  %2017 = vmatprep.subr.bf16.mxu1 %v1656_v44  ;;  %v1435_v16 = vld [vmem:[#allocation13 + $0x1b0] sm:$0xff] }
 0x3eb   :  { %v1467_v44 = vld [vmem:[#allocation13 + $0x2b0] sm:$0xff]  ;;  %v1619_v45 = vunpack.c.h.s8.bf16 %v1435_v16  ;;  %v1615_v53 = vunpack.c.l.s8.bf16 %v1435_v16  ;;  %v2155_v16 = vld [vmem:[#allocation18 + $0x10] sm:$0xff] }
 0x3ec   :  { %v1683_v48 = vunpack.c.h.s8.bf16 %v1467_v44 }
 0x3ed   :  { %1977 = vmatpush1.bf16.msra.mxu0 %v1591_v2  ;;  %2018 = vmatpush1.bf16.msra.mxu1 %v1655_v3  ;;  %v1616_v2 = vunpack.c.l.s8.bf16 %v1436_v39  ;;  %v1680_v3 = vunpack.c.l.s8.bf16 %v1468_v41  ;;  %v2156_v39 = vld [vmem:[#allocation18 + $0x18] sm:$0xff] }
 0x3ee   :  { %1978 = vmatprep.subr.bf16.mxu0 %v1588_v50  ;;  %2019 = vmatprep.subr.bf16.mxu1 %v1652_v51  ;;  %v1432_v50 = vld [vmem:[#allocation13 + $0x198] sm:$0xff] }
 0x3ef   :  { %v1464_v51 = vld [vmem:[#allocation13 + $0x298] sm:$0xff] }
 0x3f0   :  { %v1672_v1 = vunpack.c.l.s8.bf16 %v1464_v51 }
 0x3f1   :  { %1979 = vmatpush1.bf16.msra.mxu0 %v1587_v54  ;;  %2020 = vmatpush1.bf16.msra.mxu1 %v1651_v55  ;;  %v1679_v54 = vunpack.c.l.s8.bf16 %v1467_v44  ;;  %v1612_v55 = vunpack.c.h.s8.bf16 %v1432_v50 }
 0x3f2   :  { %1980 = vmatprep.subr.bf16.mxu0 %v1584_v57  ;;  %2021 = vmatprep.subr.bf16.mxu1 %v1648_v58  ;;  %v1676_v57 = vunpack.c.h.s8.bf16 %v1464_v51  ;;  %v1431_v58 = vld [vmem:[#allocation13 + $0x190] sm:$0xff] }
 0x3f5   :  { %1981 = vmatpush1.bf16.msra.mxu0 %v1583_v61  ;;  %2022 = vmatpush1.bf16.msra.mxu1 %v1647_v62  ;;  %v1611_v62 = vunpack.c.h.s8.bf16 %v1431_v58 }
 0x3f6   :  { %1982 = vmatprep.subr.bf16.mxu0 %v1580_v63  ;;  %2023 = vmatprep.subr.bf16.mxu1 %v1644_v11  ;;  %v1675_v63 = vunpack.c.h.s8.bf16 %v1463_v59  ;;  %v1608_v11 = vunpack.c.l.s8.bf16 %v1432_v50  ;;  %v2154_v50 = vld [vmem:[#allocation18 + $0x8] sm:$0xff] }
 0x3f9   :  { %1983 = vmatpush1.bf16.msra.mxu0 %v1579_v4  ;;  %2024 = vmatpush1.bf16.msra.mxu1 %v1643_v7  ;;  %v1492_v4 = vld [vmem:[#allocation13 + $0x378] sm:$0xff]  ;;  %v2160_v7 = vld [vmem:[#allocation18 + $0x38] sm:$0xff] }
 0x3fa   :  { %1984 = vmatprep.subr.bf16.mxu0 %v1576_v29  ;;  %2025 = vmatprep.subr.bf16.mxu1 %v1640_v46  ;;  %v1607_v29 = vunpack.c.l.s8.bf16 %v1431_v58  ;;  %v1671_v46 = vunpack.c.l.s8.bf16 %v1463_v59  ;;  %v1732_v30 = vunpack.c.h.s8.bf16 %v1492_v4 }
 0x3fd   :  { %1985 = vmatpush1.bf16.msra.mxu0 %v1575_v9  ;;  %2026 = vmatpush1.bf16.msra.mxu1 %v1639_v10  ;;  %v2200_v9 = vunpack.c.h.s8.bf16 %v2160_v7  ;;  %v2159_v10 = vld [vmem:[#allocation18 + $0x30] sm:$0xff] }
 0x3fe   :  { %1986 = vmatprep.subr.bf16.mxu0 %v1636_v13  ;;  %2027 = vmatprep.subr.bf16.mxu1 %v1700_v14  ;;  %v1731_v13 = vunpack.c.h.s8.bf16 %v1491_v8  ;;  %v1728_v14 = vunpack.c.l.s8.bf16 %v1492_v4  ;;  %v2199_v17 = vunpack.c.h.s8.bf16 %v2159_v10 }
 0x401   :  { %1987 = vmatpush2.bf16.msra.mxu0 %v1635_v19  ;;  %2028 = vmatpush2.bf16.msra.mxu1 %v1699_v20  ;;  %v1488_v19 = vld [vmem:[#allocation13 + $0x358] sm:$0xff]  ;;  %v2198_v20 = vunpack.c.l.s8.bf16 %v2160_v7 }
 0x402   :  { %1988 = vmatprep.subr.bf16.mxu0 %v1632_v21  ;;  %2029 = vmatprep.subr.bf16.mxu1 %v1696_v31  ;;  %v2158_v31 = vld [vmem:[#allocation18 + $0x28] sm:$0xff] }
 0x405   :  { %1989 = vmatpush2.bf16.msra.mxu0 %v1631_v23  ;;  %2030 = vmatpush2.bf16.msra.mxu1 %v1695_v35  ;;  %v1724_v35 = vunpack.c.h.s8.bf16 %v1488_v19 }
 0x406   :  { %1990 = vmatprep.subr.bf16.mxu0 %v1628_v25  ;;  %2031 = vmatprep.subr.bf16.mxu1 %v1692_v26  ;;  %v1487_v25 = vld [vmem:[#allocation13 + $0x350] sm:$0xff]  ;;  %v2197_v26 = vunpack.c.l.s8.bf16 %v2159_v10 }
 0x407   :  { %v1719_v41 = vunpack.c.l.s8.bf16 %v1487_v25 }
 0x409   :  { %1991 = vmatpush2.bf16.msra.mxu0 %v1627_v34  ;;  %2032 = vmatpush2.bf16.msra.mxu1 %v1691_v15  ;;  %v1723_v34 = vunpack.c.h.s8.bf16 %v1487_v25  ;;  %v1720_v15 = vunpack.c.l.s8.bf16 %v1488_v19  ;;  %v1500_v25 = vld [vmem:[#allocation13 + $0x3b8] sm:$0xff] }
 0x40a   :  { %1992 = vmatprep.subr.bf16.mxu0 %v1624_v36  ;;  %2033 = vmatprep.subr.bf16.mxu1 %v1688_v37  ;;  %v1484_v36 = vld [vmem:[#allocation13 + $0x338] sm:$0xff]  ;;  %v2194_v37 = vunpack.c.l.s8.bf16 %v2158_v31 }
 0x40d   :  { %1993 = vmatpush2.bf16.msra.mxu0 %v1623_v42  ;;  %2034 = vmatpush2.bf16.msra.mxu1 %v1687_v43  ;;  %v1716_v42 = vunpack.c.h.s8.bf16 %v1484_v36  ;;  %v1483_v43 = vld [vmem:[#allocation13 + $0x330] sm:$0xff] }
 0x40e   :  { %1994 = vmatprep.subr.bf16.mxu0 %v1620_v56  ;;  %2035 = vmatprep.subr.bf16.mxu1 %v1684_v28  ;;  %v2193_v56 = vunpack.c.l.s8.bf16 %v2157_v33  ;;  %v2192_v28 = vunpack.c.h.s8.bf16 %v2156_v39  ;;  %v1715_v44 = vunpack.c.h.s8.bf16 %v1483_v43  ;;  %v1711_v51 = vunpack.c.l.s8.bf16 %v1483_v43  ;;  %v2162_v43 = vld [vmem:[#allocation18 + $0x48] sm:$0xff] }
 0x411   :  { %1995 = vmatpush2.bf16.msra.mxu0 %v1619_v45  ;;  %2036 = vmatpush2.bf16.msra.mxu1 %v1683_v48  ;;  %v1799_v52 = vpop.f32.mrf.mxu1  ;;  %v1712_v45 = vunpack.c.l.s8.bf16 %v1484_v36  ;;  %v2191_v48 = vunpack.c.h.s8.bf16 %v2155_v16 }
 0x412   :  { %1996 = vmatprep.subr.bf16.mxu0 %v1616_v2  ;;  %2037 = vmatprep.subr.bf16.mxu1 %v1680_v3  ;;  %v1480_v2 = vld [vmem:[#allocation13 + $0x318] sm:$0xff]  ;;  %v2190_v3 = vunpack.c.l.s8.bf16 %v2156_v39 }
 0x413   :  { %v1801_v60 = vpop.f32.mrf.mxu1  ;;  %v1704_v59 = vunpack.c.l.s8.bf16 %v1480_v2 }
 0x415   :  { %1997 = vmatpush2.bf16.msra.mxu0 %v1615_v53  ;;  %2038 = vmatpush2.bf16.msra.mxu1 %v1679_v54  ;;  %v1803_v61 = vpop.f32.mrf.mxu1  ;;  %v1479_v53 = vld [vmem:[#allocation13 + $0x310] sm:$0xff]  ;;  %v2189_v54 = vunpack.c.l.s8.bf16 %v2155_v16 }
 0x416   :  { %1998 = vmatprep.subr.bf16.mxu0 %v1612_v55  ;;  %2039 = vmatprep.subr.bf16.mxu1 %v1676_v57  ;;  %v2188_v55 = vunpack.c.h.s8.bf16 %v2154_v50  ;;  %v2153_v57 = vld [vmem:[#allocation18] sm:$0xff]  ;;  %v1707_v58 = vunpack.c.h.s8.bf16 %v1479_v53  ;;  %v1508_v61 = vld [vmem:[#allocation13 + $0x3f8] sm:$0xff]  ;;  %v1495_v16 = vld [vmem:[#allocation13 + $0x390] sm:$0xff] }
 0x417   :  { %v1804_v12 = vpop.f32.mrf.mxu1  ;;  %v2185_v4 = vunpack.c.l.s8.bf16 %v2153_v57 }
 0x418   :  { %v1507_v12 = vld [vmem:[#allocation13 + $0x3f0] sm:$0xff] }
 0x419   :  { %1999 = vmatpush2.bf16.msra.mxu0 %v1611_v62  ;;  %2040 = vmatpush2.bf16.msra.mxu1 %v1675_v63  ;;  %v2186_v62 = vunpack.c.l.s8.bf16 %v2154_v50  ;;  %v2168_v63 = vld [vmem:[#allocation18 + $0x78] sm:$0xff] }
 0x41a   :  { %2000 = vmatprep.subr.bf16.mxu0 %v1608_v11  ;;  %2041 = vmatprep.subr.bf16.mxu1 %v1672_v1  ;;  %v1703_v11 = vunpack.c.l.s8.bf16 %v1479_v53  ;;  %v1764_v1 = vunpack.c.h.s8.bf16 %v1508_v61  ;;  %v2216_v7 = vunpack.c.h.s8.bf16 %v2168_v63  ;;  %v2214_v10 = vunpack.c.l.s8.bf16 %v2168_v63 }
 0x41d   :  { %2001 = vmatpush2.bf16.msra.mxu0 %v1607_v29  ;;  %2042 = vmatpush2.bf16.msra.mxu1 %v1671_v46  ;;  %v2167_v29 = vld [vmem:[#allocation18 + $0x70] sm:$0xff]  ;;  %v1763_v46 = vunpack.c.h.s8.bf16 %v1507_v12 }
 0x41e   :  { %2052 = vmatprep.subr.bf16.mxu0 %v1732_v30  ;;  %2249 = vmatprep.subr.bf16.mxu1 %v2200_v9  ;;  %v1760_v30 = vunpack.c.l.s8.bf16 %v1508_v61  ;;  %v2215_v8 = vunpack.c.h.s8.bf16 %v2167_v29  ;;  %v1504_v9 = vld [vmem:[#allocation13 + $0x3d8] sm:$0xff]  ;;  %v2213_v19 = vunpack.c.l.s8.bf16 %v2167_v29  ;;  %v2172_v29 = vld [vmem:[#allocation18 + $0x98] sm:$0xff] }
 0x41f   :  { %v1840_v18 = vpop.f32.mrf.mxu0  ;;  %v2175_v61 = vld [vmem:[#allocation18 + $0xb0] sm:$0xff] }
 0x420   :  { %2003 = vmatmul.mubr.bf16.vlgmr.msra.gmra.mxu0 %v3148_v5  ;;  %2044 = vmatmul.mubr.bf16.vlgmr.msra.gmra.mxu1 %v3167_v6  ;;  %v3191_v21 = vadd.f32 %v1840_v18, %v1799_v52  ;;  %v2196_v5 = vunpack.c.h.s8.bf16 %v2158_v31  ;;  %v1708_v52 = vunpack.c.h.s8.bf16 %v1480_v2  ;;  %v1503_v18 = vld [vmem:[#allocation13 + $0x3d0] sm:$0xff]  ;;  %v2165_v31 = vld [vmem:[#allocation18 + $0x60] sm:$0xff]  ;;  %v1739_v2 = vunpack.c.h.s8.bf16 %v1495_v16 }
 0x421   :  { %2053 = vmatpush1.bf16.msra.mxu0 %v1731_v13  ;;  %2084 = vmatprep.mubr.bf16.mxu0 %v3179_v24  ;;  %v1842_v22 = vpop.f32.mrf.mxu0  ;;  %v2195_v24 = vunpack.c.h.s8.bf16 %v2157_v33  ;;  %v2166_v13 = vld [vmem:[#allocation18 + $0x68] sm:$0xff]  ;;  %v1748_v33 = vunpack.c.h.s8.bf16 %v1500_v25  ;;  %v2231_v63 = vunpack.c.h.s8.bf16 %v2175_v61 }
 0x422   :  { %v3194_v23 = vadd.f32 %v1842_v22, %v1801_v60  ;;  %2054 = vmatprep.subr.bf16.mxu0 %v1728_v14  ;;  %2250 = vmatpush1.bf16.msra.mxu1 %v2199_v17  ;;  %v2187_v60 = vunpack.c.h.s8.bf16 %v2153_v57  ;;  %v1759_v14 = vunpack.c.l.s8.bf16 %v1507_v12  ;;  %v1756_v17 = vunpack.c.h.s8.bf16 %v1504_v9 }
 0x423   :  { %v1844_v32 = vpop.f32.mrf.mxu0  ;;  %2251 = vmatprep.subr.bf16.mxu1 %v2198_v20  ;;  %v2212_v20 = vunpack.c.h.s8.bf16 %v2166_v13  ;;  %v1755_v22 = vunpack.c.h.s8.bf16 %v1503_v18  ;;  %v2229_v12 = vunpack.c.l.s8.bf16 %v2175_v61 }
 0x424   :  { %v2164_v32 = vld [vmem:[#allocation18 + $0x58] sm:$0xff] }
 0x425   :  { %2055 = vmatpush1.bf16.msra.mxu0 %v1727_v0  ;;  %v1845_v6 = vpop.f32.mrf.mxu0  ;;  %v1752_v0 = vunpack.c.l.s8.bf16 %v1504_v9 }
 0x426   :  { %2056 = vmatprep.subr.bf16.mxu0 %v1724_v35  ;;  %2252 = vmatpush1.bf16.msra.mxu1 %v2197_v26  ;;  %v2211_v35 = vunpack.c.h.s8.bf16 %v2165_v31  ;;  %v2210_v26 = vunpack.c.l.s8.bf16 %v2166_v13  ;;  %v1499_v6 = vld [vmem:[#allocation13 + $0x3b0] sm:$0xff] }
 0x427   :  { %2253 = vmatprep.subr.bf16.mxu1 %v2196_v5  ;;  %v1751_v5 = vunpack.c.l.s8.bf16 %v1503_v18  ;;  %v1747_v36 = vunpack.c.h.s8.bf16 %v1499_v6  ;;  %v2170_v13 = vld [vmem:[#allocation18 + $0x88] sm:$0xff]  ;;  %v2169_v18 = vld [vmem:[#allocation18 + $0x80] sm:$0xff] }
 0x429   :  { %2057 = vmatpush1.bf16.msra.mxu0 %v1723_v34  ;;  %v2209_v34 = vunpack.c.l.s8.bf16 %v2165_v31  ;;  %v2184_v31 = vld [vmem:[#allocation18 + $0xf8] sm:$0xff] }
 0x42a   :  { %2058 = vmatprep.subr.bf16.mxu0 %v1720_v15  ;;  %2254 = vmatpush1.bf16.msra.mxu1 %v2195_v24  ;;  %v2208_v15 = vunpack.c.h.s8.bf16 %v2164_v32  ;;  %v2163_v24 = vld [vmem:[#allocation18 + $0x50] sm:$0xff] }
 0x42b   :  { %2255 = vmatprep.subr.bf16.mxu1 %v2194_v37  ;;  %v1744_v37 = vunpack.c.l.s8.bf16 %v1500_v25  ;;  %v2207_v39 = vunpack.c.h.s8.bf16 %v2163_v24 }
 0x42d   :  { %2059 = vmatpush1.bf16.msra.mxu0 %v1719_v41  ;;  %v1496_v41 = vld [vmem:[#allocation13 + $0x398] sm:$0xff] }
 0x42e   :  { %2060 = vmatprep.subr.bf16.mxu0 %v1716_v42  ;;  %2256 = vmatpush1.bf16.msra.mxu1 %v2193_v56  ;;  %v2206_v42 = vunpack.c.l.s8.bf16 %v2164_v32  ;;  %v1743_v56 = vunpack.c.l.s8.bf16 %v1499_v6  ;;  %v2182_v32 = vld [vmem:[#allocation18 + $0xe8] sm:$0xff]  ;;  %v2181_v6 = vld [vmem:[#allocation18 + $0xe0] sm:$0xff] }
 0x42f   :  { %2257 = vmatprep.subr.bf16.mxu1 %v2192_v28  ;;  %v1740_v28 = vunpack.c.h.s8.bf16 %v1496_v41 }
 0x431   :  { %2061 = vmatpush1.bf16.msra.mxu0 %v1715_v44  ;;  %v2205_v44 = vunpack.c.l.s8.bf16 %v2163_v24  ;;  %v2180_v24 = vld [vmem:[#allocation18 + $0xd8] sm:$0xff] }
 0x432   :  { %2062 = vmatprep.subr.bf16.mxu0 %v1712_v45  ;;  %2258 = vmatpush1.bf16.msra.mxu1 %v2191_v48  ;;  %v2204_v45 = vunpack.c.h.s8.bf16 %v2162_v43  ;;  %v2161_v48 = vld [vmem:[#allocation18 + $0x40] sm:$0xff] }
 0x433   :  { %2259 = vmatprep.subr.bf16.mxu1 %v2190_v3  ;;  %v1736_v3 = vunpack.c.l.s8.bf16 %v1496_v41  ;;  %v2203_v50 = vunpack.c.h.s8.bf16 %v2161_v48  ;;  %v2201_v53 = vunpack.c.l.s8.bf16 %v2161_v48 }
 0x435   :  { %2063 = vmatpush1.bf16.msra.mxu0 %v1711_v51  ;;  %v2202_v51 = vunpack.c.l.s8.bf16 %v2162_v43  ;;  %v3204_v43 = vld [vmem:[#allocation16] sm:$0xf] }
 0x436   :  { %2064 = vmatprep.subr.bf16.mxu0 %v1708_v52  ;;  %2260 = vmatpush1.bf16.msra.mxu1 %v2189_v54  ;;  %v1735_v52 = vunpack.c.l.s8.bf16 %v1495_v16 }
 0x437   :  { %2261 = vmatprep.subr.bf16.mxu1 %v2188_v55 }
 0x439   :  { %2065 = vmatpush1.bf16.msra.mxu0 %v1707_v58 }
 0x43a   :  { %2066 = vmatprep.subr.bf16.mxu0 %v1704_v59  ;;  %2262 = vmatpush1.bf16.msra.mxu1 %v2187_v60  ;;  %v2176_v60 = vld [vmem:[#allocation18 + $0xb8] sm:$0xff] }
 0x43b   :  { %2263 = vmatprep.subr.bf16.mxu1 %v2186_v62  ;;  %v2232_v62 = vunpack.c.h.s8.bf16 %v2176_v60 }
 0x43d   :  { %2067 = vmatpush1.bf16.msra.mxu0 %v1703_v11  ;;  %v2230_v11 = vunpack.c.l.s8.bf16 %v2176_v60 }
 0x43e   :  { %2068 = vmatprep.subr.bf16.mxu0 %v1764_v1  ;;  %2264 = vmatpush1.bf16.msra.mxu1 %v2185_v4  ;;  %v2174_v1 = vld [vmem:[#allocation18 + $0xa8] sm:$0xff] }
 0x43f   :  { %2265 = vmatprep.subr.bf16.mxu1 %v2216_v7  ;;  %v2228_v4 = vunpack.c.h.s8.bf16 %v2174_v1 }
 0x441   :  { %2069 = vmatpush2.bf16.msra.mxu0 %v1763_v46 }
 0x442   :  { %2070 = vmatprep.subr.bf16.mxu0 %v1760_v30  ;;  %2266 = vmatpush2.bf16.msra.mxu1 %v2215_v8  ;;  %v2224_v30 = vunpack.c.h.s8.bf16 %v2172_v29  ;;  %v2171_v8 = vld [vmem:[#allocation18 + $0x90] sm:$0xff] }
 0x443   :  { %2267 = vmatprep.subr.bf16.mxu1 %v2214_v10  ;;  %v2223_v9 = vunpack.c.h.s8.bf16 %v2171_v8  ;;  %v2222_v10 = vunpack.c.l.s8.bf16 %v2172_v29 }
 0x445   :  { %2071 = vmatpush2.bf16.msra.mxu0 %v1759_v14  ;;  %v2221_v14 = vunpack.c.l.s8.bf16 %v2171_v8 }
 0x446   :  { %2072 = vmatprep.subr.bf16.mxu0 %v1756_v17  ;;  %2268 = vmatpush2.bf16.msra.mxu1 %v2213_v19  ;;  %v2220_v17 = vunpack.c.h.s8.bf16 %v2170_v13  ;;  %v2219_v19 = vunpack.c.h.s8.bf16 %v2169_v18 }
 0x447   :  { %2269 = vmatprep.subr.bf16.mxu1 %v2212_v20  ;;  %v2218_v20 = vunpack.c.l.s8.bf16 %v2170_v13 }
 0x449   :  { %2073 = vmatpush2.bf16.msra.mxu0 %v1755_v22  ;;  %v2217_v22 = vunpack.c.l.s8.bf16 %v2169_v18 }
 0x44a   :  { %2074 = vmatprep.subr.bf16.mxu0 %v1752_v0  ;;  %2270 = vmatpush2.bf16.msra.mxu1 %v2211_v35  ;;  %v2248_v0 = vunpack.c.h.s8.bf16 %v2184_v31  ;;  %v2183_v35 = vld [vmem:[#allocation18 + $0xf0] sm:$0xff] }
 0x44b   :  { %2271 = vmatprep.subr.bf16.mxu1 %v2210_v26  ;;  %v2247_v25 = vunpack.c.h.s8.bf16 %v2183_v35  ;;  %v2246_v26 = vunpack.c.l.s8.bf16 %v2184_v31  ;;  %v2370_v31 = vld [vmem:[#allocation22 + $0x38] sm:$0xff] }
 0x44d   :  { %2075 = vmatpush2.bf16.msra.mxu0 %v1751_v5  ;;  %v2245_v5 = vunpack.c.l.s8.bf16 %v2183_v35 }
 0x44e   :  { %2076 = vmatprep.subr.bf16.mxu0 %v1748_v33  ;;  %2272 = vmatpush2.bf16.msra.mxu1 %v2209_v34  ;;  %v2244_v33 = vunpack.c.h.s8.bf16 %v2182_v32  ;;  %v2243_v34 = vunpack.c.h.s8.bf16 %v2181_v6 }
 0x44f   :  { %2273 = vmatprep.subr.bf16.mxu1 %v2208_v15  ;;  %v2242_v15 = vunpack.c.l.s8.bf16 %v2182_v32 }
 0x451   :  { %2077 = vmatpush2.bf16.msra.mxu0 %v1747_v36  ;;  %v2241_v36 = vunpack.c.l.s8.bf16 %v2181_v6 }
 0x452   :  { %2078 = vmatprep.subr.bf16.mxu0 %v1744_v37  ;;  %2274 = vmatpush2.bf16.msra.mxu1 %v2207_v39  ;;  %v2240_v37 = vunpack.c.h.s8.bf16 %v2180_v24  ;;  %v2179_v39 = vld [vmem:[#allocation18 + $0xd0] sm:$0xff] }
 0x453   :  { %2275 = vmatprep.subr.bf16.mxu1 %v2206_v42  ;;  %v2239_v41 = vunpack.c.h.s8.bf16 %v2179_v39  ;;  %v3202_v42 = vld [vmem:[#allocation15] sm:$0xf] }
 0x455   :  { %2079 = vmatpush2.bf16.msra.mxu0 %v1743_v56  ;;  %v2098_v56 = vrot.slane %v3202_v42, %v3053_v47 }
 0x456   :  { %2080 = vmatprep.subr.bf16.mxu0 %v1740_v28  ;;  %2276 = vmatpush2.bf16.msra.mxu1 %v2205_v44  ;;  %v2124_v44 = vrot.slane %v3204_v43, %v3053_v47 }
 0x457   :  { %2277 = vmatprep.subr.bf16.mxu1 %v2204_v45 }
 0x459   :  { %2081 = vmatpush2.bf16.msra.mxu0 %v1739_v2  ;;  %v2102_v2 = vrot.slane %v3202_v42, %v3056_v49 }
 0x45a   :  { %2082 = vmatprep.subr.bf16.mxu0 %v1736_v3  ;;  %2278 = vmatpush2.bf16.msra.mxu1 %v2203_v50  ;;  %v2238_v3 = vunpack.c.l.s8.bf16 %v2180_v24 }
 0x45b   :  { %2279 = vmatprep.subr.bf16.mxu1 %v2202_v51 }
 0x45d   :  { %2083 = vmatpush2.bf16.msra.mxu0 %v1735_v52  ;;  %v2237_v52 = vunpack.c.l.s8.bf16 %v2179_v39 }
 0x45e   :  { %2280 = vmatpush2.bf16.msra.mxu1 %v2201_v53  ;;  %2290 = vmatprep.subr.bf16.mxu0 %v2232_v62  ;;  %v2177_v62 = vld [vmem:[#allocation18 + $0xc0] sm:$0xff] }
 0x460   :  { %2085 = vmatmul.mubr.bf16.vlgmr.msra.gmra.mxu0 %v3181_v27  ;;  %v1881_v54 = vpop.f32.mrf.mxu1  ;;  %v2173_v27 = vld [vmem:[#allocation18 + $0xa0] sm:$0xff] }
 0x461   :  { %v3198_v55 = vadd.f32 %v1881_v54, %v3191_v21  ;;  %2291 = vmatpush1.bf16.msra.mxu0 %v2231_v63  ;;  %v2227_v7 = vunpack.c.h.s8.bf16 %v2173_v27  ;;  %v2226_v21 = vunpack.c.l.s8.bf16 %v2174_v1  ;;  %v2225_v46 = vunpack.c.l.s8.bf16 %v2173_v27 }
 0x462   :  { %v3200_v57 = vpop.f32.mrf.mxu1  ;;  %2292 = vmatprep.subr.bf16.mxu0 %v2230_v11  ;;  %v2235_v1 = vunpack.c.h.s8.bf16 %v2177_v62 }
 0x463   :  { %v1884_v45 = vadd.f32 %v3200_v57, %v3194_v23  ;;  %v2178_v23 = vld [vmem:[#allocation18 + $0xc8] sm:$0xff] }
 0x464   :  { %v1885_v58 = vpop.f32.mrf.mxu1  ;;  %v2236_v61 = vunpack.c.h.s8.bf16 %v2178_v23 }
 0x465   :  { %2293 = vmatpush1.bf16.msra.mxu0 %v2229_v12  ;;  %v2128_v58 = vrot.slane %v3204_v43, %v3056_v49 }
 0x466   :  { %v1886_v59 = vpop.f32.mrf.mxu1  ;;  %2294 = vmatprep.subr.bf16.mxu0 %v2228_v4 }
 0x469   :  { %2295 = vmatpush1.bf16.msra.mxu0 %v2227_v7  ;;  %v2234_v7 = vunpack.c.l.s8.bf16 %v2178_v23 }
 0x46a   :  { %2296 = vmatprep.subr.bf16.mxu0 %v2226_v21  ;;  %v2233_v21 = vunpack.c.l.s8.bf16 %v2177_v62 }
 0x46d   :  { %2297 = vmatpush1.bf16.msra.mxu0 %v2225_v46 }
 0x46e   :  { %2298 = vmatprep.subr.bf16.mxu0 %v2224_v30 }
 0x471   :  { %2299 = vmatpush1.bf16.msra.mxu0 %v2223_v9 }
 0x472   :  { %2300 = vmatprep.subr.bf16.mxu0 %v2222_v10 }
 0x475   :  { %2301 = vmatpush1.bf16.msra.mxu0 %v2221_v14 }
 0x476   :  { %2302 = vmatprep.subr.bf16.mxu0 %v2220_v17 }
 0x479   :  { %2303 = vmatpush1.bf16.msra.mxu0 %v2219_v19 }
 0x47a   :  { %2304 = vmatprep.subr.bf16.mxu0 %v2218_v20 }
 0x47d   :  { %2305 = vmatpush1.bf16.msra.mxu0 %v2217_v22  ;;  %v2366_v22 = vld [vmem:[#allocation22 + $0x18] sm:$0xff] }
 0x47e   :  { %2306 = vmatprep.subr.bf16.mxu0 %v2248_v0  ;;  %v2386_v0 = vunpack.c.h.s8.bf16 %v2370_v31  ;;  %v2378_v35 = vunpack.c.h.s8.bf16 %v2366_v22  ;;  %v2377_v32 = vunpack.c.l.s8.bf16 %v2366_v22 }
 0x480   :  { %2450 = vmatprep.subr.bf16.mxu1 %v2386_v0 }
 0x481   :  { %2307 = vmatpush2.bf16.msra.mxu0 %v2247_v25  ;;  %v2385_v25 = vunpack.c.l.s8.bf16 %v2370_v31 }
 0x482   :  { %2308 = vmatprep.subr.bf16.mxu0 %v2246_v26  ;;  %v2369_v26 = vld [vmem:[#allocation22 + $0x30] sm:$0xff] }
 0x485   :  { %2309 = vmatpush2.bf16.msra.mxu0 %v2245_v5  ;;  %v2384_v5 = vunpack.c.h.s8.bf16 %v2369_v26 }
 0x486   :  { %2310 = vmatprep.subr.bf16.mxu0 %v2244_v33  ;;  %v2365_v33 = vld [vmem:[#allocation22 + $0x10] sm:$0xff] }
 0x487   :  { %v2376_v6 = vunpack.c.h.s8.bf16 %v2365_v33  ;;  %v2375_v24 = vunpack.c.l.s8.bf16 %v2365_v33 }
 0x489   :  { %2311 = vmatpush2.bf16.msra.mxu0 %v2243_v34  ;;  %v2383_v34 = vunpack.c.l.s8.bf16 %v2369_v26 }
 0x48a   :  { %2312 = vmatprep.subr.bf16.mxu0 %v2242_v15  ;;  %v2368_v15 = vld [vmem:[#allocation22 + $0x28] sm:$0xff] }
 0x48d   :  { %2313 = vmatpush2.bf16.msra.mxu0 %v2241_v36  ;;  %v2382_v36 = vunpack.c.h.s8.bf16 %v2368_v15 }
 0x48e   :  { %2314 = vmatprep.subr.bf16.mxu0 %v2240_v37  ;;  %v2364_v37 = vld [vmem:[#allocation22 + $0x8] sm:$0xff] }
 0x48f   :  { %v2374_v39 = vunpack.c.h.s8.bf16 %v2364_v37  ;;  %v2373_v62 = vunpack.c.l.s8.bf16 %v2364_v37 }
 0x491   :  { %2315 = vmatpush2.bf16.msra.mxu0 %v2239_v41 }
 0x492   :  { %2316 = vmatprep.subr.bf16.mxu0 %v2238_v3 }
 0x495   :  { %2317 = vmatpush2.bf16.msra.mxu0 %v2237_v52  ;;  %v2136_v52 = vrot.slane %v3204_v43, %v3072_v40 }
 0x496   :  { %2318 = vmatprep.subr.bf16.mxu0 %v2236_v61  ;;  %v2381_v61 = vunpack.c.l.s8.bf16 %v2368_v15 }
 0x499   :  { %2319 = vmatpush2.bf16.msra.mxu0 %v2235_v1 }
 0x49a   :  { %2320 = vmatprep.subr.bf16.mxu0 %v2234_v7  ;;  %v2331_v7 = vld [vmem:[#allocation19] sm:$0x3] }
 0x49d   :  { %2321 = vmatpush2.bf16.msra.mxu0 %v2233_v21  ;;  %v2345_v21 = vld [vmem:[#allocation21] sm:$0x3] }
 0x4a0   :  { %v1963_v28 = vpop.f32.mrf.mxu1  ;;  %v1922_v16 = vpop.f32.mrf.mxu0 }
 0x4a1   :  { %v1923_v48 = vadd.f32 %v1922_v16, %v3198_v55 }
 0x4a2   :  { %v3215_v50 = vpop.f32.mrf.mxu1  ;;  %v1924_v51 = vpop.f32.mrf.mxu0 }
 0x4a3   :  { %v2115_v53 = vmul.f32 %v2098_v56, %v1923_v48  ;;  %v1925_v54 = vadd.f32 %v1924_v51, %v1884_v45  ;;  %v2106_v56 = vrot.slane %v3202_v42, %v3069_v38  ;;  %v2132_v45 = vrot.slane %v3204_v43, %v3069_v38  ;;  %v2363_v43 = vld [vmem:[#allocation22] sm:$0xff] }
 0x4a4   :  { %v1967_v59 = vpop.f32.mrf.mxu1  ;;  %v1926_v60 = vpop.f32.mrf.mxu0  ;;  %v2110_v48 = vrot.slane %v3202_v42, %v3072_v40 }
 0x4a5   :  { %v2141_v57 = vadd.f32 %v2124_v44, %v2115_v53  ;;  %v2116_v55 = vmul.f32 %v2102_v2, %v1925_v54 }
 0x4a6   :  { %v1968_v63 = vpop.f32.mrf.mxu1  ;;  %v1927_v11 = vpop.f32.mrf.mxu0 }
 0x4a7   :  { %v2142_v12 = vadd.f32 %v2128_v58, %v2116_v55  ;;  %v2145_v4 = vmax.f32 %v2141_v57, 0.0  ;;  %v2367_v11 = vld [vmem:[#allocation22 + $0x20] sm:$0xff] }
 0x4a8   :  { %v2380_v40 = vunpack.c.h.s8.bf16 %v2367_v11 }
 0x4a9   :  { %v2146_v27 = vmax.f32 %v2142_v12, 0.0  ;;  %v2149_v46 = vpack.c.bf16 %v2145_v4, %v2145_v4  ;;  %v2372_v12 = vunpack.c.h.s8.bf16 %v2363_v43  ;;  %v2379_v4 = vunpack.c.l.s8.bf16 %v2367_v11 }
 0x4ab   :  { %v2150_v29 = vpack.c.bf16 %v2146_v27, %v2146_v27  ;;  %v2371_v27 = vunpack.c.l.s8.bf16 %v2363_v43 }
 0x4ad   :  { %2281 = vmatprep.mubr.bf16.mxu1 %v2150_v29  ;;  %v2336_v29 = vrot.slane %v2331_v7, %v3053_v47 }
 0x4ae   :  { %2282 = vmatmul.mubr.bf16.vlgmr.msra.gmra.mxu1 %v2149_v46 }
 0x4af   :  { %2451 = vmatpush3.bf16.msra.mxu1 %v2378_v35 }
 0x4b0   :  { %2452 = vmatprep.subr.bf16.mxu1 %v2385_v25 }
 0x4b3   :  { %2453 = vmatpush3.bf16.msra.mxu1 %v2377_v32 }
 0x4b4   :  { %2454 = vmatprep.subr.bf16.mxu1 %v2384_v5  ;;  %v2449_v5 = vld [vmem:[%s3255_s17] ss:$0 sm:$0xff] }
 0x4b7   :  { %2455 = vmatpush3.bf16.msra.mxu1 %v2376_v6 }
 0x4b8   :  { %2456 = vmatprep.subr.bf16.mxu1 %v2383_v34 }
 0x4bb   :  { %2457 = vmatpush3.bf16.msra.mxu1 %v2375_v24 }
 0x4bc   :  { %2458 = vmatprep.subr.bf16.mxu1 %v2382_v36 }
 0x4bf   :  { %2459 = vmatpush3.bf16.msra.mxu1 %v2374_v39 }
 0x4c0   :  { %2460 = vmatprep.subr.bf16.mxu1 %v2381_v61 }
 0x4c3   :  { %2461 = vmatpush3.bf16.msra.mxu1 %v2373_v62 }
 0x4c4   :  { %2462 = vmatprep.subr.bf16.mxu1 %v2380_v40 }
 0x4c7   :  { %2463 = vmatpush3.bf16.msra.mxu1 %v2372_v12 }
 0x4c8   :  { %2464 = vmatprep.subr.bf16.mxu1 %v2379_v4 }
 0x4cb   :  { %2465 = vmatpush3.bf16.msra.mxu1 %v2371_v27 }
 0x4e0   :  { %v2004_v30 = vpop.f32.mrf.mxu0  ;;  %v2045_v8 = vpop.f32.mrf.mxu1 }
 0x4e1   :  { %v2005_v9 = vadd.f32 %v2004_v30, %v1963_v28 }
 0x4e2   :  { %v2006_v10 = vpop.f32.mrf.mxu0  ;;  %v2047_v13 = vpop.f32.mrf.mxu1 }
 0x4e3   :  { %v2046_v14 = vadd.f32 %v2045_v8, %v2005_v9  ;;  %v2007_v41 = vadd.f32 %v2006_v10, %v3215_v50  ;;  %v2350_v8 = vrot.slane %v2345_v21, %v3053_v47  ;;  %v2340_v9 = vrot.slane %v2331_v7, %v3056_v49 }
 0x4e4   :  { %v2008_v17 = vpop.f32.mrf.mxu0  ;;  %v2049_v18 = vpop.f32.mrf.mxu1 }
 0x4e5   :  { %v2048_v16 = vadd.f32 %v2047_v13, %v2007_v41  ;;  %v2354_v17 = vrot.slane %v2345_v21, %v3056_v49 }
 0x4e6   :  { %v2009_v19 = vpop.f32.mrf.mxu0  ;;  %v2050_v20 = vpop.f32.mrf.mxu1 }
 0x520   :  { %v2086_v28 = vpop.f32.mrf.mxu0 }
 0x521   :  { %v2087_v44 = vadd.f32 %v2086_v28, %v2046_v14 }
 0x522   :  { %v2088_v2 = vpop.f32.mrf.mxu0 }
 0x523   :  { %v2117_v3 = vmul.f32 %v2106_v56, %v2087_v44  ;;  %v2089_v51 = vadd.f32 %v2088_v2, %v2048_v16 }
 0x524   :  { %v2090_v53 = vpop.f32.mrf.mxu0 }
 0x525   :  { %v2143_v50 = vadd.f32 %v2132_v45, %v2117_v3  ;;  %v2118_v54 = vmul.f32 %v2110_v48, %v2089_v51 }
 0x526   :  { %v2091_v58 = vpop.f32.mrf.mxu0 }
 0x527   :  { %v2144_v59 = vadd.f32 %v2136_v52, %v2118_v54  ;;  %v2147_v60 = vmax.f32 %v2143_v50, 0.0 }
 0x529   :  { %v2148_v23 = vmax.f32 %v2144_v59, 0.0  ;;  %v2151_v55 = vpack.c.bf16 %v2147_v60, %v2147_v60 }
 0x52b   :  { %v2152_v57 = vpack.c.bf16 %v2148_v23, %v2148_v23 }
 0x52d   :  { %2322 = vmatprep.mubr.bf16.mxu0 %v2152_v57 }
 0x52e   :  { %2323 = vmatmul.mubr.bf16.vlgmr.msra.gmra.mxu0 %v2151_v55 }
 0x56e   :  { %v2283_v38 = vpop.f32.mrf.mxu1 }
 0x570   :  { %v2285_v42 = vpop.f32.mrf.mxu1 }
 0x572   :  { %v2287_v63 = vpop.f32.mrf.mxu1 }
 0x574   :  { %v2288_v1 = vpop.f32.mrf.mxu1 }
 0x5ee   :  { %v2324_v46 = vpop.f32.mrf.mxu0 }
 0x5ef   :  { %v2325_v30 = vadd.f32 %v2324_v46, %v2283_v38 }
 0x5f0   :  { %v2326_v10 = vpop.f32.mrf.mxu0 }
 0x5f1   :  { %v2343_v13 = vmul.f32 %v2336_v29, %v2325_v30  ;;  %v2327_v14 = vadd.f32 %v2326_v10, %v2285_v42 }
 0x5f2   :  { %v2328_v18 = vpop.f32.mrf.mxu0 }
 0x5f3   :  { %v2357_v19 = vadd.f32 %v2350_v8, %v2343_v13  ;;  %v2344_v20 = vmul.f32 %v2340_v9, %v2327_v14 }
 0x5f4   :  { %v2329_v31 = vpop.f32.mrf.mxu0 }
 0x5f5   :  { %v2358_v22 = vadd.f32 %v2354_v17, %v2344_v20  ;;  %v2359_v0 = vmax.f32 %v2357_v19, 0.0 }
 0x5f7   :  { %v2360_v35 = vmax.f32 %v2358_v22, 0.0  ;;  %v2361_v26 = vpack.c.bf16 %v2359_v0, %v2359_v0 }
 0x5f9   :  { %v2362_v25 = vpack.c.bf16 %v2360_v35, %v2360_v35 }
 0x5fb   :  { %2419 = vmatprep.mubr.bf16.mxu1 %v2362_v25 }
 0x5fc   :  { %2420 = vmatmul.mubr.bf16.vlgmr.msra.gmra.mxu1 %v2361_v26 }
 0x6bc   :  { %v2466_v32 = vpop.f32.mrf.mxu1 }
 0x6be   :  { %v2467_v47 = vpop.f32.mrf.mxu1 }
 0x6bf   :  { %v2468_v33 = vadd.f32 %v2467_v47, %v2466_v32 }
 0x6c0   :  { %v2469_v6 = vpop.f32.mrf.mxu1 }
 0x6c1   :  { %v2434_v49 = vmul.f32 %v2468_v33, %v2449_v5 }
 0x6c2   :  { %v2470_v34 = vpop.f32.mrf.mxu1 }
 0x6c3   :  { %2435 = vst [vmem:[%s3256_s18] sm:$0xff] %v2434_v49 }
 0x6c4   :  { %2440 = vsyncpa [#allocation3], 1 }
 0x6c5   :  { %2441 = vsyncpa [#allocation5], 1 }
 0x6c6   :  { %2442 = vsyncpa [#allocation8], 1 }
 0x6c7   :  { %2443 = vsyncpa [#allocation11], 1 }
 0x6c8   :  { %2444 = vsyncpa [#allocation14], 1 }
 0x6c9   :  { %2445 = vsyncpa [#allocation17], 1 }
 0x6ca   :  { %2446 = vsyncpa [#allocation20], 1 }
 0x6cb   :  { %2447 = vsyncpa [#allocation23], 1 }

</bundles_post_ra>
